<compile_context>
chip_gen: v6e
topology: v6e:2x2x1
jax: 0.10.0
libtpu: 0.0.40
codegen_flags: <defaults>
</compile_context>

<pallas_src>
import math

import jax
import jax.numpy as jnp
from jax.experimental import pallas as pl
from jax.experimental.pallas import tpu as pltpu

# ---------------- problem sizes (small, synthetic) ----------------
N_NODES = 8          # number of graph nodes
N_EDGES = 16         # number of directed edges
HIDDEN = 32          # hidden_channels
N_GAUSS = 16         # num_gaussians
N_FILT = 32          # num_filters
CUTOFF = 5.0         # cutoff

PAD = 128            # lane-dense padded extent for every axis (N, E, H, G, F)

_SHIFT = math.log(2.0)   # ShiftedSoftplus shift


def _ssp(x):
    # shifted softplus: softplus(x) - log(2), numerically stable form
    return jnp.maximum(x, 0.0) + jnp.log1p(jnp.exp(-jnp.abs(x))) - _SHIFT


# ---------------- Pallas kernel: the full InteractionBlock forward ----------------
def interaction_kernel(
    x_ref,       # [PAD, PAD] bf16  node features (rows >= N_NODES are zero)
    ew_ref,      # [PAD, 1]   f32   edge weights (distances)
    ea_ref,      # [PAD, PAD] bf16  edge attributes (gaussians)
    src_ref,     # [PAD, PAD] bf16  one-hot gather matrix  (edges x nodes)
    dstn_ref,    # [PAD, PAD] bf16  scatter matrix / deg    (nodes x edges) -> mean
    w_ref,       # [5*PAD, PAD] bf16 packed weights: mlp0 | mlp2 | lin1 | lin2 | lin
    b_ref,       # [8, PAD]   f32   packed biases: rows 0..3 = mlp0, mlp2, lin2, lin
    out_ref,     # [PAD, PAD] f32
):
    bf16 = jnp.bfloat16
    f32 = jnp.float32

    w_mlp0 = w_ref[0 * PAD:1 * PAD, :]
    w_mlp2 = w_ref[1 * PAD:2 * PAD, :]
    w_lin1 = w_ref[2 * PAD:3 * PAD, :]
    w_lin2 = w_ref[3 * PAD:4 * PAD, :]
    w_lin = w_ref[4 * PAD:5 * PAD, :]

    # --- filter-generating MLP on edge attributes ---
    h = jnp.dot(ea_ref[...], w_mlp0, preferred_element_type=f32) + b_ref[0:1, :]
    h = _ssp(h)
    W = jnp.dot(h.astype(bf16), w_mlp2, preferred_element_type=f32) + b_ref[1:2, :]

    # --- cosine cutoff envelope ---
    C = 0.5 * (jnp.cos(ew_ref[...] * (math.pi / CUTOFF)) + 1.0)    # [PAD, 1]
    W = W * C                                                      # [PAD(E), PAD(F)]

    # --- CFConv: lin1, gather, message, scatter-mean, lin2 ---
    x1 = jnp.dot(x_ref[...], w_lin1, preferred_element_type=f32)                  # [N, F]
    x_j = jnp.dot(src_ref[...], x1.astype(bf16), preferred_element_type=f32)      # [E, F]
    msg = x_j * W                                                                  # [E, F]
    # dstn already carries 1/deg, so this matmul is the scatter-mean directly.
    agg = jnp.dot(dstn_ref[...], msg.astype(bf16), preferred_element_type=f32)    # [N, F]
    x2 = jnp.dot(agg.astype(bf16), w_lin2, preferred_element_type=f32) + b_ref[2:3, :]

    # --- activation + final linear ---
    x2 = _ssp(x2)
    out_ref[...] = (
        jnp.dot(x2.astype(bf16), w_lin, preferred_element_type=f32) + b_ref[3:4, :]
    )


# ---------------- wrapper: padding / one-hot construction (glue) + pallas_call ----------------
def _pad2(a, rows, cols):
    out = jnp.zeros((rows, cols), jnp.float32)
    return out.at[: a.shape[0], : a.shape[1]].set(a.astype(jnp.float32))


def interaction_block(x, edge_index, edge_weight, edge_attr, params):
    n, h = x.shape
    e = edge_weight.shape[0]
    g = edge_attr.shape[1]
    assert n <= PAD and e <= PAD and h <= PAD and g <= PAD

    # ---- zero-pad everything to lane-dense 128-wide tiles (exact) ----
    xp = _pad2(x, PAD, PAD)
    eap = _pad2(edge_attr, PAD, PAD)
    ewp = jnp.zeros((PAD, 1), jnp.float32).at[:e, 0].set(edge_weight.astype(jnp.float32))

    src = edge_index[0]
    dst = edge_index[1]
    src_oh = jnp.zeros((PAD, PAD), jnp.float32).at[jnp.arange(e), src].set(1.0)   # [E, N]
    dst_oh = jnp.zeros((PAD, PAD), jnp.float32).at[dst, jnp.arange(e)].set(1.0)   # [N, E]
    deg = jnp.maximum(dst_oh.sum(axis=1, keepdims=True), 1.0)                     # [N, 1]
    dst_oh_norm = dst_oh / deg            # fold 1/deg -> scatter matmul == scatter-mean

    # ---- consolidate parameters into one weight slab + one bias slab ----
    w_slab = jnp.concatenate(
        [
            _pad2(params["w_mlp0"], PAD, PAD),   # [G, F]
            _pad2(params["w_mlp2"], PAD, PAD),   # [F, F]
            _pad2(params["w_lin1"], PAD, PAD),   # [H, F]
            _pad2(params["w_lin2"], PAD, PAD),   # [F, H]
            _pad2(params["w_lin"], PAD, PAD),    # [H, H]
        ],
        axis=0,
    ).astype(jnp.bfloat16)                       # [5*PAD, PAD]

    b_slab = jnp.zeros((8, PAD), jnp.float32)
    b_slab = b_slab.at[0, :N_FILT].set(params["b_mlp0"][0])
    b_slab = b_slab.at[1, :N_FILT].set(params["b_mlp2"][0])
    b_slab = b_slab.at[2, :HIDDEN].set(params["b_lin2"][0])
    b_slab = b_slab.at[3, :HIDDEN].set(params["b_lin"][0])

    inputs = (
        xp.astype(jnp.bfloat16),
        ewp,
        eap.astype(jnp.bfloat16),
        src_oh.astype(jnp.bfloat16),        # exact 0/1 in bf16
        dst_oh_norm.astype(jnp.bfloat16),
        w_slab,
        b_slab,
    )

    # Advisory cost estimate for the XLA scheduler.
    flops = 7 * 2 * PAD * PAD * PAD                      # 7 MXU dots, 128^3 each
    transcendentals = 2 * 2 * PAD * PAD + PAD            # 2 SSPs (exp+log1p) + cos
    bytes_accessed = (
        sum(int(a.size) * a.dtype.itemsize for a in inputs) + PAD * PAD * 4
    )

    vmem_spec = pl.BlockSpec(memory_space=pltpu.MemorySpace.VMEM)
    out_pad = pl.pallas_call(
        interaction_kernel,
        out_shape=jax.ShapeDtypeStruct((PAD, PAD), jnp.float32),
        in_specs=[vmem_spec] * len(inputs),
        out_specs=vmem_spec,
        cost_estimate=pl.CostEstimate(
            flops=flops,
            transcendentals=transcendentals,
            bytes_accessed=bytes_accessed,
        ),
    )(*inputs)

    return out_pad[:n, :h]


# ---------------- deterministic parameter init (xavier_uniform, zero bias) ----------------
def xavier_uniform(key, fan_in, fan_out):
    limit = math.sqrt(6.0 / (fan_in + fan_out))
    # stored as [in, out] (transposed vs. PyTorch [out, in]) for right-multiplication
    return jax.random.uniform(key, (fan_in, fan_out), jnp.float32, -limit, limit)


def make_params(key):
    ks = jax.random.split(key, 5)
    return {
        "w_mlp0": xavier_uniform(ks[0], N_GAUSS, N_FILT),
        "b_mlp0": jnp.zeros((1, N_FILT), jnp.float32),
        "w_mlp2": xavier_uniform(ks[1], N_FILT, N_FILT),
        "b_mlp2": jnp.zeros((1, N_FILT), jnp.float32),
        "w_lin1": xavier_uniform(ks[2], HIDDEN, N_FILT),
        "w_lin2": xavier_uniform(ks[3], N_FILT, HIDDEN),
        "b_lin2": jnp.zeros((1, HIDDEN), jnp.float32),
        "w_lin": xavier_uniform(ks[4], HIDDEN, HIDDEN),
        "b_lin": jnp.zeros((1, HIDDEN), jnp.float32),
    }


# ---------------- pure-JAX reference (segment-mean semantics) ----------------
def reference(x, edge_index, edge_weight, edge_attr, params):
    # Weights rounded to bf16 to match the kernel's weight precision; math in f32.
    w = lambda k: params[k].astype(jnp.bfloat16).astype(jnp.float32)
    h = edge_attr @ w("w_mlp0") + params["b_mlp0"]
    h = _ssp(h)
    W = h @ w("w_mlp2") + params["b_mlp2"]
    C = 0.5 * (jnp.cos(edge_weight * math.pi / CUTOFF) + 1.0)
    W = W * C[:, None]
    x1 = x @ w("w_lin1")
    x_j = x1[edge_index[0]]
    msg = x_j * W
    summ = jax.ops.segment_sum(msg, edge_index[1], num_segments=x.shape[0])
    cnt = jax.ops.segment_sum(
        jnp.ones((edge_weight.shape[0],), jnp.float32),
        edge_index[1], num_segments=x.shape[0])
    agg = summ / jnp.maximum(cnt, 1.0)[:, None]
    x2 = agg @ w("w_lin2") + params["b_lin2"]
    x2 = _ssp(x2)
    return x2 @ w("w_lin") + params["b_lin"]


if __name__ == "__main__":
    key = jax.random.PRNGKey(0)
    k_x, k_ei, k_ew, k_ea, k_p = jax.random.split(key, 5)

    x = jax.random.normal(k_x, (N_NODES, HIDDEN), jnp.float32)
    edge_index = jax.random.randint(k_ei, (2, N_EDGES), 0, N_NODES, jnp.int32)
    edge_weight = jax.random.uniform(k_ew, (N_EDGES,), jnp.float32, 0.5, CUTOFF)
    edge_attr = jax.random.normal(k_ea, (N_EDGES, N_GAUSS), jnp.float32)
    params = make_params(k_p)

    out = interaction_block(x, edge_index, edge_weight, edge_attr, params)
    out = jax.block_until_ready(out)

    ref = reference(x, edge_index, edge_weight, edge_attr, params)
    assert out.shape == (N_NODES, HIDDEN)
    # Tolerance relaxed (bf16 matmul operands in the kernel, f32 accumulation).
    assert jnp.allclose(out, ref, atol=5e-2, rtol=5e-2), "mismatch vs reference"
    print("KERNEL_OK")
</pallas_src>

<mosaic_0001>
module attributes {stable_mosaic.version = 11 : i64} {
  func.func @interaction_kernel(%arg0: memref<128x128xbf16, #tpu.memory_space<vmem>>, %arg1: memref<128x1xf32, #tpu.memory_space<vmem>>, %arg2: memref<128x128xbf16, #tpu.memory_space<vmem>>, %arg3: memref<128x128xbf16, #tpu.memory_space<vmem>>, %arg4: memref<128x128xbf16, #tpu.memory_space<vmem>>, %arg5: memref<640x128xbf16, #tpu.memory_space<vmem>>, %arg6: memref<8x128xf32, #tpu.memory_space<vmem>>, %arg7: memref<128x128xf32, #tpu.memory_space<vmem>>) attributes {dimension_semantics = [], scalar_prefetch = 0 : i64, scratch_operands = 0 : i64, tpu.core_type = #tpu.core_type<tc>} {
    %c0 = arith.constant 0 : index
    %c0_0 = arith.constant 0 : index
    %0 = vector.load %arg5[%c0, %c0_0] : memref<640x128xbf16, #tpu.memory_space<vmem>>, vector<128x128xbf16>
    %c128 = arith.constant 128 : index
    %c0_1 = arith.constant 0 : index
    %1 = vector.load %arg5[%c128, %c0_1] : memref<640x128xbf16, #tpu.memory_space<vmem>>, vector<128x128xbf16>
    %c256 = arith.constant 256 : index
    %c0_2 = arith.constant 0 : index
    %2 = vector.load %arg5[%c256, %c0_2] : memref<640x128xbf16, #tpu.memory_space<vmem>>, vector<128x128xbf16>
    %c384 = arith.constant 384 : index
    %c0_3 = arith.constant 0 : index
    %3 = vector.load %arg5[%c384, %c0_3] : memref<640x128xbf16, #tpu.memory_space<vmem>>, vector<128x128xbf16>
    %c512 = arith.constant 512 : index
    %c0_4 = arith.constant 0 : index
    %4 = vector.load %arg5[%c512, %c0_4] : memref<640x128xbf16, #tpu.memory_space<vmem>>, vector<128x128xbf16>
    %c0_5 = arith.constant 0 : index
    %c0_6 = arith.constant 0 : index
    %5 = vector.load %arg2[%c0_5, %c0_6] : memref<128x128xbf16, #tpu.memory_space<vmem>>, vector<128x128xbf16>
    %cst = arith.constant dense<0.000000e+00> : vector<128x128xf32>
    %6 = tpu.matmul %5, %0, %cst {dimension_numbers = #tpu.dot_dimension_numbers<[1], [0], [0], [1], [0, 0, 1, 1], [], []>} : vector<128x128xbf16>, vector<128x128xbf16>, vector<128x128xf32> -> vector<128x128xf32>
    %c0_7 = arith.constant 0 : index
    %c0_8 = arith.constant 0 : index
    %7 = vector.load %arg6[%c0_7, %c0_8] : memref<8x128xf32, #tpu.memory_space<vmem>>, vector<1x128xf32>
    %8 = vector.broadcast %7 : vector<1x128xf32> to vector<128x128xf32>
    %9 = arith.addf %6, %8 : vector<128x128xf32>
    %cst_9 = arith.constant 0.000000e+00 : f32
    %10 = vector.broadcast %cst_9 : f32 to vector<128x128xf32>
    %11 = arith.maximumf %9, %10 : vector<128x128xf32>
    %12 = math.absf %9 : vector<128x128xf32>
    %cst_10 = arith.constant 0.000000e+00 : f32
    %13 = vector.broadcast %cst_10 : f32 to vector<128x128xf32>
    %14 = arith.subf %13, %12 : vector<128x128xf32>
    %15 = math.exp %14 : vector<128x128xf32>
    %16 = math.log1p %15 : vector<128x128xf32>
    %17 = arith.addf %11, %16 : vector<128x128xf32>
    %cst_11 = arith.constant 0.693147182 : f32
    %18 = vector.broadcast %cst_11 : f32 to vector<128x128xf32>
    %19 = arith.subf %17, %18 : vector<128x128xf32>
    %20 = arith.truncf %19 : vector<128x128xf32> to vector<128x128xbf16>
    %cst_12 = arith.constant dense<0.000000e+00> : vector<128x128xf32>
    %21 = tpu.matmul %20, %1, %cst_12 {dimension_numbers = #tpu.dot_dimension_numbers<[1], [0], [0], [1], [0, 0, 1, 1], [], []>} : vector<128x128xbf16>, vector<128x128xbf16>, vector<128x128xf32> -> vector<128x128xf32>
    %c1 = arith.constant 1 : index
    %c0_13 = arith.constant 0 : index
    %22 = vector.load %arg6[%c1, %c0_13] : memref<8x128xf32, #tpu.memory_space<vmem>>, vector<1x128xf32>
    %23 = vector.broadcast %22 : vector<1x128xf32> to vector<128x128xf32>
    %24 = arith.addf %21, %23 : vector<128x128xf32>
    %c0_14 = arith.constant 0 : index
    %c0_15 = arith.constant 0 : index
    %25 = vector.load %arg1[%c0_14, %c0_15] : memref<128x1xf32, #tpu.memory_space<vmem>>, vector<128x1xf32>
    %cst_16 = arith.constant 0.628318548 : f32
    %26 = vector.broadcast %cst_16 : f32 to vector<128x1xf32>
    %27 = arith.mulf %25, %26 : vector<128x1xf32>
    %28 = math.cos %27 : vector<128x1xf32>
    %cst_17 = arith.constant 1.000000e+00 : f32
    %29 = vector.broadcast %cst_17 : f32 to vector<128x1xf32>
    %30 = arith.addf %28, %29 : vector<128x1xf32>
    %cst_18 = arith.constant 5.000000e-01 : f32
    %31 = vector.broadcast %cst_18 : f32 to vector<128x1xf32>
    %32 = arith.mulf %31, %30 : vector<128x1xf32>
    %33 = vector.broadcast %32 : vector<128x1xf32> to vector<128x128xf32>
    %34 = arith.mulf %24, %33 : vector<128x128xf32>
    %c0_19 = arith.constant 0 : index
    %c0_20 = arith.constant 0 : index
    %35 = vector.load %arg0[%c0_19, %c0_20] : memref<128x128xbf16, #tpu.memory_space<vmem>>, vector<128x128xbf16>
    %cst_21 = arith.constant dense<0.000000e+00> : vector<128x128xf32>
    %36 = tpu.matmul %35, %2, %cst_21 {dimension_numbers = #tpu.dot_dimension_numbers<[1], [0], [0], [1], [0, 0, 1, 1], [], []>} : vector<128x128xbf16>, vector<128x128xbf16>, vector<128x128xf32> -> vector<128x128xf32>
    %c0_22 = arith.constant 0 : index
    %c0_23 = arith.constant 0 : index
    %37 = vector.load %arg3[%c0_22, %c0_23] : memref<128x128xbf16, #tpu.memory_space<vmem>>, vector<128x128xbf16>
    %38 = arith.truncf %36 : vector<128x128xf32> to vector<128x128xbf16>
    %cst_24 = arith.constant dense<0.000000e+00> : vector<128x128xf32>
    %39 = tpu.matmul %37, %38, %cst_24 {dimension_numbers = #tpu.dot_dimension_numbers<[1], [0], [0], [1], [0, 0, 1, 1], [], []>} : vector<128x128xbf16>, vector<128x128xbf16>, vector<128x128xf32> -> vector<128x128xf32>
    %40 = arith.mulf %39, %34 : vector<128x128xf32>
    %c0_25 = arith.constant 0 : index
    %c0_26 = arith.constant 0 : index
    %41 = vector.load %arg4[%c0_25, %c0_26] : memref<128x128xbf16, #tpu.memory_space<vmem>>, vector<128x128xbf16>
    %42 = arith.truncf %40 : vector<128x128xf32> to vector<128x128xbf16>
    %cst_27 = arith.constant dense<0.000000e+00> : vector<128x128xf32>
    %43 = tpu.matmul %41, %42, %cst_27 {dimension_numbers = #tpu.dot_dimension_numbers<[1], [0], [0], [1], [0, 0, 1, 1], [], []>} : vector<128x128xbf16>, vector<128x128xbf16>, vector<128x128xf32> -> vector<128x128xf32>
    %44 = arith.truncf %43 : vector<128x128xf32> to vector<128x128xbf16>
    %cst_28 = arith.constant dense<0.000000e+00> : vector<128x128xf32>
    %45 = tpu.matmul %44, %3, %cst_28 {dimension_numbers = #tpu.dot_dimension_numbers<[1], [0], [0], [1], [0, 0, 1, 1], [], []>} : vector<128x128xbf16>, vector<128x128xbf16>, vector<128x128xf32> -> vector<128x128xf32>
    %c2 = arith.constant 2 : index
    %c0_29 = arith.constant 0 : index
    %46 = vector.load %arg6[%c2, %c0_29] : memref<8x128xf32, #tpu.memory_space<vmem>>, vector<1x128xf32>
    %47 = vector.broadcast %46 : vector<1x128xf32> to vector<128x128xf32>
    %48 = arith.addf %45, %47 : vector<128x128xf32>
    %cst_30 = arith.constant 0.000000e+00 : f32
    %49 = vector.broadcast %cst_30 : f32 to vector<128x128xf32>
    %50 = arith.maximumf %48, %49 : vector<128x128xf32>
    %51 = math.absf %48 : vector<128x128xf32>
    %cst_31 = arith.constant 0.000000e+00 : f32
    %52 = vector.broadcast %cst_31 : f32 to vector<128x128xf32>
    %53 = arith.subf %52, %51 : vector<128x128xf32>
    %54 = math.exp %53 : vector<128x128xf32>
    %55 = math.log1p %54 : vector<128x128xf32>
    %56 = arith.addf %50, %55 : vector<128x128xf32>
    %cst_32 = arith.constant 0.693147182 : f32
    %57 = vector.broadcast %cst_32 : f32 to vector<128x128xf32>
    %58 = arith.subf %56, %57 : vector<128x128xf32>
    %59 = arith.truncf %58 : vector<128x128xf32> to vector<128x128xbf16>
    %cst_33 = arith.constant dense<0.000000e+00> : vector<128x128xf32>
    %60 = tpu.matmul %59, %4, %cst_33 {dimension_numbers = #tpu.dot_dimension_numbers<[1], [0], [0], [1], [0, 0, 1, 1], [], []>} : vector<128x128xbf16>, vector<128x128xbf16>, vector<128x128xf32> -> vector<128x128xf32>
    %c3 = arith.constant 3 : index
    %c0_34 = arith.constant 0 : index
    %61 = vector.load %arg6[%c3, %c0_34] : memref<8x128xf32, #tpu.memory_space<vmem>>, vector<1x128xf32>
    %62 = vector.broadcast %61 : vector<1x128xf32> to vector<128x128xf32>
    %63 = arith.addf %60, %62 : vector<128x128xf32>
    %c0_35 = arith.constant 0 : index
    %c0_36 = arith.constant 0 : index
    %64 = vector.load %arg7[%c0_35, %c0_36] : memref<128x128xf32, #tpu.memory_space<vmem>>, vector<128x128xf32>
    tpu.vector_store %arg7[%c0_35, %c0_36], %63 {strides = array<i32>} : memref<128x128xf32, #tpu.memory_space<vmem>>, vector<128x128xf32>,
    return
  }
}

</mosaic_0001>

<bundles_post_ra>
// kernel: tpu_custom_call.1
= control target key start
LH: loop header
LB: loop body
LE: loop exit
PB: predicated region body
PF: predicated region fallthrough
CT: control target
= control target key end

     0   :  { %12 = vsyncpa [#allocation3], 0  ;;  %s7041_s0 = inlined_call_operand.vmem [shape: bf16[128,128], index: 0, kind: input, shape index: {}]   ;;  %s7042_s1 = inlined_call_operand.vmem [shape: f32[128,1], index: 1, kind: input, shape index: {}]   ;;  %s7043_s2 = inlined_call_operand.vmem [shape: bf16[128,128], index: 2, kind: input, shape index: {}]   ;;  %s7044_s3 = inlined_call_operand.hbm [shape: bf16[128,128], index: 3, kind: input, shape index: {}]   ;;  %s7045_s4 = inlined_call_operand.hbm [shape: bf16[128,128], index: 4, kind: input, shape index: {}]   ;;  %s7046_s5 = inlined_call_operand.hbm [shape: bf16[640,128], index: 5, kind: input, shape index: {}]   ;;  %s7047_s6 = inlined_call_operand.vmem [shape: f32[8,128], index: 6, kind: input, shape index: {}]   ;;  %s7048_s7 = inlined_call_operand.hbm [shape: f32[128,128], index: 7, kind: output, shape index: {}]  }
   0x1   :  { %13 = vsyncpa [#allocation6], 0 }
   0x2   :  { %14 = vsyncpa [#allocation4], 0  ;;  %s4709_s24 = smov [#allocation5]   ;;  %s4710_s26 = smov [#allocation2]  }
   0x3   :  { %s38_s25 = sshll.u32 %s4709_s24, 4  ;;  %s26_s27 = sshll.u32 %s4710_s26, 4  ;;  %s39_s25 = int_to_ptr.vmem [resolvable:$true] %s38_s25  ;;  %s27_s27 = int_to_ptr.vmem [resolvable:$true] %s26_s27 }
   0x4   :  { %s4631_s28 = scalar_lea.vmem %s39_s25, 1024  ;;  %p4636_p1 = scmp.lt.s32.totalorder %s39_s25, %s39_s25 }
   0x5   :  { %p4632_p0 = scmp.ne.s32.totalorder %s39_s25, %s4631_s28  ;;  %p4637_p2 = scmp.lt.s32.totalorder %s4631_s28, %s4631_s28 }
   0x7   :  { %p4638_p3 = por %p4637_p2, %p4636_p1 }
   0x9   :  { %p4639_p4 = pnand %p4638_p3, %p4632_p0 }
   0xb   :  { %4642 = shalt.err (!%p4639_p4)
}
   0xc   :  { %s4711_s29 = smov 64   ;;  %s4712_s30 = smov 4  }
   0xd   :  { %44 = dma.hbm_to_vmem [thread:$0]  %s7045_s4, 1024, %s39_s25, [#allocation6], %s4711_s29, %s4711_s29, %s4712_s30  }
   0xe   :  { %s4651_s10 = scalar_lea.vmem %s27_s27, 1024  ;;  %p4656_p6 = scmp.lt.s32.totalorder %s27_s27, %s27_s27 }
   0xf   :  { %p4652_p5 = scmp.ne.s32.totalorder %s27_s27, %s4651_s10  ;;  %p4657_p7 = scmp.lt.s32.totalorder %s4651_s10, %s4651_s10 }
  0x11   :  { %p4658_p8 = por %p4657_p7, %p4656_p6 }
  0x13   :  { %p4659_p9 = pnand %p4658_p8, %p4652_p5 }
  0x15   :  { %4662 = shalt.err (!%p4659_p9)
}
  0x16   :  { %32 = dma.hbm_to_vmem [thread:$0]  %s7044_s3, 1024, %s27_s27, [#allocation3], %s4711_s29, %s4711_s29, %s4712_s30  }
  0x17   :  { %s4713_s13 = smov [#allocation7]  }
  0x18   :  { %s50_s14 = sshll.u32 %s4713_s13, 4  ;;  %s51_s14 = int_to_ptr.vmem [resolvable:$true] %s50_s14 }
  0x19   :  { %s4671_s15 = scalar_lea.vmem %s51_s14, 5120  ;;  %p4676_p11 = scmp.lt.s32.totalorder %s51_s14, %s51_s14 }
  0x1a   :  { %p4672_p10 = scmp.ne.s32.totalorder %s51_s14, %s4671_s15  ;;  %p4677_p12 = scmp.lt.s32.totalorder %s4671_s15, %s4671_s15 }
  0x1c   :  { %p4678_p13 = por %p4677_p12, %p4676_p11 }
  0x1e   :  { %p4679_p0 = pnand %p4678_p13, %p4672_p10 }
  0x20   :  { %4682 = shalt.err (!%p4679_p0)
}
  0x21   :  { %56 = dma.hbm_to_vmem [thread:$0]  %s7046_s5, 5120, %s51_s14, [#allocation6], %s4711_s29, %s4711_s29, %s4712_s30  }
  0x22   :  { %4703 = dma.done.wait [#allocation3], 1024  }
  0x23   :  { %4704 = vsyncadd [#allocation3], 4294966272 }
  0x24   :  { %4705 = dma.done.wait [#allocation6], 6144  }
  0x25   :  { %4706 = vsyncadd [#allocation6], 4294961152  ;;  %v4359_v0 = vld [vmem:[#allocation7 + $0x38] sm:$0xff]   ;;  %v4360_v1 = vld [vmem:[#allocation7 + $0x30] sm:$0xff]   ;;  %v7051_v62 = vmov 2102212464  }
  0x26   :  { %4038 = vmatprep.subr.bf16.mxu0 %v4359_v0  ;;  %v4361_v2 = vld [vmem:[#allocation7 + $0x28] sm:$0xff]   ;;  %v4362_v3 = vld [vmem:[#allocation7 + $0x20] sm:$0xff]   ;;  %v4363_v5 = vld [vmem:[#allocation7 + $0x18] sm:$0xff]  }
  0x27   :  { %4039 = vmatpush3.bf16.msra.mxu0 %v4359_v0  ;;  %v4367_v4 = vld [vmem:[%s7043_s2] sm:$0xff]   ;;  %v4364_v6 = vld [vmem:[#allocation7 + $0x10] sm:$0xff]   ;;  %v4365_v7 = vld [vmem:[#allocation7 + $0x8] sm:$0xff]  }
  0x28   :  { %4040 = vmatprep.subr.bf16.mxu0 %v4360_v1  ;;  %4054 = vmatprep.mubr.bf16.mxu0 %v4367_v4  ;;  %v4366_v8 = vld [vmem:[#allocation7] sm:$0xff]   ;;  %v4369_v9 = vld [vmem:[#allocation7 + $0xb8] sm:$0xff]   ;;  %v4368_v10 = vld [vmem:[%s7043_s2 + $0x8] sm:$0xff]  }
  0x29   :  { %v4370_v11 = vld [vmem:[#allocation7 + $0xb0] sm:$0xff]   ;;  %v4373_v13 = vld [vmem:[#allocation7 + $0xa8] sm:$0xff]   ;;  %v4372_v14 = vld [vmem:[%s7043_s2 + $0x18] sm:$0xff]  }
  0x2a   :  { %v4371_v12 = vld [vmem:[%s7043_s2 + $0x10] sm:$0xff]   ;;  %v4375_v15 = vld [vmem:[%s7043_s2 + $0x20] sm:$0xff]   ;;  %v4377_v17 = vld [vmem:[#allocation7 + $0x98] sm:$0xff]  }
  0x2b   :  { %4041 = vmatpush3.bf16.msra.mxu0 %v4360_v1  ;;  %v4374_v16 = vld [vmem:[#allocation7 + $0xa0] sm:$0xff]   ;;  %v4376_v18 = vld [vmem:[%s7043_s2 + $0x28] sm:$0xff]   ;;  %v4379_v19 = vld [vmem:[%s7043_s2 + $0x30] sm:$0xff]  }
  0x2c   :  { %4042 = vmatprep.subr.bf16.mxu0 %v4361_v2  ;;  %v4378_v20 = vld [vmem:[#allocation7 + $0x90] sm:$0xff]   ;;  %v4381_v21 = vld [vmem:[#allocation7 + $0x88] sm:$0xff]   ;;  %v4380_v22 = vld [vmem:[%s7043_s2 + $0x38] sm:$0xff]  }
  0x2d   :  { %v4383_v23 = vld [vmem:[%s7041_s0] sm:$0xff]   ;;  %v4384_v25 = vld [vmem:[%s7041_s0 + $0x8] sm:$0xff]   ;;  %v4385_v26 = vld [vmem:[%s7041_s0 + $0x10] sm:$0xff]  }
  0x2e   :  { %v4382_v24 = vld [vmem:[#allocation7 + $0x80] sm:$0xff]   ;;  %v4386_v27 = vld [vmem:[%s7041_s0 + $0x18] sm:$0xff]   ;;  %v4388_v29 = vld [vmem:[%s7041_s0 + $0x28] sm:$0xff]  }
  0x2f   :  { %4043 = vmatpush3.bf16.msra.mxu0 %v4361_v2  ;;  %v4387_v28 = vld [vmem:[%s7041_s0 + $0x20] sm:$0xff]   ;;  %v4389_v30 = vld [vmem:[%s7041_s0 + $0x30] sm:$0xff]   ;;  %v4390_v31 = vld [vmem:[%s7041_s0 + $0x38] sm:$0xff]   ;;  %v7057_v2 = vmov 683565275  }
  0x30   :  { %4044 = vmatprep.subr.bf16.mxu0 %v4362_v3  ;;  %v4391_v32 = vld [vmem:[#allocation7 + $0x78] sm:$0xff]   ;;  %v4392_v33 = vld [vmem:[#allocation7 + $0x70] sm:$0xff]   ;;  %v4393_v36 = vld [vmem:[#allocation7 + $0x68] sm:$0xff]  }
  0x31   :  { %4070 = vmatprep.subr.bf16.mxu1 %v4391_v32  ;;  %v791_v34 = vld [vmem:[%s7042_s1 + $0x70] sm:$0xff]  ;;  %v792_v38 = vld [vmem:[%s7042_s1 + $0x78] sm:$0xff]  ;;  %v789_v39 = vld [vmem:[%s7042_s1 + $0x60] sm:$0xff] }
  0x32   :  { %4071 = vmatpush3.bf16.msra.mxu1 %v4391_v32  ;;  %v4824_v35 = vmul.f32 0.62831855, %v791_v34  ;;  %v4833_v41 = vmul.f32 0.62831855, %v792_v38  ;;  %v4835_v42 = vmul.f32 0.62831855, %v789_v39 }
  0x33   :  { %4045 = vmatpush3.bf16.msra.mxu0 %v4362_v3  ;;  %4072 = vmatprep.subr.bf16.mxu1 %v4392_v33  ;;  %v4394_v43 = vld [vmem:[#allocation7 + $0x60] sm:$0xff]   ;;  %v4395_v50 = vld [vmem:[#allocation7 + $0x58] sm:$0xff]   ;;  %v790_v54 = vld [vmem:[%s7042_s1 + $0x68] sm:$0xff] }
  0x34   :  { %4046 = vmatprep.subr.bf16.mxu0 %v4363_v5  ;;  %v2254_v37 = vand.u32 2139095040, %v4824_v35  ;;  %v2357_v45 = vand.u32 2139095040, %v4833_v41  ;;  %v2048_v46 = vand.u32 2139095040, %v4835_v42  ;;  %v4396_v57 = vld [vmem:[#allocation7 + $0x50] sm:$0xff]   ;;  %v4844_v60 = vmul.f32 0.62831855, %v790_v54 }
  0x35   :  { %v2251_v61 = vand.u32 2147483647, %v4824_v35  ;;  %v4397_v4 = vld [vmem:[#allocation7 + $0x48] sm:$0xff]  }
  0x36   :  { %4073 = vmatpush3.bf16.msra.mxu1 %v4392_v33  ;;  %v2255_v40 = vshrl.u32 %v2254_v37, 23  ;;  %v2358_v48 = vshrl.u32 %v2357_v45, 23  ;;  %v2049_v49 = vshrl.u32 %v2048_v46, 23  ;;  %7083 = vst [vmem:[#allocation12_spill] sm:$0xff] %v4844_v60 }
  0x37   :  { %4047 = vmatpush3.bf16.msra.mxu0 %v4363_v5  ;;  %4074 = vmatprep.subr.bf16.mxu1 %v4393_v36  ;;  %v2258_v0 = vand.u32 8388607, %v2251_v61  ;;  %v7055_v5 = vmov 2475754826  }
  0x38   :  { %4048 = vmatprep.subr.bf16.mxu0 %v4364_v6  ;;  %v3852_v44 = vadd.s32 4294967169, %v2255_v40  ;;  %v3856_v51 = vadd.s32 4294967169, %v2358_v48  ;;  %v3844_v52 = vadd.s32 4294967169, %v2049_v49 }
  0x3a   :  { %4075 = vmatpush3.bf16.msra.mxu1 %v4393_v36  ;;  %v2261_v47 = vadd.s32 1, %v3852_v44  ;;  %v2364_v56 = vadd.s32 1, %v3856_v51  ;;  %v4842_v59 = vadd.s32 1, %v3844_v52 }
  0x3b   :  { %4049 = vmatpush3.bf16.msra.mxu0 %v4364_v6  ;;  %4076 = vmatprep.subr.bf16.mxu1 %v4394_v43 }
  0x3c   :  { %4050 = vmatprep.subr.bf16.mxu0 %v4365_v7  ;;  %vm2262_vm0 = vcmp.gt.s32.totalorder %v2261_v47, 0  ;;  %vm2365_vm1 = vcmp.gt.s32.totalorder %v2364_v56, 0  ;;  %vm2056_vm6 = vcmp.gt.s32.totalorder %v4842_v59, 0 }
  0x3d   :  { %v2263_v53 = vsel %vm2262_vm0, %v2261_v47, 0 }
  0x3e   :  { %4077 = vmatpush3.bf16.msra.mxu1 %v4394_v43  ;;  %v2265_v55 = vand.u32 31, %v2263_v53  ;;  %v2264_v1 = vshrl.u32 %v2263_v53, 5 }
  0x3f   :  { %4051 = vmatpush3.bf16.msra.mxu0 %v4365_v7  ;;  %4078 = vmatprep.subr.bf16.mxu1 %v4395_v50 }
  0x40   :  { %4052 = vmatprep.subr.bf16.mxu0 %v4366_v8  ;;  %v2266_v58 = vsub.s32 32, %v2265_v55  ;;  %v2277_v63 = vshll.u32 %v7051_v62, %v2265_v55  ;;  %v2268_v3 = vshll.u32 %v7057_v2, %v2265_v55  ;;  %v2271_v7 = vshll.u32 %v7055_v5, %v2265_v55 }
  0x41   :  { %vm2283_vm2 = vcmp.lt.s32.totalorder %v2264_v1, 1  ;;  %vm2284_vm3 = vcmp.lt.s32.totalorder %v2264_v1, 2  ;;  %vm2285_vm4 = vcmp.lt.s32.totalorder %v2264_v1, 3  ;;  %vm2286_vm5 = vcmp.lt.s32.totalorder %v2264_v1, 4 }
  0x42   :  { %4079 = vmatpush3.bf16.msra.mxu1 %v4395_v50  ;;  %v2269_v6 = vshrl.u32 %v7055_v5, %v2266_v58 }
  0x43   :  { %4053 = vmatpush3.bf16.msra.mxu0 %v4366_v8  ;;  %4080 = vmatprep.subr.bf16.mxu1 %v4396_v57  ;;  %v7053_v8 = vmov 2131351028  }
  0x44   :  { %4102 = vmatprep.subr.bf16.mxu0 %v4369_v9 }
  0x46   :  { %4055 = vmatmul.mubr.bf16.vlgmr.msra.gmra.mxu0 %v4368_v10  ;;  %4081 = vmatpush3.bf16.msra.mxu1 %v4396_v57  ;;  %v2274_v10 = vshll.u32 %v7053_v8, %v2265_v55 }
  0x47   :  { %4103 = vmatpush3.bf16.msra.mxu0 %v4369_v9  ;;  %4058 = vmatprep.mubr.bf16.mxu0 %v4371_v12  ;;  %v2272_v9 = vshrl.u32 %v7053_v8, %v2266_v58  ;;  %v2275_v12 = vshrl.u32 %v7051_v62, %v2266_v58 }
  0x48   :  { %4104 = vmatprep.subr.bf16.mxu0 %v4370_v11  ;;  %4082 = vmatprep.subr.bf16.mxu1 %v4397_v4 }
  0x4a   :  { %4083 = vmatpush3.bf16.msra.mxu1 %v4397_v4 }
  0x4b   :  { %4105 = vmatpush3.bf16.msra.mxu0 %v4370_v11  ;;  %v2259_v11 = vor.u32 8388608, %v2258_v0 }
  0x4c   :  { %4106 = vmatprep.subr.bf16.mxu0 %v4373_v13 }
  0x4e   :  { %4059 = vmatmul.mubr.bf16.gmra.mxu0 %v4372_v14 }
  0x4f   :  { %4107 = vmatpush3.bf16.msra.mxu0 %v4373_v13  ;;  %4062 = vmatprep.mubr.bf16.mxu0 %v4375_v15  ;;  %v7061_v13 = vmov 920167782  }
  0x50   :  { %4108 = vmatprep.subr.bf16.mxu0 %v4374_v16  ;;  %v2278_v14 = vshrl.u32 %v7061_v13, %v2266_v58  ;;  %v2280_v15 = vshll.u32 %v7061_v13, %v2265_v55 }
  0x53   :  { %4109 = vmatpush3.bf16.msra.mxu0 %v4374_v16  ;;  %v2270_v16 = vor.u32 %v2269_v6, %v2268_v3 }
  0x54   :  { %4110 = vmatprep.subr.bf16.mxu0 %v4377_v17 }
  0x56   :  { %4063 = vmatmul.mubr.bf16.gmra.mxu0 %v4376_v18  ;;  %v7059_v18 = vmov 1326507024  }
  0x57   :  { %4111 = vmatpush3.bf16.msra.mxu0 %v4377_v17  ;;  %4066 = vmatprep.mubr.bf16.mxu0 %v4379_v19  ;;  %v2273_v17 = vor.u32 %v2272_v9, %v2271_v7  ;;  %v2281_v19 = vshrl.u32 %v7059_v18, %v2266_v58 }
  0x58   :  { %4112 = vmatprep.subr.bf16.mxu0 %v4378_v20 }
  0x5b   :  { %4113 = vmatpush3.bf16.msra.mxu0 %v4378_v20  ;;  %v2276_v20 = vor.u32 %v2275_v12, %v2274_v10 }
  0x5c   :  { %4114 = vmatprep.subr.bf16.mxu0 %v4381_v21 }
  0x5d   :  { %v2288_v34 = vsel %vm2286_vm5, %v2276_v20, 2102212464 }
  0x5e   :  { %4067 = vmatmul.mubr.bf16.gmra.mxu0 %v4380_v22  ;;  %v4398_v22 = vld [vmem:[#allocation7 + $0x40] sm:$0xff]   ;;  %v2289_v40 = vsel %vm2285_vm4, %v2273_v17, %v2288_v34  ;;  %v2057_v34 = vsel %vm2056_vm6, %v4842_v59, 0  ;;  %vm4964_vm6 = vcmp.le.f32.partialorder %v2251_v61, 0.7853982 }
  0x5f   :  { %4115 = vmatpush3.bf16.msra.mxu0 %v4381_v21  ;;  %4118 = vmatprep.mubr.bf16.mxu0 %v4383_v23  ;;  %v2279_v21 = vor.u32 %v2278_v14, %v2277_v63  ;;  %v2282_v23 = vor.u32 %v2281_v19, %v2280_v15 }
  0x60   :  { %4116 = vmatprep.subr.bf16.mxu0 %v4382_v24  ;;  %4084 = vmatprep.subr.bf16.mxu1 %v4398_v22 }
  0x61   :  { %v2296_v32 = vsel %vm2286_vm5, %v2282_v23, 1326507024  ;;  %4085 = vmatpush3.bf16.msra.mxu1 %v4398_v22 }
  0x62   :  { %v2297_v37 = vsel %vm2285_vm4, %v2279_v21, %v2296_v32  ;;  %v7063_v32 = vand.u32 2147483647, %v4835_v42 }
  0x63   :  { %4117 = vmatpush3.bf16.msra.mxu0 %v4382_v24  ;;  %v2291_v24 = vsel %vm2283_vm2, %v2270_v16, %v2273_v17 }
  0x66   :  { %4119 = vmatmul.mubr.bf16.vlgmr.msra.gmra.mxu0 %v4384_v25  ;;  %v2299_v25 = vshll.u32 %v2259_v11, 8 }
  0x67   :  { %4122 = vmatprep.mubr.bf16.mxu0 %v4385_v26  ;;  %v2292_v26 = vsel %vm2286_vm5, %v2279_v21, 920167782  ;;  %vm2253_vm5 = vcmp.lt.s32.totalorder %v4824_v35, 0 }
  0x6e   :  { %4123 = vmatmul.mubr.bf16.gmra.mxu0 %v4386_v27  ;;  %v2295_v27 = vsel %vm2283_vm2, %v2273_v17, %v2276_v20 }
  0x6f   :  { %4126 = vmatprep.mubr.bf16.mxu0 %v4387_v28  ;;  %v2354_v28 = vand.u32 2147483647, %v4833_v41  ;;  %v2298_v43 = vsel %vm2284_vm3, %v2295_v27, %v2297_v37  ;;  %v2058_v37 = vshrl.u32 %v2057_v34, 5 }
  0x70   :  { %v4873_v46 = vmul.u32.u64.low %v2299_v25, %v2298_v43  ;;  %v4874_v47 = vmul.u32.u64.high %v2299_v25, %v2298_v43, %v4873_v46 }
  0x71   :  { %v2361_v38 = vand.u32 8388607, %v2354_v28  ;;  %vm2077_vm13 = vcmp.lt.s32.totalorder %v2058_v37, 1  ;;  %vm2078_vm14 = vcmp.lt.s32.totalorder %v2058_v37, 2  ;;  %vm2079_vm15 = vcmp.lt.s32.totalorder %v2058_v37, 3 }
  0x72   :  { %vm2080_vm0 = vcmp.lt.s32.totalorder %v2058_v37, 4 }
  0x73   :  { %v2362_v48 = vor.u32 8388608, %v2361_v38  ;;  %v2059_v38 = vand.u32 31, %v2057_v34 }
  0x75   :  { %v2060_v59 = vsub.s32 32, %v2059_v38 }
  0x76   :  { %4127 = vmatmul.mubr.bf16.gmra.mxu0 %v4388_v29  ;;  %v2366_v29 = vsel %vm2365_vm1, %v2364_v56, 0 }
  0x77   :  { %4130 = vmatprep.mubr.bf16.mxu0 %v4389_v30  ;;  %v2267_v30 = vshrl.u32 %v7057_v2, %v2266_v58  ;;  %v2367_v33 = vshrl.u32 %v2366_v29, 5  ;;  %v2368_v44 = vand.u32 31, %v2366_v29 }
  0x79   :  { %v2287_v39 = vsel %vm2283_vm2, %v2267_v30, %v2270_v16  ;;  %v2369_v52 = vsub.s32 32, %v2368_v44  ;;  %v2371_v53 = vshll.u32 %v7057_v2, %v2368_v44  ;;  %v2374_v54 = vshll.u32 %v7055_v5, %v2368_v44 }
  0x7a   :  { %v2290_v45 = vsel %vm2284_vm3, %v2287_v39, %v2289_v40  ;;  %v2377_v55 = vshll.u32 %v7053_v8, %v2368_v44  ;;  %v2380_v56 = vshll.u32 %v7051_v62, %v2368_v44  ;;  %v2383_v3 = vshll.u32 %v7061_v13, %v2368_v44 }
  0x7b   :  { %v2306_v51 = vmul.u32 %v2299_v25, %v2290_v45  ;;  %v2370_v57 = vshrl.u32 %v7057_v2, %v2369_v52  ;;  %v2372_v58 = vshrl.u32 %v7055_v5, %v2369_v52  ;;  %v2375_v63 = vshrl.u32 %v7053_v8, %v2369_v52 }
  0x7c   :  { %v2378_v0 = vshrl.u32 %v7051_v62, %v2369_v52  ;;  %v2381_v1 = vshrl.u32 %v7061_v13, %v2369_v52  ;;  %v2384_v4 = vshrl.u32 %v7059_v18, %v2369_v52  ;;  %vm2386_vm8 = vcmp.lt.s32.totalorder %v2367_v33, 1 }
  0x7d   :  { %v2373_v7 = vor.u32 %v2372_v58, %v2371_v53  ;;  %v2376_v9 = vor.u32 %v2375_v63, %v2374_v54  ;;  %vm2387_vm9 = vcmp.lt.s32.totalorder %v2367_v33, 2  ;;  %vm2388_vm10 = vcmp.lt.s32.totalorder %v2367_v33, 3 }
  0x7e   :  { %4131 = vmatmul.mubr.bf16.gmra.mxu0 %v4390_v31  ;;  %v2293_v31 = vsel %vm2285_vm4, %v2276_v20, %v2292_v26  ;;  %v2379_v10 = vor.u32 %v2378_v0, %v2377_v55  ;;  %v2382_v11 = vor.u32 %v2381_v1, %v2380_v56  ;;  %v2385_v12 = vor.u32 %v2384_v4, %v2383_v3 }
  0x7f   :  { %v2294_v36 = vsel %vm2284_vm3, %v2291_v24, %v2293_v31  ;;  %vm2389_vm11 = vcmp.lt.s32.totalorder %v2367_v33, 4  ;;  %v2390_v15 = vsel %vm2386_vm8, %v2370_v57, %v2373_v7  ;;  %v2394_v19 = vsel %vm2386_vm8, %v2373_v7, %v2376_v9 }
  0x80   :  { %v4877_v49 = vmul.u32.u64.low %v2299_v25, %v2294_v36  ;;  %v4878_v50 = vmul.u32.u64.high %v2299_v25, %v2294_v36, %v4877_v49  ;;  %v2391_v17 = vsel %vm2389_vm11, %v2379_v10, 2102212464  ;;  %v2395_v20 = vsel %vm2389_vm11, %v2382_v11, 920167782 }
  0x81   :  { %v2392_v21 = vsel %vm2388_vm10, %v2376_v9, %v2391_v17  ;;  %v2396_v22 = vsel %vm2388_vm10, %v2379_v10, %v2395_v20  ;;  %v2398_v23 = vsel %vm2386_vm8, %v2376_v9, %v2379_v10  ;;  %v2399_v24 = vsel %vm2389_vm11, %v2385_v12, 1326507024 }
  0x82   :  { %vm2308_vm7 = vc.u32 %v4874_v47, %v4877_v49  ;;  %v2309_v6 = vadd.s32 1, %v4878_v50  ;;  %v2393_v26 = vsel %vm2387_vm9, %v2390_v15, %v2392_v21  ;;  %v2397_v27 = vsel %vm2387_vm9, %v2394_v19, %v2396_v22 }
  0x83   :  { %v2400_v29 = vsel %vm2388_vm10, %v2382_v11, %v2399_v24  ;;  %v2402_v31 = vshll.u32 %v2362_v48, 8  ;;  %v2151_v39 = vand.u32 2139095040, %v4844_v60  ;;  %v2052_v48 = vand.u32 8388607, %v7063_v32 }
  0x84   :  { %v2310_v14 = vsel %vm2308_vm7, %v2309_v6, %v4878_v50  ;;  %v2401_v30 = vsel %vm2387_vm9, %v2398_v23, %v2400_v29  ;;  %v2062_v50 = vshll.u32 %v7057_v2, %v2059_v38  ;;  %v2068_v52 = vshll.u32 %v7053_v8, %v2059_v38 }
  0x85   :  { %v2311_v16 = vadd.s32 %v2310_v14, %v2306_v51  ;;  %v4906_v40 = vmul.u32.u64.low %v2402_v31, %v2401_v30  ;;  %v4907_v43 = vmul.u32.u64.high %v2402_v31, %v2401_v30, %v4906_v40  ;;  %v2409_v46 = vmul.u32 %v2402_v31, %v2393_v26 }
  0x86   :  { %v4909_v44 = vmul.u32.u64.low %v2402_v31, %v2397_v27  ;;  %v4910_v45 = vmul.u32.u64.high %v2402_v31, %v2397_v27, %v4909_v44  ;;  %v2065_v51 = vshll.u32 %v7055_v5, %v2059_v38  ;;  %v2071_v53 = vshll.u32 %v7051_v62, %v2059_v38 }
  0x87   :  { %v2312_v25 = vadd.s32 536870912, %v2311_v16  ;;  %v2053_v55 = vor.u32 8388608, %v2052_v48  ;;  %v2061_v56 = vshrl.u32 %v7057_v2, %v2060_v59  ;;  %v2063_v57 = vshrl.u32 %v7055_v5, %v2060_v59 }
  0x88   :  { %vm2411_vm12 = vc.u32 %v4907_v43, %v4909_v44  ;;  %v2412_v58 = vadd.s32 1, %v4910_v45  ;;  %v2066_v63 = vshrl.u32 %v7053_v8, %v2060_v59  ;;  %v2069_v0 = vshrl.u32 %v7051_v62, %v2060_v59 }
  0x89   :  { %v4903_v36 = vshrl.u32 %v2312_v25, 30  ;;  %v2064_v3 = vor.u32 %v2063_v57, %v2062_v50  ;;  %v2072_v4 = vshrl.u32 %v7061_v13, %v2060_v59  ;;  %v2074_v6 = vshll.u32 %v7061_v13, %v2059_v38 }
  0x8a   :  { %v2413_v7 = vsel %vm2411_vm12, %v2412_v58, %v4910_v45  ;;  %v2067_v9 = vor.u32 %v2066_v63, %v2065_v51  ;;  %v2070_v10 = vor.u32 %v2069_v0, %v2068_v52  ;;  %v2075_v11 = vshrl.u32 %v7059_v18, %v2060_v59 }
  0x8b   :  { %v2314_v33 = vshll.u32 %v4903_v36, 30  ;;  %v2414_v14 = vadd.s32 %v2413_v7, %v2409_v46  ;;  %v2073_v15 = vor.u32 %v2072_v4, %v2071_v53  ;;  %v2081_v20 = vsel %vm2077_vm13, %v2061_v56, %v2064_v3 }
  0x8c   :  { %v2082_v21 = vsel %vm2080_vm0, %v2070_v10, 2102212464  ;;  %v2085_v23 = vsel %vm2077_vm13, %v2064_v3, %v2067_v9  ;;  %v2152_v25 = vshrl.u32 %v2151_v39, 23  ;;  %v2089_v30 = vsel %vm2077_vm13, %v2067_v9, %v2070_v10 }
  0x8d   :  { %v2315_v54 = vsub.s32 %v2311_v16, %v2314_v33  ;;  %v2076_v16 = vor.u32 %v2075_v11, %v2074_v6  ;;  %v2415_v19 = vadd.s32 536870912, %v2414_v14  ;;  %v2083_v22 = vsel %vm2079_vm15, %v2067_v9, %v2082_v21 }
  0x8e   :  { %v2086_v24 = vsel %vm2080_vm0, %v2073_v15, 920167782  ;;  %v2084_v31 = vsel %vm2078_vm14, %v2081_v20, %v2083_v22  ;;  %v2093_v40 = vshll.u32 %v2053_v55, 8  ;;  %v2307_v45 = vadd.s32 %v4877_v49, %v4874_v47 }
  0x8f   :  { %v2317_v1 = vsub.s32 0, %v2315_v54  ;;  %v4934_v27 = vshrl.u32 %v2415_v19, 30  ;;  %v2087_v29 = vsel %vm2079_vm15, %v2070_v10, %v2086_v24  ;;  %v2090_v38 = vsel %vm2080_vm0, %v2076_v16, 1326507024 }
  0x90   :  { %v2088_v34 = vsel %vm2078_vm14, %v2085_v23, %v2087_v29  ;;  %v2091_v39 = vsel %vm2079_vm15, %v2073_v15, %v2090_v38  ;;  %v3848_v47 = vadd.s32 4294967169, %v2152_v25  ;;  %v2100_v0 = vmul.u32 %v2093_v40, %v2084_v31 }
  0x91   :  { %v3853_v12 = vmin.u32 %v2317_v1, %v2315_v54  ;;  %v2417_v33 = vshll.u32 %v4934_v27, 30  ;;  %v2092_v48 = vsel %vm2078_vm14, %v2089_v30, %v2091_v39  ;;  %v787_v30 = vld [vmem:[%s7042_s1 + $0x50] sm:$0xff]  ;;  %v2337_v38 = vsub.s32 4, %v4903_v36 }
  0x92   :  { %v4945_v59 = vmul.u32.u64.low %v2093_v40, %v2088_v34  ;;  %v4946_v50 = vmul.u32.u64.high %v2093_v40, %v2088_v34, %v4945_v59  ;;  %v4951_v55 = vmul.u32.u64.low %v2093_v40, %v2092_v48  ;;  %v4952_v57 = vmul.u32.u64.high %v2093_v40, %v2092_v48, %v4951_v55 }
  0x93   :  { %v2319_v17 = vclz %v3853_v12  ;;  %v4949_v56 = vsub.s32 %v2414_v14, %v2417_v33  ;;  %v2338_v33 = vsel %vm2253_vm5, %v2337_v38, %v4903_v36  ;;  %vm2343_vm7 = vweird.f32 %v4824_v35 }
  0x94   :  { %v2103_v37 = vadd.s32 1, %v4946_v50  ;;  %vm2102_vm2 = vc.u32 %v4952_v57, %v4945_v59  ;;  %v2340_v36 = vsel %vm4964_vm6, 0, %v2338_v33  ;;  %vm2356_vm11 = vcmp.lt.s32.totalorder %v4833_v41, 0 }
  0x95   :  { %v3854_v26 = vadd.s32 4294967294, %v2319_v17  ;;  %v2420_v63 = vsub.s32 0, %v4949_v56  ;;  %v7050_v17 = vand.u32 2147483647, %v4844_v60  ;;  %vm2047_vm12 = vcmp.lt.s32.totalorder %v4835_v42, 0 }
  0x96   :  { %v2104_v10 = vsel %vm2102_vm2, %v2103_v37, %v4946_v50  ;;  %vm5113_vm13 = vcmp.le.f32.partialorder %v2354_v28, 0.7853982 }
  0x97   :  { %vm3855_vm1 = vcmp.lt.s32.totalorder %v3854_v26, 0  ;;  %v3857_v4 = vmin.u32 %v2420_v63, %v4949_v56  ;;  %v2105_v11 = vadd.s32 %v2104_v10, %v2100_v0  ;;  %v2155_v61 = vand.u32 8388607, %v7050_v17 }
  0x98   :  { %v2322_v46 = vsel %vm3855_vm1, 0, %v3854_v26  ;;  %v2410_v26 = vadd.s32 %v4909_v44, %v4907_v43  ;;  %v4986_v43 = vmul.f32 0.62831855, %v787_v30  ;;  %v4991_v44 = vld [vmem:[%s7047_s6] ss:$0 sm:$0xff] }
  0x99   :  { %v2323_v51 = vsub.s32 32, %v2322_v46  ;;  %v2324_v52 = vshll.u32 %v2315_v54, %v2322_v46  ;;  %v2327_v53 = vsub.s32 4294967266, %v2322_v46  ;;  %v2158_v54 = vadd.s32 1, %v3848_v47 }
  0x9a   :  { %v2422_v9 = vclz %v3857_v4  ;;  %v2106_v15 = vadd.s32 536870912, %v2105_v11  ;;  %7087 = vst [vmem:[#allocation14_spill] sm:$0xff] %v4986_v43  ;;  %v2156_v48 = vor.u32 8388608, %v2155_v61  ;;  %v7049_v47 = vand.u32 2147483647, %v4986_v43 }
  0x9b   :  { %v2325_v49 = vshrl.u32 %v2307_v45, %v2323_v51  ;;  %v2328_v58 = vadd.s32 127, %v2327_v53  ;;  %vm2159_vm4 = vcmp.gt.s32.totalorder %v2158_v54, 0  ;;  %v4720_v45 = vmov 0   ;;  %v788_v51 = vld [vmem:[%s7042_s1 + $0x58] sm:$0xff] }
  0x9c   :  { %v3858_v14 = vadd.s32 4294967294, %v2422_v9  ;;  %v4968_v22 = vshrl.u32 %v2106_v15, 30  ;;  %v2160_v23 = vsel %vm2159_vm4, %v2158_v54, 0  ;;  %4357 = vset.pattern.permute.xlu0 %v4720_v45  ;;  %4358 = vset.pattern.permute.xlu1 %v4720_v45  ;;  %v5014_v0 = vshll.u32 %v2156_v48, 8 }
  0x9d   :  { %v2326_v1 = vor.u32 %v2325_v49, %v2324_v52  ;;  %v2329_v3 = vshll.u32 %v2328_v58, 23  ;;  %v4982_v34 = vand.u32 31, %v2160_v23  ;;  %v5016_v37 = vmul.f32 0.62831855, %v788_v51 }
  0x9e   :  { %vm3859_vm3 = vcmp.lt.s32.totalorder %v3858_v14, 0  ;;  %v2108_v40 = vshll.u32 %v4968_v22, 30  ;;  %7090 = vst [vmem:[#allocation17_spill] sm:$0xff] %v5014_v0 }
  0x9f   :  { %v2330_v6 = vor.u32 4788187, %v2329_v3  ;;  %v2333_v7 = vcvt.s32.f32 %v2326_v1  ;;  %v2425_v21 = vsel %vm3859_vm3, 0, %v3858_v14  ;;  %7086 = vst [vmem:[#allocation13_spill] sm:$0xff] %v4982_v34  ;;  %v4998_v50 = vsub.s32 32, %v4982_v34  ;;  %7091 = vst [vmem:[#allocation18_spill] sm:$0xff] %v5016_v37 }
  0xa0   :  { %v2426_v29 = vsub.s32 32, %v2425_v21  ;;  %v2430_v31 = vsub.s32 4294967266, %v2425_v21  ;;  %v2427_v39 = vshll.u32 %v4949_v56, %v2425_v21  ;;  %v5003_v55 = vsub.s32 %v2105_v11, %v2108_v40 }
  0xa1   :  { %v2331_v12 = vand.u32 2147483647, %v2330_v6  ;;  %7088 = vst [vmem:[#allocation15_spill] sm:$0xff] %v4998_v50  ;;  %v1842_v56 = vand.u32 2139095040, %v4986_v43  ;;  %v5021_v3 = vadd.s32 %v4945_v59, %v4952_v57  ;;  %v2165_v4 = vshll.u32 %v7057_v2, %v4982_v34 }
  0xa2   :  { %v2428_v46 = vshrl.u32 %v2410_v26, %v2426_v29  ;;  %v2431_v53 = vadd.s32 127, %v2430_v31  ;;  %7089 = vst [vmem:[#allocation16_spill] sm:$0xff] %v5003_v55  ;;  %v2166_v54 = vshrl.u32 %v7055_v5, %v4998_v50  ;;  %v2111_v10 = vsub.s32 0, %v5003_v55 }
  0xa3   :  { %v2334_v16 = vmul.f32 %v2333_v7, %v2331_v12  ;;  %7092 = vst [vmem:[#allocation19_spill] sm:$0xff] %v5021_v3  ;;  %v2344_v7 = vand.u32 3, %v2340_v36  ;;  %v5030_v11 = vand.u32 8388607, %v7049_v47  ;;  %v5035_v59 = vshrl.u32 %v2160_v23, 5 }
  0xa4   :  { %v5012_v63 = vor.u32 %v2428_v46, %v2427_v39  ;;  %v2432_v9 = vshll.u32 %v2431_v53, 23  ;;  %v5037_v57 = vshrl.u32 %v1842_v56, 23  ;;  %v5043_v19 = vshrl.u32 %v7057_v2, %v4998_v50 }
  0xa5   :  { %v2335_v20 = vxor.u32 2147483648, %v2334_v16  ;;  %7093 = vst [vmem:[#allocation20_spill] sm:$0xff] %v5030_v11  ;;  %7094 = vst [vmem:[#allocation21_spill] sm:$0xff] %v5035_v59  ;;  %v2169_v23 = vshrl.u32 %v7053_v8, %v4998_v50  ;;  %vm2346_vm8 = vcmp.eq.s32.totalorder %v2344_v7, 0  ;;  %v5055_v30 = vmin.u32 %v2111_v10, %v5003_v55 }
  0xa6   :  { %7095 = vst [vmem:[#allocation22_spill] sm:$0xff] %v5037_v57  ;;  %7096 = vst [vmem:[#allocation23_spill] sm:$0xff] %v5043_v19  ;;  %v5052_v61 = vor.u32 4788187, %v2432_v9  ;;  %v2171_v31 = vshll.u32 %v7053_v8, %v4982_v34  ;;  %vm2349_vm9 = vcmp.eq.s32.totalorder %v2344_v7, 2  ;;  %vm2345_vm10 = vcmp.lt.s32.totalorder %v2344_v7, 2 }
  0xa7   :  { %v2336_v24 = vsel %vm2253_vm5, %v2335_v20, %v2334_v16  ;;  %v2436_v16 = vcvt.s32.f32 %v5012_v63  ;;  %v2168_v20 = vshll.u32 %v7055_v5, %v4982_v34  ;;  %v2172_v36 = vshrl.u32 %v7051_v62, %v4998_v50 }
  0xa8   :  { %v2339_v25 = vsel %vm4964_vm6, %v4824_v35, %v2336_v24  ;;  %v2175_v7 = vshrl.u32 %v7061_v13, %v4998_v50  ;;  %v2113_v35 = vclz %v5055_v30 }
  0xa9   :  { %4431 = vcosq.f32 %v2339_v25  ;;  %v5066_v53 = vor.u32 %v2169_v23, %v2168_v20 }
  0xaa   :  { %4433 = vsinq.f32 %v2339_v25  ;;  %v5048_v25 = vor.u32 %v2166_v54, %v2165_v4  ;;  %v2174_v54 = vshll.u32 %v7051_v62, %v4982_v34 }
  0xab   :  { %7099 = vst [vmem:[#allocation26_spill] sm:$0xff] %v5066_v53 }
  0xac   :  { %7097 = vst [vmem:[#allocation24_spill] sm:$0xff] %v5048_v25 }
  0xb6   :  { %v4432_v26 = vpop.eup %4431 }
  0xb7   :  { %v4434_v38 = vpop.eup %4433  ;;  %v2350_v48 = vxor.u32 2147483648, %v4432_v26 }
  0xb8   :  { %v2347_v46 = vxor.u32 2147483648, %v4434_v38 }
  0xba   :  { %v2348_v4 = vsel %vm2346_vm8, %v4432_v26, %v2347_v46 }
 0x106   :  { %v4056_v52 = vpop.f32.mrf.mxu0 }
 0x107   :  { %v5007_v49 = vadd.f32 %v4056_v52, %v4991_v44 }
 0x108   :  { %v300_v58 = vpop.f32.mrf.mxu0 }
 0x109   :  { %v381_v1 = vand.u32 2147483647, %v5007_v49  ;;  %v5063_v33 = vadd.f32 %v4991_v44, %v300_v58  ;;  %v2351_v58 = vsel %vm2349_vm9, %v2350_v48, %v4434_v38  ;;  %v2434_v48 = vand.u32 2147483647, %v5052_v61 }
 0x10a   :  { %v4057_v6 = vpop.f32.mrf.mxu0  ;;  %v2352_v10 = vsel %vm2345_vm10, %v2348_v4, %v2351_v58 }
 0x10b   :  { %v397_v12 = vsub.f32 0.0, %v381_v1  ;;  %v5033_v14 = vadd.f32 %v4057_v6, %v4991_v44  ;;  %7098 = vst [vmem:[#allocation25_spill] sm:$0xff] %v5063_v33 }
 0x10c   :  { %v303_v15 = vpop.f32.mrf.mxu0 }
 0x10d   :  { %v415_v21 = vmul.f32 1.442695, %v397_v12  ;;  %v382_v24 = vand.u32 2147483647, %v5033_v14  ;;  %v379_v12 = vand.u32 2147483647, %v5063_v33  ;;  %v5086_v23 = vadd.f32 %v4991_v44, %v303_v15 }
 0x10e   :  { %v4060_v29 = vpop.f32.mrf.mxu0 }
 0x10f   :  { %4435 = vpow2.f32 %v415_v21  ;;  %v398_v40 = vsub.f32 0.0, %v382_v24  ;;  %v5060_v45 = vadd.f32 %v4060_v29, %v4991_v44  ;;  %v2353_v24 = vsel %vm2343_vm7, nan, %v2352_v10  ;;  %7100 = vst [vmem:[#allocation27_spill] sm:$0xff] %v5086_v23 }
 0x110   :  { %v316_v39 = vpop.f32.mrf.mxu0  ;;  %v2471_v46 = vadd.f32 1.0, %v2353_v24  ;;  %v395_v15 = vsub.f32 0.0, %v379_v12  ;;  %v5108_v12 = vor.u32 %v2175_v7, %v2174_v54  ;;  %v2440_v7 = vsub.s32 4, %v4934_v27 }
 0x111   :  { %v417_v51 = vmul.f32 1.442695, %v398_v40  ;;  %v385_v52 = vand.u32 2147483647, %v5060_v45  ;;  %v5071_v56 = vadd.f32 %v4991_v44, %v316_v39 }
 0x112   :  { %v4061_v1 = vpop.f32.mrf.mxu0  ;;  %v2487_v10 = vmul.f32 0.5, %v2471_v46  ;;  %7102 = vst [vmem:[#allocation29_spill] sm:$0xff] %v5108_v12 }
 0x113   :  { %4437 = vpow2.f32 %v417_v51  ;;  %v401_v6 = vsub.f32 0.0, %v385_v52  ;;  %v5077_v9 = vadd.f32 %v4061_v1, %v4991_v44  ;;  %v383_v20 = vand.u32 2147483647, %v5071_v56 }
 0x114   :  { %v319_v21 = vpop.f32.mrf.mxu0  ;;  %v5095_v1 = vor.u32 %v2172_v36, %v2171_v31  ;;  %2561 = vperm.xlu0 %4357, %v2487_v10   ;;  %v411_v10 = vmul.f32 1.442695, %v395_v15 }
 0x115   :  { %v423_v26 = vmul.f32 1.442695, %v401_v6  ;;  %v386_v29 = vand.u32 2147483647, %v5077_v9  ;;  %v5090_v38 = vadd.f32 %v4991_v44, %v319_v21  ;;  %v399_v40 = vsub.f32 0.0, %v383_v20 }
 0x116   :  { %v4064_v39 = vpop.f32.mrf.mxu0  ;;  %7101 = vst [vmem:[#allocation28_spill] sm:$0xff] %v5095_v1  ;;  %v380_v20 = vand.u32 2147483647, %v5086_v23 }
 0x117   :  { %4439 = vpow2.f32 %v423_v26  ;;  %v402_v51 = vsub.f32 0.0, %v386_v29  ;;  %v384_v52 = vand.u32 2147483647, %v5090_v38  ;;  %v419_v4 = vmul.f32 1.442695, %v399_v40 }
 0x118   :  { %v5098_v58 = vadd.f32 %v4064_v39, %v4991_v44  ;;  %v332_v6 = vpop.f32.mrf.mxu0  ;;  %v2437_v39 = vmul.f32 %v2436_v16, %v2434_v48  ;;  %v396_v28 = vsub.f32 0.0, %v380_v20  ;;  %v2131_v48 = vsub.s32 4, %v4968_v22 }
 0x119   :  { %v425_v61 = vmul.f32 1.442695, %v402_v51  ;;  %v400_v21 = vsub.f32 0.0, %v384_v52  ;;  %v5103_v30 = vadd.f32 %v4991_v44, %v332_v6  ;;  %4441 = vpow2.f32 %v419_v4 }
 0x11a   :  { %v389_v31 = vand.u32 2147483647, %v5098_v58  ;;  %v4065_v36 = vpop.f32.mrf.mxu0  ;;  %v3846_v4 = vadd.s32 4294967294, %v2113_v35  ;;  %v2438_v47 = vxor.u32 2147483648, %v2437_v39  ;;  %v413_v17 = vmul.f32 1.442695, %v396_v28 }
 0x11b   :  { %4443 = vpow2.f32 %v425_v61  ;;  %v421_v26 = vmul.f32 1.442695, %v400_v21  ;;  %v387_v29 = vand.u32 2147483647, %v5103_v30  ;;  %v5122_v52 = vadd.f32 %v4065_v36, %v4991_v44 }
 0x11c   :  { %v5119_v46 = vpop.eup %4435  ;;  %v405_v51 = vsub.f32 0.0, %v389_v31  ;;  %v335_v54 = vpop.f32.mrf.mxu0  ;;  %vm3847_vm14 = vcmp.lt.s32.totalorder %v3846_v4, 0  ;;  %v5150_v28 = vsel %vm2047_vm12, %v2131_v48, %v4968_v22 }
 0x11d   :  { %v461_v6 = vadd.f32 1.0, %v5119_v46  ;;  %4445 = vpow2.f32 %v421_v26  ;;  %v403_v21 = vsub.f32 0.0, %v387_v29  ;;  %v390_v63 = vand.u32 2147483647, %v5122_v52  ;;  %7106 = vst [vmem:[#allocation31_spill] sm:$0xff] %v5150_v28 }
 0x11e   :  { %v431_v61 = vmul.f32 1.442695, %v405_v51  ;;  %v4068_v16 = vpop.f32.mrf.mxu0  ;;  %v5130_v36 = vadd.f32 %v4991_v44, %v335_v54  ;;  %v464_v22 = vmul.f32 -0.5, %v5119_v46 }
 0x11f   :  { %4447 = vlog2.f32 %v461_v6  ;;  %v427_v15 = vmul.f32 1.442695, %v403_v21  ;;  %v406_v20 = vsub.f32 0.0, %v390_v63  ;;  %v5135_v26 = vadd.f32 %v4068_v16, %v4991_v44 }
 0x120   :  { %v5132_v35 = vpop.eup %4437  ;;  %4449 = vpow2.f32 %v431_v61  ;;  %v348_v29 = vpop.f32.mrf.mxu0  ;;  %v2441_v6 = vsel %vm2356_vm11, %v2440_v7, %v4934_v27  ;;  %v388_v62 = vand.u32 2147483647, %v5130_v36 }
 0x121   :  { %7105 = vst [vmem:[#allocation30_spill] sm:$0xff] %v5135_v26  ;;  %4451 = vpow2.f32 %v411_v10  ;;  %v470_v51 = vadd.f32 1.0, %v5132_v35  ;;  %v433_v54 = vmul.f32 1.442695, %v406_v20  ;;  %v2439_v10 = vsel %vm2356_vm11, %v2438_v47, %v2437_v39 }
 0x122   :  { %4453 = vpow2.f32 %v427_v15  ;;  %v5142_v8 = vpop.f32.mrf.mxu0  ;;  %v404_v27 = vsub.f32 0.0, %v388_v62  ;;  %v393_v7 = vand.u32 2147483647, %v5135_v26  ;;  %v2443_v16 = vsel %vm5113_vm13, 0, %v2441_v6 }
 0x123   :  { %4455 = vlog2.f32 %v470_v51  ;;  %v5161_v47 = vadd.f32 %v4991_v44, %v348_v29  ;;  %v5163_v39 = vsel %vm3847_vm14, 0, %v3846_v4  ;;  %v2442_v51 = vsel %vm5113_vm13, %v4833_v41, %v2439_v10 }
 0x124   :  { %v5152_v21 = vpop.eup %4439  ;;  %4457 = vpow2.f32 %v433_v54  ;;  %v5155_v63 = vpop.f32.mrf.mxu0  ;;  %v429_v48 = vmul.f32 1.442695, %v404_v27  ;;  %v409_v20 = vsub.f32 0.0, %v393_v7  ;;  %v467_v10 = vand.u32 2147483647, %v5119_v46 }
 0x125   :  { %4459 = vpow2.f32 %v413_v17  ;;  %v497_v15 = vadd.f32 1.0, %v5152_v21  ;;  %7107 = vst [vmem:[#allocation32_spill] sm:$0xff] %v5161_v47  ;;  %v473_v17 = vmul.f32 -0.5, %v5132_v35  ;;  %v391_v6 = vand.u32 2147483647, %v5161_v47 }
 0x126   :  { %v5166_v62 = vpop.f32.mrf.mxu0  ;;  %v5171_v54 = vpop.eup %4441  ;;  %v439_v13 = vmul.f32 1.442695, %v409_v20  ;;  %vm5201_vm15 = vcmp.lt.f32.partialorder %v467_v10, 0.0004427343  ;;  %v500_v24 = vmul.f32 -0.5, %v5152_v21  ;;  %vm2446_vm11 = vweird.f32 %v4833_v41 }
 0x127   :  { %4461 = vlog2.f32 %v497_v15  ;;  %v479_v7 = vadd.f32 1.0, %v5171_v54  ;;  %v465_v15 = vadd.f32 1.0, %v464_v22  ;;  %v474_v5 = vadd.f32 1.0, %v473_v17 }
 0x128   :  { %v5176_v4 = vpop.eup %4443  ;;  %4463 = vpow2.f32 %v429_v48  ;;  %v5181_v40 = vpop.f32.mrf.mxu0  ;;  %v476_v48 = vand.u32 2147483647, %v5132_v35  ;;  %v5197_v22 = vand.u32 3, %v2443_v16  ;;  %v482_v11 = vmul.f32 -0.5, %v5171_v54 }
 0x129   :  { %v506_v2 = vadd.f32 1.0, %v5176_v4  ;;  %4465 = vcosq.f32 %v2442_v51  ;;  %v475_v37 = vmul.f32 %v5132_v35, %v474_v5  ;;  %v509_v5 = vmul.f32 -0.5, %v5176_v4 }
 0x12a   :  { %v5186_v31 = vpop.eup %4445  ;;  %v5189_v32 = vpop.f32.mrf.mxu0  ;;  %4467 = vsinq.f32 %v2442_v51  ;;  %vm5217_vm0 = vcmp.lt.f32.partialorder %v476_v48, 0.0004427343  ;;  %v485_v12 = vand.u32 2147483647, %v5171_v54  ;;  %v483_v25 = vadd.f32 1.0, %v482_v11 }
 0x12b   :  { %4469 = vlog2.f32 %v479_v7  ;;  %v488_v61 = vadd.f32 1.0, %v5186_v31  ;;  %v407_v7 = vsub.f32 0.0, %v391_v6  ;;  %vm2449_vm9 = vcmp.eq.s32.totalorder %v5197_v22, 0 }
 0x12c   :  { %v4448_v29 = vpop.eup %4447  ;;  %4471 = vlog2.f32 %v506_v2  ;;  %v5195_v43 = vpop.f32.mrf.mxu0  ;;  %v466_v2 = vmul.f32 %v5119_v46, %v465_v15  ;;  %v501_v46 = vadd.f32 1.0, %v500_v24  ;;  %vm5268_vm2 = vcmp.lt.f32.partialorder %v485_v12, 0.0004427343 }
 0x12d   :  { %v5199_v20 = vpop.eup %4449  ;;  %4473 = vpow2.f32 %v439_v13  ;;  %v503_v13 = vand.u32 2147483647, %v5152_v21  ;;  %v463_v15 = vmul.f32 0.6931472, %v4448_v29  ;;  %v435_v48 = vmul.f32 1.442695, %v407_v7 }
 0x12e   :  { %v5206_v27 = vpop.eup %4451  ;;  %v533_v18 = vadd.f32 1.0, %v5199_v20  ;;  %v5212_v60 = vpop.f32.mrf.mxu0  ;;  %4475 = vlog2.f32 %v488_v61  ;;  %v491_v29 = vmul.f32 -0.5, %v5186_v31  ;;  %v5237_v61 = vadd.f32 %v5142_v8, %v4991_v44 }
 0x12f   :  { %v5214_v10 = vpop.eup %4453  ;;  %v469_v24 = vsel %vm5201_vm15, %v466_v2, %v463_v15  ;;  %v536_v53 = vmul.f32 -0.5, %v5199_v20  ;;  %vm5250_vm1 = vcmp.lt.f32.partialorder %v503_v13, 0.0004427343  ;;  %v502_v51 = vmul.f32 %v5152_v21, %v501_v46 }
 0x130   :  { %v4456_v6 = vpop.eup %4455  ;;  %v5225_v57 = vpop.f32.mrf.mxu0  ;;  %4477 = vlog2.f32 %v533_v18  ;;  %v515_v35 = vadd.f32 1.0, %v5214_v10  ;;  %v512_v18 = vand.u32 2147483647, %v5176_v4  ;;  %v518_v28 = vmul.f32 -0.5, %v5214_v10 }
 0x131   :  { %v5227_v0 = vpop.eup %4457  ;;  %v472_v47 = vmul.f32 0.6931472, %v4456_v6  ;;  %v510_v6 = vadd.f32 1.0, %v509_v5  ;;  %v492_v11 = vadd.f32 1.0, %v491_v29  ;;  %v494_v2 = vand.u32 2147483647, %v5186_v31 }
 0x132   :  { %v5231_v19 = vpop.eup %4459  ;;  %v542_v26 = vadd.f32 1.0, %v5227_v0  ;;  %v5239_v16 = vpop.f32.mrf.mxu0  ;;  %4479 = vlog2.f32 %v515_v35  ;;  %v7114_v13 = vmax.f32 %v5007_v49, 0.0  ;;  %vm5272_vm3 = vcmp.lt.f32.partialorder %v512_v18, 0.0004427343 }
 0x133   :  { %v478_v5 = vsel %vm5217_vm0, %v475_v37, %v472_v47  ;;  %v394_v46 = vand.u32 2147483647, %v5237_v61  ;;  %v484_v3 = vmul.f32 %v5171_v54, %v483_v25  ;;  %v537_v59 = vadd.f32 1.0, %v536_v53 }
 0x134   :  { %v4462_v7 = vpop.eup %4461  ;;  %4481 = vlog2.f32 %v542_v26  ;;  %v5246_v1 = vpop.f32.mrf.mxu0  ;;  %v589_v50 = vadd.f32 %v469_v24, %v7114_v13  ;;  %v539_v49 = vand.u32 2147483647, %v5199_v20  ;;  %v511_v12 = vmul.f32 %v5176_v4, %v510_v6 }
 0x135   :  { %v5248_v8 = vpop.eup %4463  ;;  %4483 = vpow2.f32 %v435_v48  ;;  %v499_v48 = vmul.f32 0.6931472, %v4462_v7  ;;  %v519_v47 = vadd.f32 1.0, %v518_v28  ;;  %v521_v18 = vand.u32 2147483647, %v5214_v10 }
 0x136   :  { %v5255_v35 = vpop.eup %4465  ;;  %v524_v26 = vadd.f32 1.0, %v5248_v8  ;;  %v5260_v15 = vpop.f32.mrf.mxu0  ;;  %v410_v7 = vsub.f32 0.0, %v394_v46  ;;  %v7120_v13 = vmax.f32 %v5033_v14, 0.0  ;;  %v5288_v25 = vmul.f32 %v5186_v31, %v492_v11 }
 0x137   :  { %v5262_v33 = vpop.eup %4467  ;;  %v545_v53 = vmul.f32 -0.5, %v5227_v0  ;;  %v505_v28 = vsel %vm5250_vm1, %v502_v51, %v499_v48  ;;  %vm5298_vm4 = vcmp.lt.f32.partialorder %v494_v2, 0.0004427343  ;;  %v527_v14 = vmul.f32 -0.5, %v5248_v8 }
 0x138   :  { %v4470_v29 = vpop.eup %4469  ;;  %4485 = vlog2.f32 %v524_v26  ;;  %v5279_v17 = vpop.f32.mrf.mxu0  ;;  %v590_v55 = vadd.f32 %v478_v5, %v7120_v13  ;;  %v5305_v31 = vadd.f32 %v4991_v44, %v5155_v63  ;;  %v538_v5 = vmul.f32 %v5199_v20, %v537_v59 }
 0x139   :  { %7119 = vst [vmem:[#allocation33_spill] sm:$0xff] %v5279_v17  ;;  %v4472_v37 = vpop.eup %4471  ;;  %v5294_v17 = vadd.f32 -0.6931472, %v589_v50  ;;  %v481_v6 = vmul.f32 0.6931472, %v4470_v29  ;;  %v520_v48 = vmul.f32 %v5214_v10, %v519_v47  ;;  %v7127_v20 = vmax.f32 %v5060_v45, 0.0 }
 0x13a   :  { %v5283_v24 = vpop.eup %4473  ;;  %v5292_v26 = vpop.f32.mrf.mxu0  ;;  %v508_v11 = vmul.f32 0.6931472, %v4472_v37  ;;  %vm5308_vm5 = vcmp.lt.f32.partialorder %v539_v49, 0.0004427343  ;;  %v441_v23 = vmul.f32 1.442695, %v410_v7  ;;  %v5329_v47 = vpack.c.bf16 %v5189_v32, %v5166_v62 }
 0x13b   :  { %v4476_v2 = vpop.eup %4475  ;;  %vm5315_vm6 = vcmp.lt.f32.partialorder %v521_v18, 0.0004427343  ;;  %v548_v44 = vand.u32 2147483647, %v5227_v0  ;;  %v569_v63 = vadd.f32 1.0, %v5283_v24  ;;  %v593_v49 = vadd.f32 %v505_v28, %v7127_v20 }
 0x13c   :  { %v5312_v51 = vpop.f32.mrf.mxu0  ;;  %v5321_v59 = vadd.f32 -0.6931472, %v590_v55  ;;  %v546_v37 = vadd.f32 1.0, %v545_v53  ;;  %v530_v7 = vand.u32 2147483647, %v5248_v8  ;;  %v528_v13 = vadd.f32 1.0, %v527_v14 }
 0x13d   :  { %v4478_v29 = vpop.eup %4477  ;;  %4487 = vpow2.f32 %v441_v23  ;;  %v392_v10 = vand.u32 2147483647, %v5305_v31  ;;  %7128 = vst [vmem:[#allocation34_spill] sm:$0xff] %v5329_v47  ;;  %v487_v54 = vsel %vm5268_vm2, %v484_v3, %v481_v6  ;;  %v514_v55 = vsel %vm5272_vm3, %v511_v12, %v508_v11 }
 0x13e   :  { %v490_v45 = vmul.f32 0.6931472, %v4476_v2  ;;  %v5337_v53 = vpack.c.bf16 %v5195_v43, %v5181_v40  ;;  %v4132_v28 = vpop.f32.mrf.mxu0  ;;  %v535_v23 = vmul.f32 0.6931472, %v4478_v29  ;;  %4489 = vlog2.f32 %v569_v63 }
 0x13f   :  { %v4480_v18 = vpop.eup %4479  ;;  %v572_v20 = vmul.f32 -0.5, %v5283_v24  ;;  %v408_v32 = vsub.f32 0.0, %v392_v10  ;;  %v547_v3 = vmul.f32 %v5227_v0, %v546_v37  ;;  %vm5343_vm7 = vcmp.lt.f32.partialorder %v548_v44, 0.0004427343 }
 0x140   :  { %v517_v47 = vmul.f32 0.6931472, %v4480_v18  ;;  %v5347_v12 = vadd.f32 -0.6931472, %v593_v49  ;;  %v7131_v43 = vmax.f32 %v5071_v56, 0.0  ;;  %v443_v11 = vadd.f32 1.0, %v5206_v27  ;;  %v5362_v49 = vpop.f32.mrf.mxu0 }
 0x141   :  { %v4482_v14 = vpop.eup %4481  ;;  %vm5351_vm8 = vcmp.lt.f32.partialorder %v530_v7, 0.0004427343  ;;  %v7134_v2 = vmax.f32 %v5077_v9, 0.0  ;;  %v496_v0 = vsel %vm5298_vm4, %v5288_v25, %v490_v45  ;;  %v529_v44 = vmul.f32 %v5248_v8, %v528_v13 }
 0x142   :  { %v5340_v62 = vpop.eup %4483  ;;  %v544_v34 = vmul.f32 0.6931472, %v4482_v14  ;;  %v591_v40 = vadd.f32 %v487_v54, %v7131_v43  ;;  %v437_v29 = vmul.f32 1.442695, %v408_v32  ;;  %v541_v54 = vsel %vm5308_vm5, %v538_v5, %v535_v23 }
 0x143   :  { %v594_v63 = vadd.f32 %v514_v55, %v7134_v2  ;;  %v573_v37 = vadd.f32 1.0, %v572_v20  ;;  %v551_v7 = vadd.f32 1.0, %v5340_v62  ;;  %v554_v10 = vmul.f32 -0.5, %v5340_v62 }
 0x144   :  { %v523_v9 = vsel %vm5315_vm6, %v520_v48, %v517_v47  ;;  %v550_v8 = vsel %vm5343_vm7, %v547_v3, %v544_v34  ;;  %4491 = vpow2.f32 %v437_v29  ;;  %v446_v25 = vmul.f32 -0.5, %v5206_v27  ;;  %v4133_v47 = vpop.f32.mrf.mxu0 }
 0x145   :  { %v4486_v56 = vpop.eup %4485  ;;  %v5374_v4 = vadd.f32 -0.6931472, %v591_v40  ;;  %v7135_v5 = vmax.f32 %v5090_v38, 0.0  ;;  %v575_v13 = vand.u32 2147483647, %v5283_v24  ;;  %4493 = vlog2.f32 %v443_v11 }
 0x146   :  { %v7136_v18 = vmax.f32 %v5098_v58, 0.0  ;;  %v526_v45 = vmul.f32 0.6931472, %v4486_v56  ;;  %v376_v48 = vmax.f32 %v5305_v31, 0.0  ;;  %v452_v46 = vadd.f32 1.0, %v5231_v19 }
 0x147   :  { %v592_v50 = vadd.f32 %v496_v0, %v7135_v5  ;;  %vm2448_vm10 = vcmp.lt.s32.totalorder %v5197_v22, 2  ;;  %v7137_v14 = vmax.f32 %v5103_v30, 0.0  ;;  %v7138_v38 = vmax.f32 %v5122_v52, 0.0 }
 0x148   :  { %v597_v55 = vadd.f32 %v541_v54, %v7136_v18  ;;  %4495 = vlog2.f32 %v551_v7  ;;  %v555_v32 = vadd.f32 1.0, %v554_v10  ;;  %v5389_v58 = vadd.f32 -0.6931472, %v594_v63  ;;  %v7173_v10 = vld [vmem:[#allocation30_spill] sm:$0xff] }
 0x149   :  { %v595_v23 = vadd.f32 %v523_v9, %v7137_v14  ;;  %v598_v20 = vadd.f32 %v550_v8, %v7138_v38  ;;  %v5392_v34 = vmul.f32 %v5283_v24, %v573_v37  ;;  %v447_v3 = vadd.f32 1.0, %v446_v25  ;;  %v7145_v25 = vld [vmem:[#allocation16_spill] sm:$0xff] }
 0x14a   :  { %4497 = vlog2.f32 %v452_v46  ;;  %v5394_v21 = vadd.f32 -0.6931472, %v592_v50  ;;  %v5398_v30 = vpack.c.bf16 %v5239_v16, %v5212_v60  ;;  %v5402_v52 = vpack.c.bf16 %v5246_v1, %v5225_v57  ;;  %v5406_v40 = vpop.eup %4487 }
 0x14b   :  { %v5404_v43 = vpack.c.bf16 %v4133_v47, %v4132_v28  ;;  %v5408_v11 = vadd.f32 -0.6931472, %v597_v55  ;;  %v532_v24 = vsel %vm5351_vm8, %v529_v44, %v526_v45  ;;  %v557_v2 = vand.u32 2147483647, %v5340_v62  ;;  %v4490_v6 = vpop.eup %4489  ;;  %v7149_v45 = vld [vmem:[#allocation19_spill] sm:$0xff] }
 0x14c   :  { %v5415_v63 = vpack.c.bf16 %v5292_v26, %v5260_v15  ;;  %v5417_v60 = vadd.f32 -0.6931472, %v595_v23  ;;  %v5419_v16 = vadd.f32 -0.6931472, %v598_v20  ;;  %vm5421_vm13 = vcmp.lt.f32.partialorder %v575_v13, 0.0004427343 }
 0x14d   :  { %v5426_v1 = vmul.f32 %v5340_v62, %v555_v32  ;;  %v578_v28 = vadd.f32 1.0, %v5406_v40  ;;  %4134 = vmatprep.subr.bf16.mxu1 %v5404_v43  ;;  %v448_v0 = vmul.f32 %v5206_v27, %v447_v3  ;;  %v449_v15 = vand.u32 2147483647, %v5206_v27  ;;  %v7146_v13 = vld [vmem:[#allocation21_spill] sm:$0xff] }
 0x14e   :  { %v455_v26 = vmul.f32 -0.5, %v5231_v19  ;;  %v2450_v44 = vxor.u32 2147483648, %v5262_v33  ;;  %v7141_v29 = vmax.f32 %v5130_v36, 0.0  ;;  %v458_v62 = vand.u32 2147483647, %v5231_v19  ;;  %v7168_v23 = vld [vmem:[#allocation29_spill] sm:$0xff] }
 0x14f   :  { %4499 = vlog2.f32 %v578_v28  ;;  %vm2452_vm14 = vcmp.eq.s32.totalorder %v5197_v22, 2  ;;  %v620_v54 = vpack.c.bf16 %v5321_v59, %v5294_v17  ;;  %v2453_v27 = vxor.u32 2147483648, %v5255_v35  ;;  %v7172_v17 = vld [vmem:[#allocation22_spill] sm:$0xff] }
 0x150   :  { %v596_v56 = vadd.f32 %v532_v24, %v7141_v29  ;;  %v2451_v37 = vsel %vm2449_vm9, %v5255_v35, %v2450_v44  ;;  %v7142_v7 = vand.u32 2147483647, %v4835_v42  ;;  %v2117_v36 = vsub.s32 32, %v5163_v39 }
 0x151   :  { %v5451_v9 = vmul.f32 0.6931472, %v4490_v6  ;;  %v581_v8 = vmul.f32 -0.5, %v5406_v40  ;;  %v2118_v5 = vshll.u32 %v7145_v25, %v5163_v39  ;;  %v2121_v50 = vsub.s32 4294967266, %v5163_v39  ;;  %v5464_v47 = vpop.eup %4491 }
 0x152   :  { %vm5446_vm15 = vcmp.le.f32.partialorder %v7142_v7, 0.7853982  ;;  %vm2180_vm0 = vcmp.lt.s32.totalorder %v7146_v13, 1  ;;  %vm5458_vm1 = vcmp.lt.f32.partialorder %v449_v15, 0.0004427343  ;;  %v456_v18 = vadd.f32 1.0, %v455_v26  ;;  %v4494_v20 = vpop.eup %4493  ;;  %v2782_v15 = vpop.f32.mrf.mxu0 }
 0x153   :  { %v2454_v55 = vsel %vm2452_vm14, %v2453_v27, %v5262_v33  ;;  %v2119_v46 = vshrl.u32 %v7149_v45, %v2117_v36  ;;  %v5466_v14 = vadd.f32 -0.6931472, %v596_v56  ;;  %vm5468_vm2 = vcmp.lt.f32.partialorder %v458_v62, 0.0004427343  ;;  %v7152_v56 = vld [vmem:[#allocation13_spill] sm:$0xff]  ;;  %v7154_v27 = vld [vmem:[#allocation15_spill] sm:$0xff] }
 0x154   :  { %v2455_v39 = vsel %vm2448_vm10, %v2451_v37, %v2454_v55  ;;  %v2122_v38 = vadd.s32 127, %v2121_v50  ;;  %v584_v32 = vand.u32 2147483647, %v5406_v40  ;;  %v560_v3 = vadd.f32 1.0, %v5464_v47 }
 0x155   :  { %v621_v33 = vpack.c.bf16 %v5394_v21, %v5374_v4  ;;  %v2456_v24 = vsel %vm2446_vm11, nan, %v2455_v39  ;;  %vm2181_vm3 = vcmp.lt.s32.totalorder %v7146_v13, 2  ;;  %v582_v28 = vadd.f32 1.0, %v581_v8  ;;  %v4496_v44 = vpop.eup %4495  ;;  %v7175_v21 = vld [vmem:[#allocation32_spill] sm:$0xff] }
 0x156   :  { %v445_v6 = vmul.f32 0.6931472, %v4494_v20  ;;  %v2472_v26 = vadd.f32 1.0, %v2456_v24  ;;  %v2120_v22 = vor.u32 %v2119_v46, %v2118_v5  ;;  %v577_v29 = vsel %vm5421_vm13, %v5392_v34, %v5451_v9  ;;  %v7158_v46 = vld [vmem:[#allocation25_spill] sm:$0xff] }
 0x157   :  { %4501 = vlog2.f32 %v560_v3  ;;  %v7153_v62 = vmov 920167782   ;;  %v7155_v41 = vmov 1326507024   ;;  %v4498_v36 = vpop.eup %4497  ;;  %v457_v25 = vmul.f32 %v5231_v19, %v456_v18  ;;  %v7162_v18 = vld [vmem:[#allocation31_spill] sm:$0xff]  ;;  %v7177_v9 = vld [vmem:[#allocation33_spill] sm:$0xff] }
 0x158   :  { %v2177_v37 = vshll.u32 %v7153_v62, %v7152_v56  ;;  %v2178_v7 = vshrl.u32 %v7155_v41, %v7154_v27  ;;  %v451_v8 = vsel %vm5458_vm1, %v448_v0, %v445_v6  ;;  %v2488_v5 = vmul.f32 0.5, %v2472_v26 }
 0x159   :  { %v2123_v50 = vshll.u32 %v2122_v38, 23  ;;  %vm5492_vm4 = vcmp.lt.f32.partialorder %v584_v32, 0.0004427343  ;;  %v454_v45 = vmul.f32 0.6931472, %v4498_v36  ;;  %v7159_v39 = vmax.f32 %v7158_v46, 0.0 }
 0x15a   :  { %v5499_v3 = vpack.c.bf16 %v2782_v15, %v5362_v49  ;;  %vm5501_vm5 = vcmp.lt.f32.partialorder %v557_v2, 0.0004427343  ;;  %v583_v0 = vmul.f32 %v5406_v40, %v582_v28  ;;  %2566 = vperm.xlu0 %4357, %v2488_v5   ;;  %v2127_v35 = vcvt.s32.f32 %v2120_v22  ;;  %v7163_v2 = vld [vmem:[#allocation27_spill] sm:$0xff]  ;;  %v7165_v22 = vld [vmem:[#allocation28_spill] sm:$0xff] }
 0x15b   :  { %v587_v20 = vadd.f32 %v451_v8, %v7159_v39  ;;  %v2124_v19 = vor.u32 4788187, %v2123_v50  ;;  %v2134_v38 = vsel %vm5446_vm15, 0, %v7162_v18  ;;  %v553_v32 = vmul.f32 0.6931472, %v4496_v44  ;;  %v7166_v8 = vld [vmem:[#allocation26_spill] sm:$0xff] }
 0x15c   :  { %v563_v6 = vmul.f32 -0.5, %v5464_v47  ;;  %v460_v49 = vsel %vm5468_vm2, %v457_v25, %v454_v45  ;;  %v2179_v15 = vor.u32 %v2178_v7, %v2177_v37  ;;  %v7164_v26 = vmax.f32 %v7163_v2, 0.0  ;;  %v4500_v40 = vpop.eup %4499  ;;  %v7167_v44 = vld [vmem:[#allocation24_spill] sm:$0xff]  ;;  %v7169_v45 = vld [vmem:[#allocation23_spill] sm:$0xff] }
 0x15d   :  { %v2125_v27 = vand.u32 2147483647, %v2124_v19  ;;  %vm2182_vm6 = vcmp.lt.s32.totalorder %v7146_v13, 3  ;;  %vm2183_vm7 = vcmp.lt.s32.totalorder %v7146_v13, 4  ;;  %v3771_v28 = vadd.f32 -0.6931472, %v587_v20 }
 0x15e   :  { %v588_v56 = vadd.f32 %v460_v49, %v7164_v26  ;;  %v2185_v36 = vsel %vm2183_vm7, %v7165_v22, 2102212464  ;;  %v2188_v5 = vsel %vm2180_vm0, %v7167_v44, %v7166_v8  ;;  %v2189_v25 = vsel %vm2183_vm7, %v7168_v23, 920167782 }
 0x15f   :  { %v580_v37 = vmul.f32 0.6931472, %v4500_v40  ;;  %v2128_v50 = vmul.f32 %v2127_v35, %v2125_v27  ;;  %v2184_v46 = vsel %vm2180_vm0, %v7169_v45, %v7167_v44  ;;  %v2186_v39 = vsel %vm2182_vm6, %v7166_v8, %v2185_v36  ;;  %v7170_v40 = vld [vmem:[#allocation17_spill] sm:$0xff] }
 0x160   :  { %v3772_v7 = vadd.f32 -0.6931472, %v588_v56  ;;  %v2190_v20 = vsel %vm2182_vm6, %v7165_v22, %v2189_v25  ;;  %v2192_v19 = vsel %vm2180_vm0, %v7166_v8, %v7165_v22  ;;  %v2193_v18 = vsel %vm2183_vm7, %v2179_v15, 1326507024 }
 0x161   :  { %v564_v35 = vadd.f32 1.0, %v563_v6  ;;  %v2129_v2 = vxor.u32 2147483648, %v2128_v50  ;;  %v2191_v26 = vsel %vm2181_vm3, %v2188_v5, %v2190_v20  ;;  %v586_v56 = vsel %vm5492_vm4, %v583_v0, %v580_v37 }
 0x162   :  { %v619_v49 = vpack.c.bf16 %v3772_v7, %v3771_v28  ;;  %v2194_v27 = vsel %vm2182_vm6, %v7168_v23, %v2193_v18  ;;  %v5544_v36 = vmul.u32.u64.low %v7170_v40, %v2191_v26  ;;  %v5545_v44 = vmul.u32.u64.high %v7170_v40, %v2191_v26, %v5544_v36 }
 0x163   :  { %v566_v15 = vand.u32 2147483647, %v5464_v47  ;;  %v2130_v6 = vsel %vm2047_vm12, %v2129_v2, %v2128_v50  ;;  %v2187_v28 = vsel %vm2181_vm3, %v2184_v46, %v2186_v39  ;;  %v2195_v55 = vsel %vm2181_vm3, %v2192_v19, %v2194_v27 }
 0x164   :  { %4086 = vmatprep.mubr.bf16.mxu1 %v619_v49  ;;  %v559_v0 = vsel %vm5501_vm5, %v5426_v1, %v553_v32  ;;  %v2133_v22 = vsel %vm5446_vm15, %v4835_v42, %v2130_v6  ;;  %v5565_v8 = vmul.u32.u64.low %v7170_v40, %v2195_v55  ;;  %v5566_v5 = vmul.u32.u64.high %v7170_v40, %v2195_v55, %v5565_v8  ;;  %v4502_v23 = vpop.eup %4501 }
 0x165   :  { %4087 = vmatmul.mubr.bf16.vlgmr.msra.gmra.mxu1 %v620_v54  ;;  %v7171_v13 = vmax.f32 %v5237_v61, 0.0  ;;  %v565_v37 = vmul.f32 %v5464_v47, %v564_v35  ;;  %4503 = vcosq.f32 %v2133_v22  ;;  %v3836_v59 = vadd.s32 4294967169, %v7172_v17 }
 0x166   :  { %4090 = vmatprep.mubr.bf16.mxu1 %v621_v33  ;;  %4135 = vmatpush3.bf16.msra.mxu1 %v5404_v43  ;;  %v562_v1 = vmul.f32 0.6931472, %v4502_v23  ;;  %4505 = vsinq.f32 %v2133_v22  ;;  %v2203_v54 = vmul.u32 %v7170_v40, %v2187_v28  ;;  %v2206_v61 = vadd.s32 1, %v5545_v44 }
 0x167   :  { %v602_v25 = vadd.f32 %v586_v56, %v7171_v13  ;;  %4136 = vmatprep.subr.bf16.mxu1 %v5499_v3  ;;  %v7174_v24 = vmax.f32 %v7173_v10, 0.0  ;;  %v7176_v43 = vmax.f32 %v7175_v21, 0.0  ;;  %vm567_vm12 = vcmp.lt.f32.partialorder %v566_v15, 0.0004427343  ;;  %v7183_v13 = vld [vmem:[#allocation18_spill] sm:$0xff] }
 0x168   :  { %v1849_v33 = vadd.s32 1, %v3836_v59  ;;  %v568_v32 = vsel %vm567_vm12, %v565_v37, %v562_v1  ;;  %v623_v7 = vpack.c.bf16 %v5466_v14, %v5417_v60  ;;  %v5590_v50 = vand.u32 3, %v2134_v38 }
 0x169   :  { %v601_v4 = vadd.f32 %v577_v29, %v7174_v24  ;;  %v599_v47 = vadd.f32 %v559_v0, %v7176_v43  ;;  %vm2205_vm8 = vc.u32 %v5566_v5, %v5544_v36  ;;  %v5594_v45 = vadd.f32 -0.6931472, %v602_v25 }
 0x16a   :  { %v600_v34 = vadd.f32 %v568_v32, %v376_v48  ;;  %4137 = vmatpush3.bf16.msra.mxu1 %v5499_v3  ;;  %v2207_v57 = vsel %vm2205_vm8, %v2206_v61, %v5545_v44  ;;  %vm1850_vm9 = vcmp.gt.s32.totalorder %v1849_v33, 0  ;;  %v2814_v29 = vpack.c.bf16 %v5312_v51, %v7177_v9 }
 0x16b   :  { %v622_v60 = vpack.c.bf16 %v5389_v58, %v5347_v12  ;;  %4138 = vmatprep.subr.bf16.mxu1 %v5415_v63  ;;  %v2208_v14 = vadd.s32 %v2207_v57, %v2203_v54  ;;  %v1851_v38 = vsel %vm1850_vm9, %v1849_v33, 0  ;;  %v5605_v46 = vadd.f32 -0.6931472, %v601_v4  ;;  %v7178_v12 = vld [vmem:[#allocation20_spill] sm:$0xff] }
 0x16c   :  { %v3783_v39 = vadd.f32 -0.6931472, %v599_v47  ;;  %v624_v31 = vpack.c.bf16 %v5419_v16, %v5408_v11  ;;  %v1853_v48 = vand.u32 31, %v1851_v38  ;;  %vm2139_vm10 = vcmp.lt.s32.totalorder %v5590_v50, 2 }
 0x16d   :  { %4091 = vmatmul.mubr.bf16.gmra.mxu1 %v622_v60  ;;  %vm2140_vm11 = vcmp.eq.s32.totalorder %v5590_v50, 0  ;;  %vm2143_vm13 = vcmp.eq.s32.totalorder %v5590_v50, 2  ;;  %v2209_v51 = vadd.s32 536870912, %v2208_v14  ;;  %v1847_v58 = vor.u32 8388608, %v7178_v12  ;;  %v4399_v50 = vld [vmem:[#allocation2] sm:$0xff]  }
 0x16e   :  { %v3784_v3 = vadd.f32 -0.6931472, %v600_v34  ;;  %4094 = vmatprep.mubr.bf16.mxu1 %v623_v7  ;;  %4139 = vmatpush3.bf16.msra.mxu1 %v5415_v63  ;;  %v626_v20 = vpack.c.bf16 %v5594_v45, %v5605_v46  ;;  %vm2137_vm14 = vweird.f32 %v4835_v42  ;;  %v5617_v11 = vshrl.u32 %v1851_v38, 5 }
 0x16f   :  { %v1854_v16 = vsub.s32 32, %v1853_v48  ;;  %4140 = vmatprep.subr.bf16.mxu1 %v2814_v29  ;;  %v5619_v19 = vshrl.u32 %v2209_v51, 30  ;;  %v7179_v18 = vmov 683565275   ;;  %v7180_v49 = vmov 2475754826  }
 0x170   :  { %v1856_v35 = vshll.u32 %v7179_v18, %v1853_v48  ;;  %v1859_v2 = vshll.u32 %v7180_v49, %v1853_v48  ;;  %v7181_v26 = vmov 2131351028   ;;  %v7182_v40 = vmov 2102212464  }
 0x171   :  { %v1862_v56 = vshll.u32 %v7181_v26, %v1853_v48  ;;  %v1857_v27 = vshrl.u32 %v7180_v49, %v1854_v16  ;;  %v1860_v63 = vshrl.u32 %v7181_v26, %v1854_v16  ;;  %v1863_v44 = vshrl.u32 %v7182_v40, %v1854_v16 }
 0x172   :  { %v1865_v15 = vshll.u32 %v7182_v40, %v1853_v48  ;;  %v2211_v6 = vshll.u32 %v5619_v19, 30  ;;  %v1866_v28 = vshrl.u32 %v7153_v62, %v1854_v16  ;;  %v1868_v55 = vshll.u32 %v7153_v62, %v1853_v48  ;;  %4141 = vmatpush3.bf16.msra.mxu1 %v2814_v29  ;;  %v4504_v37 = vpop.eup %4503 }
 0x173   :  { %v1869_v0 = vshrl.u32 %v7155_v41, %v1854_v16  ;;  %v625_v22 = vpack.c.bf16 %v3784_v3, %v3783_v39  ;;  %v1855_v8 = vshrl.u32 %v7179_v18, %v1854_v16  ;;  %v5633_v23 = vshll.u32 %v1847_v58, 8  ;;  %4142 = vmatprep.subr.bf16.mxu1 %v5398_v30  ;;  %v4506_v61 = vpop.eup %4505  ;;  %v785_v3 = vld [vmem:[%s7042_s1 + $0x40] sm:$0xff]  ;;  %v7184_v16 = vld [vmem:[#allocation34_spill] sm:$0xff] }
 0x174   :  { %v1942_v25 = vand.u32 2147483647, %v7183_v13  ;;  %v5637_v17 = vsub.s32 %v2208_v14, %v2211_v6  ;;  %v1858_v59 = vor.u32 %v1857_v27, %v1856_v35  ;;  %v1861_v1 = vor.u32 %v1860_v63, %v1859_v2 }
 0x175   :  { %v1945_v54 = vand.u32 2139095040, %v7183_v13  ;;  %v2144_v10 = vxor.u32 2147483648, %v4504_v37  ;;  %v1864_v24 = vor.u32 %v1863_v44, %v1862_v56  ;;  %v1867_v4 = vor.u32 %v1866_v28, %v1865_v15  ;;  %4095 = vmatmul.mubr.bf16.gmra.mxu1 %v624_v31 }
 0x176   :  { %vm1871_vm15 = vcmp.lt.s32.totalorder %v5617_v11, 1  ;;  %v2141_v21 = vxor.u32 2147483648, %v4506_v61  ;;  %v2214_v43 = vsub.s32 0, %v5637_v17  ;;  %v1870_v47 = vor.u32 %v1869_v0, %v1868_v55  ;;  %4098 = vmatprep.mubr.bf16.mxu1 %v625_v22  ;;  %4143 = vmatpush3.bf16.msra.mxu1 %v5398_v30 }
 0x177   :  { %vm1874_vm0 = vcmp.lt.s32.totalorder %v5617_v11, 4  ;;  %v2145_v33 = vsel %vm2143_vm13, %v2144_v10, %v4506_v61  ;;  %vm1873_vm1 = vcmp.lt.s32.totalorder %v5617_v11, 3  ;;  %v1875_v32 = vsel %vm1871_vm15, %v1855_v8, %v1858_v59  ;;  %4144 = vmatprep.subr.bf16.mxu1 %v5402_v52 }
 0x178   :  { %v1876_v7 = vsel %vm1874_vm0, %v1864_v24, 2102212464  ;;  %v2142_v34 = vsel %vm2140_vm11, %v4504_v37, %v2141_v21  ;;  %v3849_v57 = vmin.u32 %v2214_v43, %v5637_v17  ;;  %vm1872_vm2 = vcmp.lt.s32.totalorder %v5617_v11, 2  ;;  %v4400_v37 = vld [vmem:[#allocation2 + $0x8] sm:$0xff]  }
 0x179   :  { %v1879_v30 = vsel %vm1871_vm15, %v1858_v59, %v1861_v1  ;;  %v2146_v9 = vsel %vm2139_vm10, %v2142_v34, %v2145_v33  ;;  %v1877_v29 = vsel %vm1873_vm1, %v1861_v1, %v1876_v7  ;;  %v1880_v60 = vsel %vm1874_vm0, %v1867_v4, 920167782  ;;  %v7185_v59 = vld [vmem:[#allocation12_spill] sm:$0xff] }
 0x17a   :  { %v1946_v14 = vshrl.u32 %v1945_v54, 23  ;;  %v2147_v38 = vsel %vm2137_vm14, nan, %v2146_v9  ;;  %v2216_v39 = vclz %v3849_v57  ;;  %v1878_v31 = vsel %vm1872_vm2, %v1875_v32, %v1877_v29  ;;  %4145 = vmatpush3.bf16.msra.mxu1 %v5402_v52 }
 0x17b   :  { %v1881_v48 = vsel %vm1873_vm1, %v1864_v24, %v1880_v60  ;;  %v2469_v51 = vadd.f32 1.0, %v2147_v38  ;;  %v1883_v58 = vsel %vm1871_vm15, %v1861_v1, %v1864_v24  ;;  %v1884_v42 = vsel %vm1874_vm0, %v1870_v47, 1326507024  ;;  %4146 = vmatprep.subr.bf16.mxu1 %v7184_v16 }
 0x17c   :  { %v1882_v12 = vsel %vm1872_vm2, %v1879_v30, %v1881_v48  ;;  %v3850_v35 = vadd.s32 4294967294, %v2216_v39  ;;  %v1885_v52 = vsel %vm1873_vm1, %v1867_v4, %v1884_v42  ;;  %v2204_v63 = vadd.s32 %v5544_v36, %v5566_v5 }
 0x17d   :  { %v5684_v2 = vmul.u32.u64.low %v5633_v23, %v1882_v12  ;;  %v5685_v56 = vmul.u32.u64.high %v5633_v23, %v1882_v12, %v5684_v2  ;;  %v2485_v27 = vmul.f32 0.5, %v2469_v51  ;;  %v1886_v44 = vsel %vm1872_vm2, %v1883_v58, %v1885_v52  ;;  %4099 = vmatmul.mubr.bf16.gmra.mxu1 %v626_v20  ;;  %v4402_v58 = vld [vmem:[#allocation2 + $0x18] sm:$0xff]   ;;  %v4403_v52 = vld [vmem:[#allocation2 + $0x20] sm:$0xff]  }
 0x17e   :  { %v3840_v15 = vadd.s32 4294967169, %v1946_v14  ;;  %vm3851_vm3 = vcmp.lt.s32.totalorder %v3850_v35, 0  ;;  %v5696_v6 = vmul.u32.u64.low %v5633_v23, %v1886_v44  ;;  %v5697_v28 = vmul.u32.u64.high %v5633_v23, %v1886_v44, %v5696_v6  ;;  %4147 = vmatpush3.bf16.msra.mxu1 %v7184_v16  ;;  %4150 = vmatprep.mubr.bf16.mxu1 %v4399_v50 }
 0x17f   :  { %v5699_v55 = vmul.f32 0.62831855, %v785_v3  ;;  %v2219_v0 = vsel %vm3851_vm3, 0, %v3850_v35  ;;  %v2234_v36 = vsub.s32 4, %v5619_v19  ;;  %v1894_v5 = vmul.u32 %v5633_v23, %v1878_v31  ;;  %4148 = vmatprep.subr.bf16.mxu1 %v5337_v53  ;;  %2551 = vperm.xlu1 %4358, %v2485_v27   ;;  %v4401_v23 = vld [vmem:[#allocation2 + $0x10] sm:$0xff]  }
 0x180   :  { %v1952_v11 = vadd.s32 1, %v3840_v15  ;;  %v2220_v45 = vsub.s32 32, %v2219_v0  ;;  %v2221_v46 = vshll.u32 %v5637_v17, %v2219_v0  ;;  %v2224_v20 = vsub.s32 4294967266, %v2219_v0 }
 0x181   :  { %v1897_v22 = vadd.s32 1, %v5685_v56  ;;  %v1949_v8 = vand.u32 8388607, %v1942_v25  ;;  %vm2150_vm5 = vcmp.lt.s32.totalorder %v7185_v59, 0  ;;  %vm1896_vm6 = vc.u32 %v5697_v28, %v5684_v2 }
 0x182   :  { %vm1953_vm4 = vcmp.gt.s32.totalorder %v1952_v11, 0  ;;  %v2222_v1 = vshrl.u32 %v2204_v63, %v2220_v45  ;;  %v2225_v54 = vadd.s32 127, %v2224_v20  ;;  %4149 = vmatpush3.bf16.msra.mxu1 %v5337_v53  ;;  %v5716_v17 = vsel %vm2150_vm5, %v2234_v36, %v5619_v19 }
 0x183   :  { %v1898_v61 = vsel %vm1896_vm6, %v1897_v22, %v5685_v56  ;;  %v1954_v10 = vsel %vm1953_vm4, %v1952_v11, 0  ;;  %v1636_v24 = vand.u32 2139095040, %v5699_v55  ;;  %v7186_v47 = vand.u32 2147483647, %v7185_v59 }
 0x184   :  { %v2223_v4 = vor.u32 %v2222_v1, %v2221_v46  ;;  %v2226_v21 = vshll.u32 %v2225_v54, 23  ;;  %v1899_v43 = vadd.s32 %v1898_v61, %v1894_v5  ;;  %v1950_v53 = vor.u32 8388608, %v1949_v8 }
 0x185   :  { %vm5722_vm7 = vcmp.le.f32.partialorder %v7186_v47, 0.7853982  ;;  %v1956_v32 = vand.u32 31, %v1954_v10  ;;  %4151 = vmatmul.mubr.bf16.vlgmr.msra.gmra.mxu1 %v4400_v37  ;;  %v5729_v30 = vshrl.u32 %v1954_v10, 5  ;;  %v1637_v60 = vshrl.u32 %v1636_v24, 23 }
 0x186   :  { %v2227_v7 = vor.u32 4788187, %v2226_v21  ;;  %v2230_v19 = vcvt.s32.f32 %v2223_v4  ;;  %v2237_v34 = vsel %vm5722_vm7, 0, %v5716_v17  ;;  %v1900_v57 = vadd.s32 536870912, %v1899_v43  ;;  %4154 = vmatprep.mubr.bf16.mxu1 %v4401_v23  ;;  %v4404_v21 = vld [vmem:[#allocation2 + $0x28] sm:$0xff]  }
 0x187   :  { %v1957_v9 = vsub.s32 32, %v1956_v32  ;;  %v1959_v29 = vshll.u32 %v7179_v18, %v1956_v32  ;;  %v1962_v39 = vshll.u32 %v7180_v49, %v1956_v32  ;;  %v1965_v31 = vshll.u32 %v7181_v26, %v1956_v32 }
 0x188   :  { %v2228_v14 = vand.u32 2147483647, %v2227_v7  ;;  %v5732_v38 = vshrl.u32 %v1900_v57, 30  ;;  %v1968_v12 = vshll.u32 %v7182_v40, %v1956_v32  ;;  %v1971_v35 = vshll.u32 %v7153_v62, %v1956_v32 }
 0x189   :  { %v1960_v48 = vshrl.u32 %v7180_v49, %v1957_v9  ;;  %v1963_v50 = vshrl.u32 %v7181_v26, %v1957_v9  ;;  %v1966_v51 = vshrl.u32 %v7182_v40, %v1957_v9  ;;  %v1969_v16 = vshrl.u32 %v7153_v62, %v1957_v9 }
 0x18a   :  { %v2231_v42 = vmul.f32 %v2230_v19, %v2228_v14  ;;  %v1902_v3 = vshll.u32 %v5732_v38, 30  ;;  %v1958_v56 = vshrl.u32 %v7179_v18, %v1957_v9  ;;  %v1972_v27 = vshrl.u32 %v7155_v41, %v1957_v9 }
 0x18b   :  { %v5745_v63 = vshll.u32 %v1950_v53, 8  ;;  %v1633_v44 = vand.u32 2147483647, %v5699_v55  ;;  %v1961_v0 = vor.u32 %v1960_v48, %v1959_v29  ;;  %v1964_v36 = vor.u32 %v1963_v50, %v1962_v39 }
 0x18c   :  { %v2232_v15 = vxor.u32 2147483648, %v2231_v42  ;;  %v5748_v6 = vsub.s32 %v1899_v43, %v1902_v3  ;;  %v1967_v5 = vor.u32 %v1966_v51, %v1965_v31  ;;  %v1970_v11 = vor.u32 %v1969_v16, %v1968_v12 }
 0x18d   :  { %vm1974_vm12 = vcmp.lt.s32.totalorder %v5729_v30, 1  ;;  %v3828_v45 = vadd.s32 4294967169, %v1637_v60  ;;  %4155 = vmatmul.mubr.bf16.gmra.mxu1 %v4402_v58  ;;  %v1973_v22 = vor.u32 %v1972_v27, %v1971_v35  ;;  %vm1977_vm8 = vcmp.lt.s32.totalorder %v5729_v30, 4 }
 0x18e   :  { %v2233_v46 = vsel %vm2150_vm5, %v2232_v15, %v2231_v42  ;;  %v1905_v20 = vsub.s32 0, %v5748_v6  ;;  %4158 = vmatprep.mubr.bf16.mxu1 %v4403_v52  ;;  %vm1975_vm9 = vcmp.lt.s32.totalorder %v5729_v30, 2  ;;  %vm1976_vm10 = vcmp.lt.s32.totalorder %v5729_v30, 3  ;;  %v7189_v52 = vld [vmem:[#allocation14_spill] sm:$0xff] }
 0x18f   :  { %v2236_v8 = vsel %vm5722_vm7, %v7185_v59, %v2233_v46  ;;  %v1979_v37 = vsel %vm1977_vm8, %v1967_v5, 2102212464  ;;  %v1978_v54 = vsel %vm1974_vm12, %v1958_v56, %v1961_v0  ;;  %v1982_v23 = vsel %vm1974_vm12, %v1961_v0, %v1964_v36 }
 0x190   :  { %4507 = vcosq.f32 %v2236_v8  ;;  %v3837_v1 = vmin.u32 %v1905_v20, %v5748_v6  ;;  %v1980_v17 = vsel %vm1976_vm10, %v1964_v36, %v1979_v37  ;;  %v1983_v61 = vsel %vm1977_vm8, %v1970_v11, 920167782 }
 0x191   :  { %4509 = vsinq.f32 %v2236_v8  ;;  %v1640_v10 = vand.u32 8388607, %v1633_v44  ;;  %v5773_v24 = vand.u32 3, %v2237_v34  ;;  %v1984_v43 = vsel %vm1976_vm10, %v1967_v5, %v1983_v61 }
 0x192   :  { %v1907_v4 = vclz %v3837_v1  ;;  %v1986_v47 = vsel %vm1974_vm12, %v1964_v36, %v1967_v5  ;;  %v1981_v33 = vsel %vm1975_vm9, %v1978_v54, %v1980_v17  ;;  %v1985_v53 = vsel %vm1975_vm9, %v1982_v23, %v1984_v43 }
 0x193   :  { %v1987_v32 = vsel %vm1977_vm8, %v1973_v22, 1326507024  ;;  %v1643_v7 = vadd.s32 1, %v3828_v45  ;;  %v5788_v57 = vmul.u32.u64.low %v5745_v63, %v1985_v53  ;;  %v5789_v9 = vmul.u32.u64.high %v5745_v63, %v1985_v53, %v5788_v57 }
 0x194   :  { %v3838_v19 = vadd.s32 4294967294, %v1907_v4  ;;  %v1988_v34 = vsel %vm1976_vm10, %v1970_v11, %v1987_v32  ;;  %v1895_v29 = vadd.s32 %v5684_v2, %v5697_v28  ;;  %v1641_v14 = vor.u32 8388608, %v1640_v10 }
 0x195   :  { %v1989_v60 = vsel %vm1975_vm9, %v1986_v47, %v1988_v34  ;;  %vm1644_vm11 = vcmp.gt.s32.totalorder %v1643_v7, 0  ;;  %4159 = vmatmul.mubr.bf16.gmra.mxu1 %v4404_v21  ;;  %v1997_v51 = vmul.u32 %v5745_v63, %v1981_v33  ;;  %vm2240_vm14 = vweird.f32 %v7185_v59  ;;  %v4405_v47 = vld [vmem:[#allocation2 + $0x30] sm:$0xff]   ;;  %v4406_v33 = vld [vmem:[#allocation2 + $0x38] sm:$0xff]  }
 0x196   :  { %vm3839_vm13 = vcmp.lt.s32.totalorder %v3838_v19, 0  ;;  %v5797_v39 = vmul.u32.u64.low %v5745_v63, %v1989_v60  ;;  %v5798_v31 = vmul.u32.u64.high %v5745_v63, %v1989_v60, %v5797_v39  ;;  %v1645_v48 = vsel %vm1644_vm11, %v1643_v7, 0  ;;  %4162 = vmatprep.mubr.bf16.mxu1 %v4405_v47 }
 0x197   :  { %v1910_v50 = vsel %vm3839_vm13, 0, %v3838_v19  ;;  %v1647_v12 = vand.u32 31, %v1645_v48  ;;  %v2000_v30 = vadd.s32 1, %v5789_v9  ;;  %vm2242_vm15 = vcmp.lt.s32.totalorder %v5773_v24, 2 }
 0x198   :  { %v1911_v58 = vsub.s32 32, %v1910_v50  ;;  %v1912_v2 = vshll.u32 %v5748_v6, %v1910_v50  ;;  %v1915_v28 = vsub.s32 4294967266, %v1910_v50  ;;  %vm2243_vm0 = vcmp.eq.s32.totalorder %v5773_v24, 0 }
 0x199   :  { %vm2246_vm1 = vcmp.eq.s32.totalorder %v5773_v24, 2  ;;  %v1648_v42 = vsub.s32 32, %v1647_v12  ;;  %vm1999_vm2 = vc.u32 %v5798_v31, %v5788_v57  ;;  %v5809_v35 = vshll.u32 %v1641_v14, 8 }
 0x19a   :  { %v1913_v3 = vshrl.u32 %v1895_v29, %v1911_v58  ;;  %v1916_v16 = vadd.s32 127, %v1915_v28  ;;  %vm1841_vm3 = vcmp.lt.s32.totalorder %v7189_v52, 0  ;;  %v1925_v56 = vsub.s32 4, %v5732_v38 }
 0x19b   :  { %v2001_v27 = vsel %vm1999_vm2, %v2000_v30, %v5789_v9  ;;  %v5814_v63 = vshrl.u32 %v1645_v48, 5  ;;  %v1650_v15 = vshll.u32 %v7179_v18, %v1647_v12  ;;  %v7190_v6 = vand.u32 2147483647, %v7189_v52 }
 0x19c   :  { %v1914_v36 = vor.u32 %v1913_v3, %v1912_v2  ;;  %v1917_v5 = vshll.u32 %v1916_v16, 23  ;;  %v2002_v11 = vadd.s32 %v2001_v27, %v1997_v51  ;;  %v1651_v45 = vshrl.u32 %v7180_v49, %v1648_v42 }
 0x19d   :  { %vm5819_vm4 = vcmp.le.f32.partialorder %v7190_v6, 0.7853982  ;;  %v4508_v46 = vpop.eup %4507  ;;  %v1653_v20 = vshll.u32 %v7180_v49, %v1647_v12  ;;  %v1654_v22 = vshrl.u32 %v7181_v26, %v1648_v42  ;;  %v1659_v8 = vshll.u32 %v7182_v40, %v1647_v12  ;;  %4163 = vmatmul.mubr.bf16.gmra.mxu1 %v4406_v33 }
 0x19e   :  { %v1660_v37 = vshrl.u32 %v7153_v62, %v1648_v42  ;;  %v4510_v1 = vpop.eup %4509  ;;  %v2247_v54 = vxor.u32 2147483648, %v4508_v46  ;;  %v1918_v23 = vor.u32 4788187, %v1917_v5  ;;  %v1921_v17 = vcvt.s32.f32 %v1914_v36 }
 0x19f   :  { %v2003_v61 = vadd.s32 536870912, %v2002_v11  ;;  %v2244_v10 = vxor.u32 2147483648, %v4510_v1  ;;  %v1649_v4 = vshrl.u32 %v7179_v18, %v1648_v42  ;;  %v1656_v21 = vshll.u32 %v7181_v26, %v1647_v12 }
 0x1a0   :  { %v1657_v43 = vshrl.u32 %v7182_v40, %v1648_v42  ;;  %v2248_v53 = vsel %vm2246_vm1, %v2247_v54, %v4510_v1  ;;  %v1919_v32 = vand.u32 2147483647, %v1918_v23  ;;  %v1652_v19 = vor.u32 %v1651_v45, %v1650_v15 }
 0x1a1   :  { %v5833_v7 = vshrl.u32 %v2003_v61, 30  ;;  %v2245_v34 = vsel %vm2243_vm0, %v4508_v46, %v2244_v10  ;;  %v1661_v9 = vor.u32 %v1660_v37, %v1659_v8  ;;  %v1662_v29 = vshll.u32 %v7153_v62, %v1647_v12 }
 0x1a2   :  { %v1663_v60 = vshrl.u32 %v7155_v41, %v1648_v42  ;;  %v2249_v14 = vsel %vm2242_vm15, %v2245_v34, %v2248_v53  ;;  %v1922_v39 = vmul.f32 %v1921_v17, %v1919_v32  ;;  %v1655_v50 = vor.u32 %v1654_v22, %v1653_v20  ;;  %v786_v42 = vld [vmem:[%s7042_s1 + $0x48] sm:$0xff] }
 0x1a3   :  { %v2005_v48 = vshll.u32 %v5833_v7, 30  ;;  %v2250_v51 = vsel %vm2240_vm14, nan, %v2249_v14  ;;  %v1658_v58 = vor.u32 %v1657_v43, %v1656_v21  ;;  %vm1665_vm5 = vcmp.lt.s32.totalorder %v5814_v63, 1 }
 0x1a4   :  { %vm1668_vm6 = vcmp.lt.s32.totalorder %v5814_v63, 4  ;;  %v2470_v12 = vadd.f32 1.0, %v2250_v51  ;;  %v1923_v2 = vxor.u32 2147483648, %v1922_v39  ;;  %vm1667_vm7 = vcmp.lt.s32.totalorder %v5814_v63, 3 }
 0x1a5   :  { %v5846_v28 = vsub.s32 %v2002_v11, %v2005_v48  ;;  %v1664_v24 = vor.u32 %v1663_v60, %v1662_v29  ;;  %vm1666_vm12 = vcmp.lt.s32.totalorder %v5814_v63, 2  ;;  %v1670_v30 = vsel %vm1668_vm6, %v1658_v58, 2102212464 }
 0x1a6   :  { %v1674_v59 = vsel %vm1668_vm6, %v1661_v9, 920167782  ;;  %v2486_v3 = vmul.f32 0.5, %v2470_v12  ;;  %v1924_v16 = vsel %vm1841_vm3, %v1923_v2, %v1922_v39  ;;  %v1673_v15 = vsel %vm1665_vm5, %v1652_v19, %v1655_v50 }
 0x1a7   :  { %v2008_v27 = vsub.s32 0, %v5846_v28  ;;  %v1926_v6 = vsel %vm1841_vm3, %v1925_v56, %v5732_v38  ;;  %v1927_v36 = vsel %vm5819_vm4, %v7189_v52, %v1924_v16  ;;  %v1675_v5 = vsel %vm1667_vm7, %v1658_v58, %v1674_v59  ;;  %v783_v38 = vld [vmem:[%s7042_s1 + $0x30] sm:$0xff] }
 0x1a8   :  { %2556 = vperm.xlu1 %4358, %v2486_v3   ;;  %4511 = vcosq.f32 %v1927_v36  ;;  %v1669_v45 = vsel %vm1665_vm5, %v1649_v4, %v1652_v19  ;;  %v5873_v46 = vmul.f32 0.62831855, %v786_v42  ;;  %v1671_v56 = vsel %vm1667_vm7, %v1655_v50, %v1670_v30 }
 0x1a9   :  { %v3841_v11 = vmin.u32 %v2008_v27, %v5846_v28  ;;  %4513 = vsinq.f32 %v1927_v36  ;;  %v1676_v20 = vsel %vm1666_vm12, %v1673_v15, %v1675_v5  ;;  %v1677_v22 = vsel %vm1665_vm5, %v1655_v50, %v1658_v58 }
 0x1aa   :  { %v1678_v37 = vsel %vm1668_vm6, %v1664_v24, 1326507024  ;;  %v5887_v1 = vmul.u32.u64.low %v5809_v35, %v1676_v20  ;;  %v5888_v54 = vmul.u32.u64.high %v5809_v35, %v1676_v20, %v5887_v1  ;;  %v1928_v23 = vsel %vm5819_vm4, 0, %v1926_v6 }
 0x1ab   :  { %v2010_v8 = vclz %v3841_v11  ;;  %vm1944_vm8 = vcmp.lt.s32.totalorder %v7183_v13, 0  ;;  %v1679_v17 = vsel %vm1667_vm7, %v1661_v9, %v1678_v37  ;;  %v5895_v61 = vmul.f32 0.62831855, %v783_v38 }
 0x1ac   :  { %v1672_v4 = vsel %vm1666_vm12, %v1669_v45, %v1671_v56  ;;  %v1680_v21 = vsel %vm1666_vm12, %v1677_v22, %v1679_v17  ;;  %v1739_v43 = vand.u32 2139095040, %v5873_v46  ;;  %v2028_v47 = vsub.s32 4, %v5833_v7 }
 0x1ad   :  { %v3842_v10 = vadd.s32 4294967294, %v2010_v8  ;;  %v5904_v0 = vmul.u32.u64.low %v5809_v35, %v1680_v21  ;;  %v5905_v33 = vmul.u32.u64.high %v5809_v35, %v1680_v21, %v5904_v0  ;;  %v1736_v53 = vand.u32 2147483647, %v5873_v46 }
 0x1ae   :  { %v1998_v32 = vadd.s32 %v5788_v57, %v5798_v31  ;;  %v1691_v19 = vadd.s32 1, %v5888_v54  ;;  %v1740_v34 = vshrl.u32 %v1739_v43, 23  ;;  %v1932_v9 = vand.u32 3, %v1928_v23 }
 0x1af   :  { %vm3843_vm9 = vcmp.lt.s32.totalorder %v3842_v10, 0  ;;  %v1688_v29 = vmul.u32 %v5809_v35, %v1672_v4  ;;  %v1430_v60 = vand.u32 2139095040, %v5895_v61  ;;  %v2029_v51 = vsel %vm1944_vm8, %v2028_v47, %v5833_v7 }
 0x1b0   :  { %v2013_v63 = vsel %vm3843_vm9, 0, %v3842_v10  ;;  %v3832_v50 = vadd.s32 4294967169, %v1740_v34  ;;  %vm1690_vm10 = vc.u32 %v5905_v33, %v5887_v1  ;;  %v1743_v57 = vand.u32 8388607, %v1736_v53 }
 0x1b1   :  { %v2014_v14 = vsub.s32 32, %v2013_v63  ;;  %v2015_v39 = vshll.u32 %v5846_v28, %v2013_v63  ;;  %v2018_v48 = vsub.s32 4294967266, %v2013_v63  ;;  %v1431_v31 = vshrl.u32 %v1430_v60, 23 }
 0x1b2   :  { %v1692_v35 = vsel %vm1690_vm10, %v1691_v19, %v5888_v54  ;;  %v1746_v2 = vadd.s32 1, %v3832_v50  ;;  %vm1931_vm11 = vweird.f32 %v7189_v52  ;;  %vm1934_vm13 = vcmp.eq.s32.totalorder %v1932_v9, 0 }
 0x1b3   :  { %v2016_v58 = vshrl.u32 %v1998_v32, %v2014_v14  ;;  %v2019_v12 = vadd.s32 127, %v2018_v48  ;;  %vm5924_vm14 = vcmp.le.f32.partialorder %v1942_v25, 0.7853982  ;;  %v1693_v7 = vadd.s32 %v1692_v35, %v1688_v29 }
 0x1b4   :  { %vm1937_vm15 = vcmp.eq.s32.totalorder %v1932_v9, 2  ;;  %vm1747_vm0 = vcmp.gt.s32.totalorder %v1746_v2, 0  ;;  %v2031_v42 = vsel %vm5924_vm14, 0, %v2029_v51  ;;  %v1744_v16 = vor.u32 8388608, %v1743_v57 }
 0x1b5   :  { %v2017_v24 = vor.u32 %v2016_v58, %v2015_v39  ;;  %v2020_v30 = vshll.u32 %v2019_v12, 23  ;;  %v4512_v59 = vpop.eup %4511  ;;  %v1694_v3 = vadd.s32 536870912, %v1693_v7  ;;  %v1748_v27 = vsel %vm1747_vm0, %v1746_v2, 0 }
 0x1b6   :  { %v4514_v15 = vpop.eup %4513  ;;  %v1938_v6 = vxor.u32 2147483648, %v4512_v59  ;;  %v3820_v25 = vadd.s32 4294967169, %v1431_v31  ;;  %vm1933_vm1 = vcmp.lt.s32.totalorder %v1932_v9, 2  ;;  %v1750_v38 = vand.u32 31, %v1748_v27 }
 0x1b7   :  { %v2021_v36 = vor.u32 4788187, %v2020_v30  ;;  %v2024_v5 = vcvt.s32.f32 %v2017_v24  ;;  %v1935_v11 = vxor.u32 2147483648, %v4514_v15  ;;  %v5930_v45 = vshrl.u32 %v1694_v3, 30 }
 0x1b8   :  { %v1939_v56 = vsel %vm1937_vm15, %v1938_v6, %v4514_v15  ;;  %v5933_v22 = vand.u32 3, %v2031_v42  ;;  %v1427_v8 = vand.u32 2147483647, %v5895_v61  ;;  %v5938_v54 = vadd.s32 %v5887_v1, %v5905_v33 }
 0x1b9   :  { %v2022_v20 = vand.u32 2147483647, %v2021_v36  ;;  %v1936_v37 = vsel %vm1934_vm13, %v4512_v59, %v1935_v11  ;;  %v1696_v23 = vshll.u32 %v5930_v45, 30  ;;  %v1751_v17 = vsub.s32 32, %v1750_v38 }
 0x1ba   :  { %v1940_v10 = vsel %vm1933_vm1, %v1936_v37, %v1939_v56  ;;  %v5941_v21 = vshll.u32 %v1744_v16, 8  ;;  %v1437_v43 = vadd.s32 1, %v3820_v25  ;;  %v5947_v32 = vshrl.u32 %v1748_v27, 5 }
 0x1bb   :  { %v2025_v4 = vmul.f32 %v2024_v5, %v2022_v20  ;;  %v1941_v47 = vsel %vm1931_vm11, nan, %v1940_v10  ;;  %v5945_v0 = vsub.s32 %v1693_v7, %v1696_v23  ;;  %v1753_v19 = vshll.u32 %v7179_v18, %v1750_v38  ;;  %v784_v10 = vld [vmem:[%s7042_s1 + $0x38] sm:$0xff] }
 0x1bc   :  { %v2467_v34 = vadd.f32 1.0, %v1941_v47  ;;  %v1754_v33 = vshrl.u32 %v7180_v49, %v1751_v17  ;;  %v1756_v9 = vshll.u32 %v7180_v49, %v1750_v38  ;;  %v1757_v29 = vshrl.u32 %v7181_v26, %v1751_v17 }
 0x1bd   :  { %v2026_v1 = vxor.u32 2147483648, %v2025_v4  ;;  %v1699_v63 = vsub.s32 0, %v5945_v0  ;;  %v1759_v60 = vshll.u32 %v7181_v26, %v1750_v38  ;;  %v5957_v52 = vand.u32 8388607, %v1427_v8 }
 0x1be   :  { %v2483_v14 = vmul.f32 0.5, %v2467_v34  ;;  %v1760_v48 = vshrl.u32 %v7182_v40, %v1751_v17  ;;  %vm1438_vm2 = vcmp.gt.s32.totalorder %v1437_v43, 0  ;;  %v1752_v57 = vshrl.u32 %v7179_v18, %v1751_v17 }
 0x1bf   :  { %v2027_v39 = vsel %vm1944_vm8, %v2026_v1, %v2025_v4  ;;  %v3829_v51 = vmin.u32 %v1699_v63, %v5945_v0  ;;  %vm1768_vm3 = vcmp.lt.s32.totalorder %v5947_v32, 1  ;;  %v1755_v31 = vor.u32 %v1754_v33, %v1753_v19 }
 0x1c0   :  { %v2030_v50 = vsel %vm5924_vm14, %v7183_v13, %v2027_v39  ;;  %2541 = vperm.xlu0 %4357, %v2483_v14   ;;  %v1758_v58 = vor.u32 %v1757_v29, %v1756_v9  ;;  %v1761_v12 = vor.u32 %v1760_v48, %v1759_v60  ;;  %v1762_v2 = vshll.u32 %v7182_v40, %v1750_v38 }
 0x1c1   :  { %4515 = vcosq.f32 %v2030_v50  ;;  %v1701_v35 = vclz %v3829_v51  ;;  %v1763_v7 = vshrl.u32 %v7153_v62, %v1751_v17  ;;  %v1765_v28 = vshll.u32 %v7153_v62, %v1750_v38 }
 0x1c2   :  { %4517 = vsinq.f32 %v2030_v50  ;;  %v1766_v24 = vshrl.u32 %v7155_v41, %v1751_v17  ;;  %vm1770_vm4 = vcmp.lt.s32.totalorder %v5947_v32, 3  ;;  %vm1771_vm5 = vcmp.lt.s32.totalorder %v5947_v32, 4 }
 0x1c3   :  { %v3830_v30 = vadd.s32 4294967294, %v1701_v35  ;;  %v1764_v59 = vor.u32 %v1763_v7, %v1762_v2  ;;  %v1772_v42 = vsel %vm1768_vm3, %v1752_v57, %v1755_v31  ;;  %v1773_v3 = vsel %vm1771_vm5, %v1761_v12, 2102212464 }
 0x1c4   :  { %v1767_v16 = vor.u32 %v1766_v24, %v1765_v28  ;;  %vm1769_vm6 = vcmp.lt.s32.totalorder %v5947_v32, 2  ;;  %v1774_v27 = vsel %vm1770_vm4, %v1758_v58, %v1773_v3  ;;  %v1776_v15 = vsel %vm1768_vm3, %v1755_v31, %v1758_v58 }
 0x1c5   :  { %vm2040_vm7 = vcmp.eq.s32.totalorder %v5933_v22, 2  ;;  %vm3831_vm12 = vcmp.lt.s32.totalorder %v3830_v30, 0  ;;  %v1775_v6 = vsel %vm1769_vm6, %v1772_v42, %v1774_v27  ;;  %v1777_v36 = vsel %vm1771_vm5, %v1764_v59, 920167782 }
 0x1c6   :  { %v1780_v5 = vsel %vm1768_vm3, %v1758_v58, %v1761_v12  ;;  %vm2037_vm8 = vcmp.eq.s32.totalorder %v5933_v22, 0  ;;  %v1704_v25 = vsel %vm3831_vm12, 0, %v3830_v30  ;;  %v1778_v11 = vsel %vm1770_vm4, %v1761_v12, %v1777_v36 }
 0x1c7   :  { %v1781_v38 = vsel %vm1771_vm5, %v1767_v16, 1326507024  ;;  %v1439_v56 = vsel %vm1438_vm2, %v1437_v43, 0  ;;  %vm2036_vm9 = vcmp.lt.s32.totalorder %v5933_v22, 2  ;;  %v1705_v20 = vsub.s32 32, %v1704_v25 }
 0x1c8   :  { %v1706_v37 = vshll.u32 %v5945_v0, %v1704_v25  ;;  %v1709_v23 = vsub.s32 4294967266, %v1704_v25  ;;  %v1779_v17 = vsel %vm1769_vm6, %v1776_v15, %v1778_v11  ;;  %vm2034_vm10 = vweird.f32 %v7183_v13 }
 0x1c9   :  { %v1782_v4 = vsel %vm1770_vm4, %v1764_v59, %v1781_v38  ;;  %v6007_v43 = vmul.u32.u64.low %v5941_v21, %v1779_v17  ;;  %v6008_v47 = vmul.u32.u64.high %v5941_v21, %v1779_v17, %v6007_v43  ;;  %v6011_v19 = vshrl.u32 %v1439_v56, 5 }
 0x1ca   :  { %v1707_v0 = vshrl.u32 %v5938_v54, %v1705_v20  ;;  %v1710_v34 = vadd.s32 127, %v1709_v23  ;;  %v1783_v1 = vsel %vm1769_vm6, %v1780_v5, %v1782_v4  ;;  %v1441_v33 = vand.u32 31, %v1439_v56 }
 0x1cb   :  { %vm1635_vm11 = vcmp.lt.s32.totalorder %v5699_v55, 0  ;;  %v6018_v9 = vmul.u32.u64.low %v5941_v21, %v1783_v1  ;;  %v6019_v63 = vmul.u32.u64.high %v5941_v21, %v1783_v1, %v6018_v9  ;;  %v1435_v29 = vor.u32 8388608, %v5957_v52 }
 0x1cc   :  { %v6022_v60 = vmul.f32 0.62831855, %v784_v10  ;;  %vm6026_vm13 = vcmp.le.f32.partialorder %v1633_v44, 0.7853982  ;;  %v1708_v54 = vor.u32 %v1707_v0, %v1706_v37  ;;  %v1711_v32 = vshll.u32 %v1710_v34, 23 }
 0x1cd   :  { %v1719_v39 = vsub.s32 4, %v5930_v45  ;;  %v1442_v48 = vsub.s32 32, %v1441_v33  ;;  %v1791_v50 = vmul.u32 %v5941_v21, %v1775_v6  ;;  %v1794_v51 = vadd.s32 1, %v6008_v47 }
 0x1ce   :  { %v1444_v57 = vshll.u32 %v7179_v18, %v1441_v33  ;;  %vm1459_vm14 = vcmp.lt.s32.totalorder %v6011_v19, 1  ;;  %v4516_v31 = vpop.eup %4515  ;;  %v1712_v58 = vor.u32 4788187, %v1711_v32  ;;  %v1715_v12 = vcvt.s32.f32 %v1708_v54 }
 0x1cf   :  { %v1447_v44 = vshll.u32 %v7180_v49, %v1441_v33  ;;  %v1450_v35 = vshll.u32 %v7181_v26, %v1441_v33  ;;  %v4518_v2 = vpop.eup %4517  ;;  %v2041_v7 = vxor.u32 2147483648, %v4516_v31  ;;  %vm1793_vm15 = vc.u32 %v6019_v63, %v6007_v43 }
 0x1d0   :  { %v1445_v21 = vshrl.u32 %v7180_v49, %v1442_v48  ;;  %v1453_v28 = vshll.u32 %v7182_v40, %v1441_v33  ;;  %v2038_v24 = vxor.u32 2147483648, %v4518_v2  ;;  %v1713_v30 = vand.u32 2147483647, %v1712_v58 }
 0x1d1   :  { %v1795_v59 = vsel %vm1793_vm15, %v1794_v51, %v6008_v47  ;;  %v1448_v42 = vshrl.u32 %v7181_v26, %v1442_v48  ;;  %v2042_v3 = vsel %vm2040_vm7, %v2041_v7, %v4518_v2  ;;  %v1443_v27 = vshrl.u32 %v7179_v18, %v1442_v48 }
 0x1d2   :  { %v1796_v16 = vadd.s32 %v1795_v59, %v1791_v50  ;;  %v1451_v15 = vshrl.u32 %v7182_v40, %v1442_v48  ;;  %v2039_v6 = vsel %vm2037_vm8, %v4516_v31, %v2038_v24  ;;  %v1716_v36 = vmul.f32 %v1715_v12, %v1713_v30 }
 0x1d3   :  { %v1454_v5 = vshrl.u32 %v7153_v62, %v1442_v48  ;;  %v1456_v25 = vshll.u32 %v7153_v62, %v1441_v33  ;;  %v2043_v11 = vsel %vm2036_vm9, %v2039_v6, %v2042_v3  ;;  %v1446_v56 = vor.u32 %v1445_v21, %v1444_v57 }
 0x1d4   :  { %v1797_v38 = vadd.s32 536870912, %v1796_v16  ;;  %v1457_v20 = vshrl.u32 %v7155_v41, %v1442_v48  ;;  %v2044_v37 = vsel %vm2034_vm10, nan, %v2043_v11  ;;  %v1717_v23 = vxor.u32 2147483648, %v1716_v36 }
 0x1d5   :  { %v1449_v17 = vor.u32 %v1448_v42, %v1447_v44  ;;  %v1455_v10 = vor.u32 %v1454_v5, %v1453_v28  ;;  %v2468_v4 = vadd.f32 1.0, %v2044_v37  ;;  %v1452_v0 = vor.u32 %v1451_v15, %v1450_v35 }
 0x1d6   :  { %v1798_v47 = vshrl.u32 %v1797_v38, 30  ;;  %vm1462_vm0 = vcmp.lt.s32.totalorder %v6011_v19, 4  ;;  %v1718_v34 = vsel %vm1635_vm11, %v1717_v23, %v1716_v36  ;;  %v1720_v22 = vsel %vm1635_vm11, %v1719_v39, %v5930_v45 }
 0x1d7   :  { %v1458_v1 = vor.u32 %v1457_v20, %v1456_v25  ;;  %vm1461_vm1 = vcmp.lt.s32.totalorder %v6011_v19, 3  ;;  %v2484_v13 = vmul.f32 0.5, %v2468_v4  ;;  %v1721_v33 = vsel %vm6026_vm13, %v5699_v55, %v1718_v34 }
 0x1d8   :  { %v1799_v9 = vshll.u32 %v1798_v47, 30  ;;  %v1464_v54 = vsel %vm1462_vm0, %v1452_v0, 2102212464  ;;  %4519 = vcosq.f32 %v1721_v33  ;;  %vm1460_vm2 = vcmp.lt.s32.totalorder %v6011_v19, 2 }
 0x1d9   :  { %v1467_v32 = vsel %vm1459_vm14, %v1446_v56, %v1449_v17  ;;  %v1468_v45 = vsel %vm1462_vm0, %v1455_v10, 920167782  ;;  %2546 = vperm.xlu1 %4358, %v2484_v13   ;;  %4521 = vsinq.f32 %v1721_v33  ;;  %v1463_v48 = vsel %vm1459_vm14, %v1443_v27, %v1446_v56 }
 0x1da   :  { %v6073_v39 = vsub.s32 %v1796_v16, %v1799_v9  ;;  %v1471_v50 = vsel %vm1459_vm14, %v1449_v17, %v1452_v0  ;;  %v1465_v51 = vsel %vm1461_vm1, %v1449_v17, %v1464_v54  ;;  %v1469_v57 = vsel %vm1461_vm1, %v1452_v0, %v1468_v45  ;;  %v781_v16 = vld [vmem:[%s7042_s1 + $0x20] sm:$0xff] }
 0x1db   :  { %v1472_v31 = vsel %vm1462_vm0, %v1458_v1, 1326507024  ;;  %v1475_v58 = vshll.u32 %v1435_v29, 8  ;;  %v1722_v12 = vsel %vm6026_vm13, 0, %v1720_v22  ;;  %v1470_v35 = vsel %vm1460_vm2, %v1467_v32, %v1469_v57 }
 0x1dc   :  { %v1802_v44 = vsub.s32 0, %v6073_v39  ;;  %v1473_v2 = vsel %vm1461_vm1, %v1455_v10, %v1472_v31  ;;  %v1822_v29 = vsub.s32 4, %v1798_v47  ;;  %v1466_v14 = vsel %vm1460_vm2, %v1463_v48, %v1465_v51 }
 0x1dd   :  { %v1474_v7 = vsel %vm1460_vm2, %v1471_v50, %v1473_v2  ;;  %v6096_v21 = vmul.u32.u64.low %v1475_v58, %v1470_v35  ;;  %v6097_v28 = vmul.u32.u64.high %v1475_v58, %v1470_v35, %v6096_v21  ;;  %v1726_v24 = vand.u32 3, %v1722_v12 }
 0x1de   :  { %v3833_v52 = vmin.u32 %v1802_v44, %v6073_v39  ;;  %v6103_v30 = vmul.u32.u64.low %v1475_v58, %v1474_v7  ;;  %v6104_v59 = vmul.u32.u64.high %v1475_v58, %v1474_v7, %v6103_v30  ;;  %v1533_v3 = vand.u32 2139095040, %v6022_v60 }
 0x1df   :  { %vm1725_vm3 = vweird.f32 %v5699_v55  ;;  %vm1738_vm4 = vcmp.lt.s32.totalorder %v5873_v46, 0  ;;  %v1482_v27 = vmul.u32 %v1475_v58, %v1466_v14  ;;  %v1485_v15 = vadd.s32 1, %v6097_v28 }
 0x1e0   :  { %v1804_v42 = vclz %v3833_v52  ;;  %v1530_v19 = vand.u32 2147483647, %v6022_v60  ;;  %vm6116_vm5 = vcmp.le.f32.partialorder %v1736_v53, 0.7853982  ;;  %v1823_v5 = vsel %vm1738_vm4, %v1822_v29, %v1798_v47 }
 0x1e1   :  { %v1534_v25 = vshrl.u32 %v1533_v3, 23  ;;  %vm1727_vm6 = vcmp.lt.s32.totalorder %v1726_v24, 2  ;;  %vm1731_vm7 = vcmp.eq.s32.totalorder %v1726_v24, 2  ;;  %vm1484_vm12 = vc.u32 %v6104_v59, %v6096_v21 }
 0x1e2   :  { %v3834_v36 = vadd.s32 4294967294, %v1804_v42  ;;  %v6124_v11 = vmul.f32 0.62831855, %v781_v16  ;;  %v1792_v38 = vadd.s32 %v6007_v43, %v6019_v63  ;;  %v1486_v53 = vsel %vm1484_vm12, %v1485_v15, %v6097_v28 }
 0x1e3   :  { %v3824_v56 = vadd.s32 4294967169, %v1534_v25  ;;  %v1825_v37 = vsel %vm6116_vm5, 0, %v1823_v5  ;;  %v1487_v23 = vadd.s32 %v1486_v53, %v1482_v27  ;;  %v1537_v17 = vand.u32 8388607, %v1530_v19 }
 0x1e4   :  { %vm3835_vm8 = vcmp.lt.s32.totalorder %v3834_v36, 0  ;;  %vm1728_vm9 = vcmp.eq.s32.totalorder %v1726_v24, 0  ;;  %v1224_v1 = vand.u32 2139095040, %v6124_v11  ;;  %v6136_v32 = vand.u32 3, %v1825_v37 }
 0x1e5   :  { %v1807_v20 = vsel %vm3835_vm8, 0, %v3834_v36  ;;  %v4520_v10 = vpop.eup %4519  ;;  %v1540_v34 = vadd.s32 1, %v3824_v56  ;;  %v1488_v63 = vadd.s32 536870912, %v1487_v23  ;;  %v1538_v57 = vor.u32 8388608, %v1537_v17 }
 0x1e6   :  { %v1808_v4 = vsub.s32 32, %v1807_v20  ;;  %v1809_v47 = vshll.u32 %v6073_v39, %v1807_v20  ;;  %v1812_v0 = vsub.s32 4294967266, %v1807_v20  ;;  %v4522_v22 = vpop.eup %4521  ;;  %v1732_v43 = vxor.u32 2147483648, %v4520_v10 }
 0x1e7   :  { %v1729_v13 = vxor.u32 2147483648, %v4522_v22  ;;  %vm1541_vm10 = vcmp.gt.s32.totalorder %v1540_v34, 0  ;;  %v6138_v45 = vshrl.u32 %v1488_v63, 30  ;;  %v1225_v44 = vshrl.u32 %v1224_v1, 23 }
 0x1e8   :  { %v1810_v33 = vshrl.u32 %v1792_v38, %v1808_v4  ;;  %v1813_v9 = vadd.s32 127, %v1812_v0  ;;  %v1733_v54 = vsel %vm1731_vm7, %v1732_v43, %v4522_v22  ;;  %v1542_v48 = vsel %vm1541_vm10, %v1540_v34, 0 }
 0x1e9   :  { %v1730_v39 = vsel %vm1728_vm9, %v4520_v10, %v1729_v13  ;;  %v1490_v58 = vshll.u32 %v6138_v45, 30  ;;  %v1544_v12 = vand.u32 31, %v1542_v48  ;;  %v1221_v28 = vand.u32 2147483647, %v6124_v11 }
 0x1ea   :  { %v1811_v50 = vor.u32 %v1810_v33, %v1809_v47  ;;  %v1814_v51 = vshll.u32 %v1813_v9, 23  ;;  %v1734_v31 = vsel %vm1727_vm6, %v1730_v39, %v1733_v54  ;;  %v1543_v14 = vshrl.u32 %v1542_v48, 5 }
 0x1eb   :  { %v1735_v35 = vsel %vm1725_vm3, nan, %v1734_v31  ;;  %v6145_v29 = vsub.s32 %v1487_v23, %v1490_v58  ;;  %v1545_v30 = vsub.s32 32, %v1544_v12  ;;  %v1483_v24 = vadd.s32 %v6096_v21, %v6104_v59 }
 0x1ec   :  { %v1815_v2 = vor.u32 4788187, %v1814_v51  ;;  %v1818_v7 = vcvt.s32.f32 %v1811_v50  ;;  %v2465_v52 = vadd.f32 1.0, %v1735_v35  ;;  %v1547_v3 = vshll.u32 %v7179_v18, %v1544_v12 }
 0x1ed   :  { %v6150_v16 = vshll.u32 %v1538_v57, 8  ;;  %v1493_v55 = vsub.s32 0, %v6145_v29  ;;  %v1550_v15 = vshll.u32 %v7180_v49, %v1544_v12  ;;  %v3812_v36 = vadd.s32 4294967169, %v1225_v44 }
 0x1ee   :  { %v1816_v42 = vand.u32 2147483647, %v1815_v2  ;;  %v2481_v27 = vmul.f32 0.5, %v2465_v52  ;;  %v1548_v25 = vshrl.u32 %v7180_v49, %v1545_v30  ;;  %v1551_v38 = vshrl.u32 %v7181_v26, %v1545_v30 }
 0x1ef   :  { %v1553_v53 = vshll.u32 %v7181_v26, %v1544_v12  ;;  %v3821_v21 = vmin.u32 %v1493_v55, %v6145_v29  ;;  %v1513_v59 = vsub.s32 4, %v6138_v45  ;;  %vm1562_vm11 = vcmp.lt.s32.totalorder %v1543_v14, 1 }
 0x1f0   :  { %v1819_v5 = vmul.f32 %v1818_v7, %v1816_v42  ;;  %2531 = vperm.xlu0 %4357, %v2481_v27   ;;  %v6161_v56 = vand.u32 8388607, %v1221_v28  ;;  %v1546_v37 = vshrl.u32 %v7179_v18, %v1545_v30  ;;  %v1549_v23 = vor.u32 %v1548_v25, %v1547_v3 }
 0x1f1   :  { %v1554_v17 = vshrl.u32 %v7182_v40, %v1545_v30  ;;  %v1495_v10 = vclz %v3821_v21  ;;  %v1556_v4 = vshll.u32 %v7182_v40, %v1544_v12  ;;  %v1557_v47 = vshrl.u32 %v7153_v62, %v1545_v30 }
 0x1f2   :  { %v1820_v20 = vxor.u32 2147483648, %v1819_v5  ;;  %v1559_v0 = vshll.u32 %v7153_v62, %v1544_v12  ;;  %v1552_v22 = vor.u32 %v1551_v38, %v1550_v15  ;;  %v1560_v63 = vshrl.u32 %v7155_v41, %v1545_v30 }
 0x1f3   :  { %v1555_v43 = vor.u32 %v1554_v17, %v1553_v53  ;;  %v3822_v13 = vadd.s32 4294967294, %v1495_v10  ;;  %v1558_v33 = vor.u32 %v1557_v47, %v1556_v4  ;;  %vm1563_vm13 = vcmp.lt.s32.totalorder %v1543_v14, 2 }
 0x1f4   :  { %v1821_v34 = vsel %vm1738_vm4, %v1820_v20, %v1819_v5  ;;  %v1561_v9 = vor.u32 %v1560_v63, %v1559_v0  ;;  %vm1564_vm14 = vcmp.lt.s32.totalorder %v1543_v14, 3  ;;  %vm1565_vm15 = vcmp.lt.s32.totalorder %v1543_v14, 4 }
 0x1f5   :  { %v1824_v1 = vsel %vm6116_vm5, %v5873_v46, %v1821_v34  ;;  %vm3823_vm0 = vcmp.lt.s32.totalorder %v3822_v13, 0  ;;  %v1566_v54 = vsel %vm1562_vm11, %v1546_v37, %v1549_v23  ;;  %v1567_v48 = vsel %vm1565_vm15, %v1555_v43, 2102212464 }
 0x1f6   :  { %4523 = vcosq.f32 %v1824_v1  ;;  %v1498_v39 = vsel %vm3823_vm0, 0, %v3822_v13  ;;  %v1568_v50 = vsel %vm1564_vm14, %v1552_v22, %v1567_v48  ;;  %v1570_v51 = vsel %vm1562_vm11, %v1549_v23, %v1552_v22 }
 0x1f7   :  { %4525 = vsinq.f32 %v1824_v1  ;;  %v1571_v57 = vsel %vm1565_vm15, %v1558_v33, 920167782  ;;  %v1499_v6 = vsub.s32 32, %v1498_v39  ;;  %v1500_v31 = vshll.u32 %v6145_v29, %v1498_v39 }
 0x1f8   :  { %v1503_v58 = vsub.s32 4294967266, %v1498_v39  ;;  %v1574_v12 = vsel %vm1562_vm11, %v1552_v22, %v1555_v43  ;;  %v1569_v44 = vsel %vm1563_vm13, %v1566_v54, %v1568_v50  ;;  %v1572_v35 = vsel %vm1564_vm14, %v1555_v43, %v1571_v57 }
 0x1f9   :  { %v1575_v2 = vsel %vm1565_vm15, %v1561_v9, 1326507024  ;;  %v1231_v7 = vadd.s32 1, %v3812_v36  ;;  %v1501_v52 = vshrl.u32 %v1483_v24, %v1499_v6  ;;  %v1573_v42 = vsel %vm1563_vm13, %v1570_v51, %v1572_v35 }
 0x1fa   :  { %v1504_v30 = vadd.s32 127, %v1503_v58  ;;  %v1576_v3 = vsel %vm1564_vm14, %v1558_v33, %v1575_v2  ;;  %v6185_v55 = vmul.u32.u64.low %v6150_v16, %v1573_v42  ;;  %v6186_v29 = vmul.u32.u64.high %v6150_v16, %v1573_v42, %v6185_v55 }
 0x1fb   :  { %v1577_v27 = vsel %vm1563_vm13, %v1574_v12, %v1576_v3  ;;  %vm1232_vm1 = vcmp.gt.s32.totalorder %v1231_v7, 0  ;;  %v1502_v15 = vor.u32 %v1501_v52, %v1500_v31  ;;  %vm1828_vm2 = vweird.f32 %v5873_v46 }
 0x1fc   :  { %v1505_v5 = vshll.u32 %v1504_v30, 23  ;;  %v6190_v25 = vmul.u32.u64.low %v6150_v16, %v1577_v27  ;;  %v6191_v38 = vmul.u32.u64.high %v6150_v16, %v1577_v27, %v6190_v25  ;;  %vm1830_vm3 = vcmp.lt.s32.totalorder %v6136_v32, 2  ;;  %v782_v30 = vld [vmem:[%s7042_s1 + $0x28] sm:$0xff] }
 0x1fd   :  { %vm6197_vm4 = vcmp.le.f32.partialorder %v1427_v8, 0.7853982  ;;  %vm1429_vm5 = vcmp.lt.s32.totalorder %v5895_v61, 0  ;;  %v1233_v24 = vsel %vm1232_vm1, %v1231_v7, 0  ;;  %v1509_v53 = vcvt.s32.f32 %v1502_v15 }
 0x1fe   :  { %v1506_v36 = vor.u32 4788187, %v1505_v5  ;;  %v1585_v21 = vmul.u32 %v6150_v16, %v1569_v44  ;;  %v1235_v20 = vand.u32 31, %v1233_v24  ;;  %vm1831_vm6 = vcmp.eq.s32.totalorder %v6136_v32, 0 }
 0x1ff   :  { %vm1834_vm7 = vcmp.eq.s32.totalorder %v6136_v32, 2  ;;  %v1588_v37 = vadd.s32 1, %v6186_v29  ;;  %v1229_v23 = vor.u32 8388608, %v6161_v56  ;;  %v1514_v17 = vsel %vm1429_vm5, %v1513_v59, %v6138_v45 }
 0x200   :  { %v1507_v8 = vand.u32 2147483647, %v1506_v36  ;;  %vm1587_vm12 = vc.u32 %v6191_v38, %v6185_v55  ;;  %v1236_v16 = vsub.s32 32, %v1235_v20  ;;  %v6215_v4 = vshrl.u32 %v1233_v24, 5 }
 0x201   :  { %v1589_v10 = vsel %vm1587_vm12, %v1588_v37, %v6186_v29  ;;  %v1238_v47 = vshll.u32 %v7179_v18, %v1235_v20  ;;  %v1241_v0 = vshll.u32 %v7180_v49, %v1235_v20  ;;  %v1244_v63 = vshll.u32 %v7181_v26, %v1235_v20 }
 0x202   :  { %v1510_v34 = vmul.f32 %v1509_v53, %v1507_v8  ;;  %v1590_v22 = vadd.s32 %v1589_v10, %v1585_v21  ;;  %v1239_v43 = vshrl.u32 %v7180_v49, %v1236_v16  ;;  %v1237_v1 = vshrl.u32 %v7179_v18, %v1236_v16 }
 0x203   :  { %v4524_v56 = vpop.eup %4523  ;;  %v1242_v13 = vshrl.u32 %v7181_v26, %v1236_v16  ;;  %v1245_v33 = vshrl.u32 %v7182_v40, %v1236_v16  ;;  %v1247_v39 = vshll.u32 %v7182_v40, %v1235_v20  ;;  %v1248_v6 = vshrl.u32 %v7153_v62, %v1236_v16 }
 0x204   :  { %v4526_v45 = vpop.eup %4525  ;;  %v1835_v59 = vxor.u32 2147483648, %v4524_v56  ;;  %v1511_v54 = vxor.u32 2147483648, %v1510_v34  ;;  %v1591_v48 = vadd.s32 536870912, %v1590_v22  ;;  %v1240_v51 = vor.u32 %v1239_v43, %v1238_v47 }
 0x205   :  { %v1832_v9 = vxor.u32 2147483648, %v4526_v45  ;;  %v1243_v57 = vor.u32 %v1242_v13, %v1241_v0  ;;  %v1250_v44 = vshll.u32 %v7153_v62, %v1235_v20  ;;  %v1246_v7 = vor.u32 %v1245_v33, %v1244_v63 }
 0x206   :  { %v1836_v50 = vsel %vm1834_vm7, %v1835_v59, %v4526_v45  ;;  %v1512_v58 = vsel %vm1429_vm5, %v1511_v54, %v1510_v34  ;;  %v1592_v12 = vshrl.u32 %v1591_v48, 30  ;;  %v1251_v52 = vshrl.u32 %v7155_v41, %v1236_v16 }
 0x207   :  { %v1833_v31 = vsel %vm1831_vm6, %v4524_v56, %v1832_v9  ;;  %v1515_v2 = vsel %vm6197_vm4, %v5895_v61, %v1512_v58  ;;  %v1249_v27 = vor.u32 %v1248_v6, %v1247_v39  ;;  %vm1253_vm8 = vcmp.lt.s32.totalorder %v6215_v4, 1 }
 0x208   :  { %v1837_v35 = vsel %vm1830_vm3, %v1833_v31, %v1836_v50  ;;  %4527 = vcosq.f32 %v1515_v2  ;;  %v1593_v3 = vshll.u32 %v1592_v12, 30  ;;  %v1252_v32 = vor.u32 %v1251_v52, %v1250_v44 }
 0x209   :  { %v1838_v42 = vsel %vm1828_vm2, nan, %v1837_v35  ;;  %4529 = vsinq.f32 %v1515_v2  ;;  %v1516_v15 = vsel %vm6197_vm4, 0, %v1514_v17  ;;  %v1269_v25 = vshll.u32 %v1229_v23, 8 }
 0x20a   :  { %v2466_v29 = vadd.f32 1.0, %v1838_v42  ;;  %v6247_v5 = vsub.s32 %v1590_v22, %v1593_v3  ;;  %v6249_v24 = vmul.f32 0.62831855, %v782_v30  ;;  %vm1254_vm9 = vcmp.lt.s32.totalorder %v6215_v4, 2 }
 0x20b   :  { %vm1255_vm10 = vcmp.lt.s32.totalorder %v6215_v4, 3  ;;  %vm1256_vm11 = vcmp.lt.s32.totalorder %v6215_v4, 4  ;;  %v1257_v53 = vsel %vm1253_vm8, %v1237_v1, %v1240_v51  ;;  %v1261_v14 = vsel %vm1253_vm8, %v1240_v51, %v1243_v57 }
 0x20c   :  { %v2482_v36 = vmul.f32 0.5, %v2466_v29  ;;  %v1596_v46 = vsub.s32 0, %v6247_v5  ;;  %v1258_v21 = vsel %vm1256_vm11, %v1246_v7, 2102212464  ;;  %v1262_v37 = vsel %vm1256_vm11, %v1249_v27, 920167782 }
 0x20d   :  { %v1259_v20 = vsel %vm1255_vm10, %v1243_v57, %v1258_v21  ;;  %v1265_v23 = vsel %vm1253_vm8, %v1243_v57, %v1246_v7  ;;  %v1266_v8 = vsel %vm1256_vm11, %v1252_v32, 1326507024  ;;  %v1327_v16 = vand.u32 2139095040, %v6249_v24 }
 0x20e   :  { %2536 = vperm.xlu1 %4358, %v2482_v36   ;;  %v3825_v17 = vmin.u32 %v1596_v46, %v6247_v5  ;;  %v1520_v10 = vand.u32 3, %v1516_v15  ;;  %v1616_v47 = vsub.s32 4, %v1592_v12  ;;  %v1263_v0 = vsel %vm1255_vm10, %v1246_v7, %v1262_v37 }
 0x20f   :  { %v1267_v56 = vsel %vm1255_vm10, %v1249_v27, %v1266_v8  ;;  %vm1519_vm13 = vweird.f32 %v5895_v61  ;;  %v1260_v22 = vsel %vm1254_vm9, %v1257_v53, %v1259_v20  ;;  %v1264_v43 = vsel %vm1254_vm9, %v1261_v14, %v1263_v0  ;;  %v779_v27 = vld [vmem:[%s7042_s1 + $0x10] sm:$0xff] }
 0x210   :  { %v1598_v34 = vclz %v3825_v17  ;;  %v1268_v63 = vsel %vm1254_vm9, %v1265_v23, %v1267_v56  ;;  %v6279_v1 = vmul.u32.u64.low %v1269_v25, %v1264_v43  ;;  %v6280_v13 = vmul.u32.u64.high %v1269_v25, %v1264_v43, %v6279_v1 }
 0x211   :  { %v6276_v45 = vmul.u32.u64.low %v1269_v25, %v1268_v63  ;;  %v6277_v59 = vmul.u32.u64.high %v1269_v25, %v1268_v63, %v6276_v45  ;;  %vm6284_vm14 = vcmp.le.f32.partialorder %v1530_v19, 0.7853982  ;;  %vm1532_vm15 = vcmp.lt.s32.totalorder %v6022_v60, 0 }
 0x212   :  { %v3826_v9 = vadd.s32 4294967294, %v1598_v34  ;;  %v1328_v54 = vshrl.u32 %v1327_v16, 23  ;;  %vm1521_vm0 = vcmp.lt.s32.totalorder %v1520_v10, 2  ;;  %vm1522_vm1 = vcmp.eq.s32.totalorder %v1520_v10, 0 }
 0x213   :  { %vm1525_vm2 = vcmp.eq.s32.totalorder %v1520_v10, 2  ;;  %v1324_v4 = vand.u32 2147483647, %v6249_v24  ;;  %v1586_v48 = vadd.s32 %v6185_v55, %v6191_v38  ;;  %v1276_v39 = vmul.u32 %v1269_v25, %v1260_v22 }
 0x214   :  { %vm3827_vm3 = vcmp.lt.s32.totalorder %v3826_v9, 0  ;;  %v3816_v50 = vadd.s32 4294967169, %v1328_v54  ;;  %v1617_v57 = vsel %vm1532_vm15, %v1616_v47, %v1592_v12  ;;  %vm1278_vm4 = vc.u32 %v6277_v59, %v6279_v1 }
 0x215   :  { %v4528_v51 = vpop.eup %4527  ;;  %v1601_v19 = vsel %vm3827_vm3, 0, %v3826_v9  ;;  %v1279_v6 = vadd.s32 1, %v6280_v13  ;;  %v1331_v38 = vand.u32 8388607, %v1324_v4  ;;  %v1619_v32 = vsel %vm6284_vm14, 0, %v1617_v57 }
 0x216   :  { %v4530_v31 = vpop.eup %4529  ;;  %v1526_v58 = vxor.u32 2147483648, %v4528_v51  ;;  %v1602_v44 = vsub.s32 32, %v1601_v19  ;;  %v1603_v35 = vshll.u32 %v6247_v5, %v1601_v19  ;;  %v1606_v2 = vsub.s32 4294967266, %v1601_v19 }
 0x217   :  { %v1523_v7 = vxor.u32 2147483648, %v4530_v31  ;;  %v1280_v55 = vsel %vm1278_vm4, %v1279_v6, %v6280_v13  ;;  %v1334_v52 = vadd.s32 1, %v3816_v50  ;;  %v1332_v53 = vor.u32 8388608, %v1331_v38 }
 0x218   :  { %v1527_v30 = vsel %vm1525_vm2, %v1526_v58, %v4530_v31  ;;  %v1604_v12 = vshrl.u32 %v1586_v48, %v1602_v44  ;;  %v1607_v42 = vadd.s32 127, %v1606_v2  ;;  %v1281_v3 = vadd.s32 %v1280_v55, %v1276_v39 }
 0x219   :  { %v1524_v29 = vsel %vm1522_vm1, %v4528_v51, %v1523_v7  ;;  %vm1335_vm5 = vcmp.gt.s32.totalorder %v1334_v52, 0  ;;  %v6310_v14 = vmul.f32 0.62831855, %v779_v27  ;;  %v6314_v10 = vand.u32 3, %v1619_v32 }
 0x21a   :  { %v1528_v15 = vsel %vm1521_vm0, %v1524_v29, %v1527_v30  ;;  %v1605_v5 = vor.u32 %v1604_v12, %v1603_v35  ;;  %v1608_v25 = vshll.u32 %v1607_v42, 23  ;;  %v1282_v36 = vadd.s32 536870912, %v1281_v3 }
 0x21b   :  { %v1529_v46 = vsel %vm1519_vm13, nan, %v1528_v15  ;;  %v1336_v21 = vsel %vm1335_vm5, %v1334_v52, 0  ;;  %v1277_v56 = vadd.s32 %v6279_v1, %v6277_v59  ;;  %v6318_v34 = vshll.u32 %v1332_v53, 8 }
 0x21c   :  { %v2463_v20 = vadd.f32 1.0, %v1529_v46  ;;  %v1609_v37 = vor.u32 4788187, %v1608_v25  ;;  %v1612_v23 = vcvt.s32.f32 %v1605_v5  ;;  %v6312_v8 = vshrl.u32 %v1282_v36, 30 }
 0x21d   :  { %v1338_v17 = vand.u32 31, %v1336_v21  ;;  %v1018_v22 = vand.u32 2139095040, %v6310_v14  ;;  %v1337_v50 = vshrl.u32 %v1336_v21, 5  ;;  %v1015_v6 = vand.u32 2147483647, %v6310_v14 }
 0x21e   :  { %v2479_v16 = vmul.f32 0.5, %v2463_v20  ;;  %v1610_v47 = vand.u32 2147483647, %v1609_v37  ;;  %v1284_v0 = vshll.u32 %v6312_v8, 30  ;;  %v1307_v25 = vsub.s32 4, %v6312_v8 }
 0x21f   :  { %v1339_v61 = vsub.s32 32, %v1338_v17  ;;  %v1341_v45 = vshll.u32 %v7179_v18, %v1338_v17  ;;  %v1344_v13 = vshll.u32 %v7180_v49, %v1338_v17  ;;  %v1347_v48 = vshll.u32 %v7181_v26, %v1338_v17 }
 0x220   :  { %2521 = vperm.xlu0 %4357, %v2479_v16   ;;  %v1613_v43 = vmul.f32 %v1612_v23, %v1610_v47  ;;  %v6321_v63 = vsub.s32 %v1281_v3, %v1284_v0  ;;  %v1350_v59 = vshll.u32 %v7182_v40, %v1338_v17  ;;  %v1019_v31 = vshrl.u32 %v1018_v22, 23 }
 0x221   :  { %v1342_v9 = vshrl.u32 %v7180_v49, %v1339_v61  ;;  %v1345_v54 = vshrl.u32 %v7181_v26, %v1339_v61  ;;  %v1348_v51 = vshrl.u32 %v7182_v40, %v1339_v61  ;;  %v1340_v19 = vshrl.u32 %v7179_v18, %v1339_v61 }
 0x222   :  { %v1614_v1 = vxor.u32 2147483648, %v1613_v43  ;;  %v1287_v39 = vsub.s32 0, %v6321_v63  ;;  %v1351_v57 = vshrl.u32 %v7153_v62, %v1339_v61  ;;  %v1353_v2 = vshll.u32 %v7153_v62, %v1338_v17 }
 0x223   :  { %v1343_v35 = vor.u32 %v1342_v9, %v1341_v45  ;;  %v1346_v55 = vor.u32 %v1345_v54, %v1344_v13  ;;  %v1349_v38 = vor.u32 %v1348_v51, %v1347_v48  ;;  %v1354_v12 = vshrl.u32 %v7155_v41, %v1339_v61 }
 0x224   :  { %v1615_v58 = vsel %vm1532_vm15, %v1614_v1, %v1613_v43  ;;  %v3813_v44 = vmin.u32 %v1287_v39, %v6321_v63  ;;  %v1352_v52 = vor.u32 %v1351_v57, %v1350_v59  ;;  %vm1356_vm6 = vcmp.lt.s32.totalorder %v1337_v50, 1 }
 0x225   :  { %v1618_v7 = vsel %vm6284_vm14, %v6022_v60, %v1615_v58  ;;  %vm1357_vm7 = vcmp.lt.s32.totalorder %v1337_v50, 2  ;;  %vm1358_vm12 = vcmp.lt.s32.totalorder %v1337_v50, 3  ;;  %vm1359_vm8 = vcmp.lt.s32.totalorder %v1337_v50, 4 }
 0x226   :  { %4531 = vcosq.f32 %v1618_v7  ;;  %v1289_v30 = vclz %v3813_v44  ;;  %v1355_v3 = vor.u32 %v1354_v12, %v1353_v2  ;;  %v1360_v27 = vsel %vm1356_vm6, %v1340_v19, %v1343_v35 }
 0x227   :  { %4533 = vsinq.f32 %v1618_v7  ;;  %v1361_v29 = vsel %vm1359_vm8, %v1349_v38, 2102212464  ;;  %v1364_v33 = vsel %vm1356_vm6, %v1343_v35, %v1346_v55  ;;  %v1365_v15 = vsel %vm1359_vm8, %v1352_v52, 920167782 }
 0x228   :  { %v3814_v42 = vadd.s32 4294967294, %v1289_v30  ;;  %v1362_v32 = vsel %vm1358_vm12, %v1346_v55, %v1361_v29  ;;  %v1368_v5 = vsel %vm1356_vm6, %v1346_v55, %v1349_v38  ;;  %v1366_v36 = vsel %vm1358_vm12, %v1349_v38, %v1365_v15 }
 0x229   :  { %v1369_v46 = vsel %vm1359_vm8, %v1355_v3, 1326507024  ;;  %v1363_v21 = vsel %vm1357_vm7, %v1360_v27, %v1362_v32  ;;  %v1367_v20 = vsel %vm1357_vm7, %v1364_v33, %v1366_v36  ;;  %vm1223_vm10 = vcmp.lt.s32.totalorder %v6124_v11, 0 }
 0x22a   :  { %vm3815_vm9 = vcmp.lt.s32.totalorder %v3814_v42, 0  ;;  %v1370_v37 = vsel %vm1358_vm12, %v1352_v52, %v1369_v46  ;;  %v6355_v22 = vmul.u32.u64.low %v6318_v34, %v1367_v20  ;;  %v6356_v43 = vmul.u32.u64.high %v6318_v34, %v1367_v20, %v6355_v22 }
 0x22b   :  { %v1292_v53 = vsel %vm3815_vm9, 0, %v3814_v42  ;;  %v1371_v47 = vsel %vm1357_vm7, %v1368_v5, %v1370_v37  ;;  %v3804_v9 = vadd.s32 4294967169, %v1019_v31  ;;  %vm1622_vm11 = vweird.f32 %v6022_v60 }
 0x22c   :  { %v1293_v23 = vsub.s32 32, %v1292_v53  ;;  %v1294_v17 = vshll.u32 %v6321_v63, %v1292_v53  ;;  %v1297_v16 = vsub.s32 4294967266, %v1292_v53  ;;  %v1308_v63 = vsel %vm1223_vm10, %v1307_v25, %v6312_v8 }
 0x22d   :  { %v6351_v0 = vmul.u32.u64.low %v6318_v34, %v1371_v47  ;;  %v6352_v61 = vmul.u32.u64.high %v6318_v34, %v1371_v47, %v6351_v0  ;;  %v1022_v54 = vand.u32 8388607, %v1015_v6  ;;  %v1379_v1 = vmul.u32 %v6318_v34, %v1363_v21 }
 0x22e   :  { %v1295_v45 = vshrl.u32 %v1277_v56, %v1293_v23  ;;  %v1298_v13 = vadd.s32 127, %v1297_v16  ;;  %v1025_v39 = vadd.s32 1, %v3804_v9  ;;  %v780_v56 = vld [vmem:[%s7042_s1 + $0x18] sm:$0xff]  ;;  %vm1628_vm13 = vcmp.eq.s32.totalorder %v6314_v10, 2 }
 0x22f   :  { %vm6373_vm14 = vcmp.le.f32.partialorder %v1221_v28, 0.7853982  ;;  %vm1381_vm15 = vc.u32 %v6352_v61, %v6355_v22  ;;  %v1382_v8 = vadd.s32 1, %v6356_v43  ;;  %v1023_v58 = vor.u32 8388608, %v1022_v54 }
 0x230   :  { %v1296_v48 = vor.u32 %v1295_v45, %v1294_v17  ;;  %v1299_v59 = vshll.u32 %v1298_v13, 23  ;;  %v1310_v19 = vsel %vm6373_vm14, 0, %v1308_v63  ;;  %vm1026_vm0 = vcmp.gt.s32.totalorder %v1025_v39, 0 }
 0x231   :  { %v1383_v31 = vsel %vm1381_vm15, %v1382_v8, %v6356_v43  ;;  %v1027_v44 = vsel %vm1026_vm0, %v1025_v39, 0  ;;  %v6383_v28 = vmul.f32 0.62831855, %v780_v56  ;;  %vm1625_vm1 = vcmp.eq.s32.totalorder %v6314_v10, 0 }
 0x232   :  { %v1300_v51 = vor.u32 4788187, %v1299_v59  ;;  %v1303_v34 = vcvt.s32.f32 %v1296_v48  ;;  %v1384_v55 = vadd.s32 %v1383_v31, %v1379_v1  ;;  %vm1624_vm2 = vcmp.lt.s32.totalorder %v6314_v10, 2 }
 0x233   :  { %v4532_v57 = vpop.eup %4531  ;;  %v6387_v52 = vand.u32 3, %v1310_v19  ;;  %v1029_v30 = vand.u32 31, %v1027_v44  ;;  %v1118_v27 = vand.u32 2147483647, %v6383_v28  ;;  %v6392_v33 = vshll.u32 %v1023_v58, 8 }
 0x234   :  { %v4534_v35 = vpop.eup %4533  ;;  %v1629_v2 = vxor.u32 2147483648, %v4532_v57  ;;  %v1301_v7 = vand.u32 2147483647, %v1300_v51  ;;  %v1385_v3 = vadd.s32 536870912, %v1384_v55  ;;  %v1121_v15 = vand.u32 2139095040, %v6383_v28 }
 0x235   :  { %v1626_v38 = vxor.u32 2147483648, %v4534_v35  ;;  %v1030_v32 = vsub.s32 32, %v1029_v30  ;;  %v1032_v46 = vshll.u32 %v7179_v18, %v1029_v30  ;;  %v1035_v21 = vshll.u32 %v7180_v49, %v1029_v30 }
 0x236   :  { %v1630_v12 = vsel %vm1628_vm13, %v1629_v2, %v4534_v35  ;;  %v1304_v42 = vmul.f32 %v1303_v34, %v1301_v7  ;;  %v6395_v36 = vshrl.u32 %v1385_v3, 30  ;;  %v1038_v16 = vshll.u32 %v7181_v26, %v1029_v30 }
 0x237   :  { %v1627_v29 = vsel %vm1625_vm1, %v4532_v57, %v1626_v38  ;;  %v1033_v53 = vshrl.u32 %v7180_v49, %v1030_v32  ;;  %v1036_v20 = vshrl.u32 %v7181_v26, %v1030_v32  ;;  %v1028_v60 = vshrl.u32 %v1027_v44, 5 }
 0x238   :  { %v1631_v5 = vsel %vm1624_vm2, %v1627_v29, %v1630_v12  ;;  %v1305_v25 = vxor.u32 2147483648, %v1304_v42  ;;  %v1387_v17 = vshll.u32 %v6395_v36, 30  ;;  %v1039_v0 = vshrl.u32 %v7182_v40, %v1030_v32 }
 0x239   :  { %v1632_v10 = vsel %vm1622_vm11, nan, %v1631_v5  ;;  %v1122_v43 = vshrl.u32 %v1121_v15, 23  ;;  %v1031_v9 = vshrl.u32 %v7179_v18, %v1030_v32  ;;  %v1034_v63 = vor.u32 %v1033_v53, %v1032_v46 }
 0x23a   :  { %v2464_v37 = vadd.f32 1.0, %v1632_v10  ;;  %v1306_v23 = vsel %vm1223_vm10, %v1305_v25, %v1304_v42  ;;  %v6411_v13 = vsub.s32 %v1384_v55, %v1387_v17  ;;  %v1037_v54 = vor.u32 %v1036_v20, %v1035_v21 }
 0x23b   :  { %v1309_v47 = vsel %vm6373_vm14, %v6124_v11, %v1306_v23  ;;  %v1041_v48 = vshll.u32 %v7182_v40, %v1029_v30  ;;  %v1040_v1 = vor.u32 %v1039_v0, %v1038_v16  ;;  %v1042_v39 = vshrl.u32 %v7153_v62, %v1030_v32 }
 0x23c   :  { %v2480_v45 = vmul.f32 0.5, %v2464_v37  ;;  %4535 = vcosq.f32 %v1309_v47  ;;  %v1390_v59 = vsub.s32 0, %v6411_v13  ;;  %v1044_v56 = vshll.u32 %v7153_v62, %v1029_v30 }
 0x23d   :  { %4537 = vsinq.f32 %v1309_v47  ;;  %v1045_v50 = vshrl.u32 %v7155_v41, %v1030_v32  ;;  %vm1047_vm3 = vcmp.lt.s32.totalorder %v1028_v60, 1  ;;  %v3808_v8 = vadd.s32 4294967169, %v1122_v43 }
 0x23e   :  { %2526 = vperm.xlu1 %4358, %v2480_v45   ;;  %v1125_v51 = vand.u32 8388607, %v1118_v27  ;;  %v3817_v34 = vmin.u32 %v1390_v59, %v6411_v13  ;;  %vm1048_vm4 = vcmp.lt.s32.totalorder %v1028_v60, 2  ;;  %vm1049_vm5 = vcmp.lt.s32.totalorder %v1028_v60, 3 }
 0x23f   :  { %vm1050_vm6 = vcmp.lt.s32.totalorder %v1028_v60, 4  ;;  %v1043_v19 = vor.u32 %v1042_v39, %v1041_v48  ;;  %v1046_v57 = vor.u32 %v1045_v50, %v1044_v56  ;;  %v1051_v31 = vsel %vm1047_vm3, %v1031_v9, %v1034_v63 }
 0x240   :  { %v1052_v58 = vsel %vm1050_vm6, %v1040_v1, 2102212464  ;;  %vm1316_vm7 = vcmp.eq.s32.totalorder %v6387_v52, 0  ;;  %v1392_v44 = vclz %v3817_v34  ;;  %v1055_v2 = vsel %vm1047_vm3, %v1034_v63, %v1037_v54 }
 0x241   :  { %v1053_v35 = vsel %vm1049_vm5, %v1037_v54, %v1052_v58  ;;  %v1059_v7 = vsel %vm1047_vm3, %v1037_v54, %v1040_v1  ;;  %vm1315_vm12 = vcmp.lt.s32.totalorder %v6387_v52, 2  ;;  %v1380_v55 = vadd.s32 %v6355_v22, %v6352_v61 }
 0x242   :  { %v1056_v38 = vsel %vm1050_vm6, %v1043_v19, 920167782  ;;  %v1060_v30 = vsel %vm1050_vm6, %v1046_v57, 1326507024  ;;  %v1128_v12 = vadd.s32 1, %v3808_v8  ;;  %vm1313_vm8 = vweird.f32 %v6124_v11 }
 0x243   :  { %v3818_v42 = vadd.s32 4294967294, %v1392_v44  ;;  %v1057_v3 = vsel %vm1049_vm5, %v1040_v1, %v1056_v38  ;;  %v1061_v29 = vsel %vm1049_vm5, %v1043_v19, %v1060_v30  ;;  %v1126_v32 = vor.u32 8388608, %v1125_v51 }
 0x244   :  { %v1054_v15 = vsel %vm1048_vm4, %v1051_v31, %v1053_v35  ;;  %v1058_v5 = vsel %vm1048_vm4, %v1055_v2, %v1057_v3  ;;  %v1062_v25 = vsel %vm1048_vm4, %v1059_v7, %v1061_v29  ;;  %vm1129_vm9 = vcmp.gt.s32.totalorder %v1128_v12, 0 }
 0x245   :  { %vm3819_vm10 = vcmp.lt.s32.totalorder %v3818_v42, 0  ;;  %v6434_v61 = vmul.u32.u64.low %v6392_v33, %v1062_v25  ;;  %v6435_v22 = vmul.u32.u64.high %v6392_v33, %v1062_v25, %v6434_v61  ;;  %v1130_v46 = vsel %vm1129_vm9, %v1128_v12, 0 }
 0x246   :  { %v1395_v10 = vsel %vm3819_vm10, 0, %v3818_v42  ;;  %v6438_v53 = vmul.u32.u64.low %v6392_v33, %v1058_v5  ;;  %v6439_v21 = vmul.u32.u64.high %v6392_v33, %v1058_v5, %v6438_v53  ;;  %v6442_v20 = vshrl.u32 %v1130_v46, 5 }
 0x247   :  { %v1396_v37 = vsub.s32 32, %v1395_v10  ;;  %v1397_v23 = vshll.u32 %v6411_v13, %v1395_v10  ;;  %v1400_v17 = vsub.s32 4294967266, %v1395_v10  ;;  %v1132_v16 = vand.u32 31, %v1130_v46  ;;  %v777_v10 = vld [vmem:[%s7042_s1] sm:$0xff] }
 0x248   :  { %vm1319_vm11 = vcmp.eq.s32.totalorder %v6387_v52, 2  ;;  %v1410_v60 = vsub.s32 4, %v6395_v36  ;;  %v1070_v0 = vmul.u32 %v6392_v33, %v1054_v15  ;;  %v6448_v43 = vshll.u32 %v1126_v32, 8 }
 0x249   :  { %v4536_v47 = vpop.eup %4535  ;;  %v1398_v63 = vshrl.u32 %v1380_v55, %v1396_v37  ;;  %v1401_v54 = vadd.s32 127, %v1400_v17  ;;  %vm1150_vm13 = vcmp.lt.s32.totalorder %v6442_v20, 1  ;;  %vm1326_vm14 = vcmp.lt.s32.totalorder %v6249_v24, 0 }
 0x24a   :  { %v4538_v45 = vpop.eup %4537  ;;  %v1320_v9 = vxor.u32 2147483648, %v4536_v47  ;;  %vm1072_vm15 = vc.u32 %v6435_v22, %v6438_v53  ;;  %v1073_v13 = vadd.s32 1, %v6439_v21  ;;  %v1133_v59 = vsub.s32 32, %v1132_v16 }
 0x24b   :  { %v1317_v48 = vxor.u32 2147483648, %v4538_v45  ;;  %vm6457_vm0 = vcmp.le.f32.partialorder %v1324_v4, 0.7853982  ;;  %v1399_v39 = vor.u32 %v1398_v63, %v1397_v23  ;;  %v1402_v56 = vshll.u32 %v1401_v54, 23 }
 0x24c   :  { %v1321_v1 = vsel %vm1319_vm11, %v1320_v9, %v4538_v45  ;;  %v1135_v50 = vshll.u32 %v7179_v18, %v1132_v16  ;;  %v1074_v51 = vsel %vm1072_vm15, %v1073_v13, %v6439_v21  ;;  %v1136_v34 = vshrl.u32 %v7180_v49, %v1133_v59 }
 0x24d   :  { %v1318_v8 = vsel %vm1316_vm7, %v4536_v47, %v1317_v48  ;;  %vm1153_vm1 = vcmp.lt.s32.totalorder %v6442_v20, 4  ;;  %v1403_v4 = vor.u32 4788187, %v1402_v56  ;;  %v1406_v57 = vcvt.s32.f32 %v1399_v39 }
 0x24e   :  { %v1322_v19 = vsel %vm1315_vm12, %v1318_v8, %v1321_v1  ;;  %v1075_v31 = vadd.s32 %v1074_v51, %v1070_v0  ;;  %v1137_v44 = vor.u32 %v1136_v34, %v1135_v50  ;;  %v1138_v35 = vshll.u32 %v7180_v49, %v1132_v16 }
 0x24f   :  { %v1323_v58 = vsel %vm1313_vm8, nan, %v1322_v19  ;;  %v1139_v2 = vshrl.u32 %v7181_v26, %v1133_v59  ;;  %v1404_v55 = vand.u32 2147483647, %v1403_v4  ;;  %v1141_v30 = vshll.u32 %v7181_v26, %v1132_v16 }
 0x250   :  { %v2461_v7 = vadd.f32 1.0, %v1323_v58  ;;  %v1076_v38 = vadd.s32 536870912, %v1075_v31  ;;  %v1142_v52 = vshrl.u32 %v7182_v40, %v1133_v59  ;;  %v1144_v42 = vshll.u32 %v7182_v40, %v1132_v16  ;;  %v778_v58 = vld [vmem:[%s7042_s1 + $0x8] sm:$0xff] }
 0x251   :  { %v1140_v12 = vor.u32 %v1139_v2, %v1138_v35  ;;  %v1145_v3 = vshrl.u32 %v7153_v62, %v1133_v59  ;;  %v1407_v11 = vmul.f32 %v1406_v57, %v1404_v55  ;;  %v1147_v15 = vshll.u32 %v7153_v62, %v1132_v16 }
 0x252   :  { %v2477_v29 = vmul.f32 0.5, %v2461_v7  ;;  %v1077_v32 = vshrl.u32 %v1076_v38, 30  ;;  %v1134_v5 = vshrl.u32 %v7179_v18, %v1133_v59  ;;  %v1143_v25 = vor.u32 %v1142_v52, %v1141_v30 }
 0x253   :  { %v1146_v61 = vor.u32 %v1145_v3, %v1144_v42  ;;  %v1148_v46 = vshrl.u32 %v7155_v41, %v1133_v59  ;;  %v1408_v21 = vxor.u32 2147483648, %v1407_v11  ;;  %vm1151_vm2 = vcmp.lt.s32.totalorder %v6442_v20, 2 }
 0x254   :  { %2511 = vperm.xlu0 %4357, %v2477_v29   ;;  %v1078_v37 = vshll.u32 %v1077_v32, 30  ;;  %vm1152_vm3 = vcmp.lt.s32.totalorder %v6442_v20, 3  ;;  %v1155_v17 = vsel %vm1153_vm1, %v1143_v25, 2102212464  ;;  %v1158_v16 = vsel %vm1150_vm13, %v1137_v44, %v1140_v12 }
 0x255   :  { %v1149_v23 = vor.u32 %v1148_v46, %v1147_v15  ;;  %v1159_v47 = vsel %vm1153_vm1, %v1146_v61, 920167782  ;;  %v1409_v0 = vsel %vm1326_vm14, %v1408_v21, %v1407_v11  ;;  %v1411_v45 = vsel %vm1326_vm14, %v1410_v60, %v6395_v36 }
 0x256   :  { %v1079_v9 = vsub.s32 %v1075_v31, %v1078_v37  ;;  %v6496_v63 = vmul.f32 0.62831855, %v777_v10  ;;  %v1412_v54 = vsel %vm6457_vm0, %v6249_v24, %v1409_v0  ;;  %v1154_v48 = vsel %vm1150_vm13, %v1134_v5, %v1137_v44 }
 0x257   :  { %v1160_v13 = vsel %vm1152_vm3, %v1143_v25, %v1159_v47  ;;  %v1162_v59 = vsel %vm1150_vm13, %v1140_v12, %v1143_v25  ;;  %4539 = vcosq.f32 %v1412_v54  ;;  %v1156_v36 = vsel %vm1152_vm3, %v1140_v12, %v1155_v17 }
 0x258   :  { %v1081_v1 = vsub.s32 0, %v1079_v9  ;;  %v1161_v60 = vsel %vm1151_vm2, %v1158_v16, %v1160_v13  ;;  %4541 = vsinq.f32 %v1412_v54  ;;  %v1163_v39 = vsel %vm1153_vm1, %v1149_v23, 1326507024 }
 0x259   :  { %v6514_v56 = vmul.u32.u64.low %v6448_v43, %v1161_v60  ;;  %v6515_v50 = vmul.u32.u64.high %v6448_v43, %v1161_v60, %v6514_v56  ;;  %v1413_v51 = vsel %vm6457_vm0, 0, %v1411_v45  ;;  %v1164_v34 = vsel %vm1152_vm3, %v1146_v61, %v1163_v39 }
 0x25a   :  { %v3805_v8 = vmin.u32 %v1081_v1, %v1079_v9  ;;  %v1157_v4 = vsel %vm1151_vm2, %v1154_v48, %v1156_v36  ;;  %v1165_v57 = vsel %vm1151_vm2, %v1162_v59, %v1164_v34  ;;  %v812_v31 = vand.u32 2139095040, %v6496_v63 }
 0x25b   :  { %v1101_v44 = vsub.s32 4, %v1077_v32  ;;  %v6531_v33 = vmul.u32.u64.low %v6448_v43, %v1165_v57  ;;  %v6532_v35 = vmul.u32.u64.high %v6448_v43, %v1165_v57, %v6531_v33  ;;  %v1176_v7 = vadd.s32 1, %v6515_v50 }
 0x25c   :  { %v1083_v19 = vclz %v3805_v8  ;;  %v813_v55 = vshrl.u32 %v812_v31, 23  ;;  %v1417_v38 = vand.u32 3, %v1413_v51  ;;  %vm1017_vm4 = vcmp.lt.s32.totalorder %v6310_v14, 0 }
 0x25d   :  { %v1173_v20 = vmul.u32 %v6448_v43, %v1157_v4  ;;  %v6537_v30 = vmul.f32 0.62831855, %v778_v58  ;;  %vm1416_vm5 = vweird.f32 %v6249_v24  ;;  %vm6542_vm6 = vcmp.le.f32.partialorder %v1015_v6, 0.7853982 }
 0x25e   :  { %v3806_v2 = vadd.s32 4294967294, %v1083_v19  ;;  %v1071_v52 = vadd.s32 %v6438_v53, %v6435_v22  ;;  %v3796_v42 = vadd.s32 4294967169, %v813_v55  ;;  %v1102_v29 = vsel %vm1017_vm4, %v1101_v44, %v1077_v32 }
 0x25f   :  { %vm1175_vm12 = vc.u32 %v6532_v35, %v6514_v56  ;;  %v809_v43 = vand.u32 2147483647, %v6496_v63  ;;  %vm1418_vm8 = vcmp.lt.s32.totalorder %v1417_v38, 2  ;;  %v915_v22 = vand.u32 2139095040, %v6537_v30 }
 0x260   :  { %vm3807_vm7 = vcmp.lt.s32.totalorder %v3806_v2, 0  ;;  %v1177_v5 = vsel %vm1175_vm12, %v1176_v7, %v6515_v50  ;;  %v819_v61 = vadd.s32 1, %v3796_v42  ;;  %vm1419_vm9 = vcmp.eq.s32.totalorder %v1417_v38, 0 }
 0x261   :  { %v1086_v3 = vsel %vm3807_vm7, 0, %v3806_v2  ;;  %v1178_v25 = vadd.s32 %v1177_v5, %v1173_v20  ;;  %vm1422_vm10 = vcmp.eq.s32.totalorder %v1417_v38, 2  ;;  %v1104_v10 = vsel %vm6542_vm6, 0, %v1102_v29 }
 0x262   :  { %v1087_v11 = vsub.s32 32, %v1086_v3  ;;  %v1088_v15 = vshll.u32 %v1079_v9, %v1086_v3  ;;  %v1091_v6 = vsub.s32 4294967266, %v1086_v3  ;;  %v816_v37 = vand.u32 8388607, %v809_v43 }
 0x263   :  { %v1179_v21 = vadd.s32 536870912, %v1178_v25  ;;  %vm820_vm11 = vcmp.gt.s32.totalorder %v819_v61, 0  ;;  %v916_v48 = vshrl.u32 %v915_v22, 23  ;;  %v6562_v36 = vand.u32 3, %v1104_v10 }
 0x264   :  { %v1089_v53 = vshrl.u32 %v1071_v52, %v1087_v11  ;;  %v1092_v46 = vadd.s32 127, %v1091_v6  ;;  %v4540_v32 = vpop.eup %4539  ;;  %v821_v0 = vsel %vm820_vm11, %v819_v61, 0  ;;  %v817_v50 = vor.u32 8388608, %v816_v37 }
 0x265   :  { %v4542_v23 = vpop.eup %4541  ;;  %v1423_v17 = vxor.u32 2147483648, %v4540_v32  ;;  %v6559_v9 = vshrl.u32 %v1179_v21, 30  ;;  %v823_v54 = vand.u32 31, %v821_v0  ;;  %v1174_v19 = vadd.s32 %v6514_v56, %v6532_v35 }
 0x266   :  { %v1090_v16 = vor.u32 %v1089_v53, %v1088_v15  ;;  %v1093_v47 = vshll.u32 %v1092_v46, 23  ;;  %v1420_v45 = vxor.u32 2147483648, %v4542_v23  ;;  %v912_v4 = vand.u32 2147483647, %v6537_v30 }
 0x267   :  { %v1424_v13 = vsel %vm1422_vm10, %v1423_v17, %v4542_v23  ;;  %v1181_v39 = vshll.u32 %v6559_v9, 30  ;;  %v824_v8 = vsub.s32 32, %v823_v54  ;;  %v826_v58 = vshll.u32 %v7179_v18, %v823_v54 }
 0x268   :  { %v1094_v59 = vor.u32 4788187, %v1093_v47  ;;  %v1097_v1 = vcvt.s32.f32 %v1090_v16  ;;  %v1421_v60 = vsel %vm1419_vm9, %v4540_v32, %v1420_v45  ;;  %v3800_v44 = vadd.s32 4294967169, %v916_v48 }
 0x269   :  { %v1425_v51 = vsel %vm1418_vm8, %v1421_v60, %v1424_v13  ;;  %v6572_v31 = vsub.s32 %v1178_v25, %v1181_v39  ;;  %v827_v7 = vshrl.u32 %v7180_v49, %v824_v8  ;;  %v829_v55 = vshll.u32 %v7180_v49, %v823_v54 }
 0x26a   :  { %v1095_v34 = vand.u32 2147483647, %v1094_v59  ;;  %v1426_v57 = vsel %vm1416_vm5, nan, %v1425_v51  ;;  %v830_v56 = vshrl.u32 %v7181_v26, %v824_v8  ;;  %v832_v35 = vshll.u32 %v7181_v26, %v823_v54 }
 0x26b   :  { %v2462_v33 = vadd.f32 1.0, %v1426_v57  ;;  %v1184_v38 = vsub.s32 0, %v6572_v31  ;;  %v6580_v20 = vshll.u32 %v817_v50, 8  ;;  %v822_v42 = vshrl.u32 %v821_v0, 5 }
 0x26c   :  { %v1098_v2 = vmul.f32 %v1097_v1, %v1095_v34  ;;  %v833_v3 = vshrl.u32 %v7182_v40, %v824_v8  ;;  %v825_v11 = vshrl.u32 %v7179_v18, %v824_v8  ;;  %v828_v15 = vor.u32 %v827_v7, %v826_v58 }
 0x26d   :  { %v2478_v24 = vmul.f32 0.5, %v2462_v33  ;;  %v3809_v29 = vmin.u32 %v1184_v38, %v6572_v31  ;;  %v922_v6 = vadd.s32 1, %v3800_v44  ;;  %v831_v25 = vor.u32 %v830_v56, %v829_v55 }
 0x26e   :  { %v1099_v52 = vxor.u32 2147483648, %v1098_v2  ;;  %v834_v61 = vor.u32 %v833_v3, %v832_v35  ;;  %v835_v22 = vshll.u32 %v7182_v40, %v823_v54  ;;  %v836_v32 = vshrl.u32 %v7153_v62, %v824_v8 }
 0x26f   :  { %2516 = vperm.xlu1 %4358, %v2478_v24   ;;  %v1186_v46 = vclz %v3809_v29  ;;  %v838_v10 = vshll.u32 %v7153_v62, %v823_v54  ;;  %v839_v21 = vshrl.u32 %v7155_v41, %v824_v8  ;;  %vm841_vm13 = vcmp.lt.s32.totalorder %v822_v42, 1 }
 0x270   :  { %v1100_v5 = vsel %vm1017_vm4, %v1099_v52, %v1098_v2  ;;  %vm842_vm14 = vcmp.lt.s32.totalorder %v822_v42, 2  ;;  %v837_v23 = vor.u32 %v836_v32, %v835_v22  ;;  %vm843_vm15 = vcmp.lt.s32.totalorder %v822_v42, 3 }
 0x271   :  { %v1103_v53 = vsel %vm6542_vm6, %v6310_v14, %v1100_v5  ;;  %v3810_v37 = vadd.s32 4294967294, %v1186_v46  ;;  %v840_v17 = vor.u32 %v839_v21, %v838_v10  ;;  %vm844_vm0 = vcmp.lt.s32.totalorder %v822_v42, 4 }
 0x272   :  { %4543 = vcosq.f32 %v1103_v53  ;;  %v845_v16 = vsel %vm841_vm13, %v825_v11, %v828_v15  ;;  %v849_v47 = vsel %vm841_vm13, %v828_v15, %v831_v25  ;;  %v846_v12 = vsel %vm844_vm0, %v834_v61, 2102212464 }
 0x273   :  { %4545 = vsinq.f32 %v1103_v53  ;;  %vm3811_vm1 = vcmp.lt.s32.totalorder %v3810_v37, 0  ;;  %v850_v0 = vsel %vm844_vm0, %v837_v23, 920167782  ;;  %v853_v45 = vsel %vm841_vm13, %v831_v25, %v834_v61 }
 0x274   :  { %v1189_v48 = vsel %vm3811_vm1, 0, %v3810_v37  ;;  %v847_v54 = vsel %vm843_vm15, %v831_v25, %v846_v12  ;;  %v851_v13 = vsel %vm843_vm15, %v834_v61, %v850_v0  ;;  %v854_v59 = vsel %vm844_vm0, %v840_v17, 1326507024 }
 0x275   :  { %v1190_v1 = vsub.s32 32, %v1189_v48  ;;  %v1191_v60 = vshll.u32 %v6572_v31, %v1189_v48  ;;  %v1194_v39 = vsub.s32 4294967266, %v1189_v48  ;;  %v6599_v50 = vand.u32 8388607, %v912_v4 }
 0x276   :  { %v848_v8 = vsel %vm842_vm14, %v845_v16, %v847_v54  ;;  %v852_v51 = vsel %vm842_vm14, %v849_v47, %v851_v13  ;;  %v855_v34 = vsel %vm843_vm15, %v837_v23, %v854_v59  ;;  %vm923_vm2 = vcmp.gt.s32.totalorder %v922_v6, 0 }
 0x277   :  { %v1192_v57 = vshrl.u32 %v1174_v19, %v1190_v1  ;;  %v1195_v58 = vadd.s32 127, %v1194_v39  ;;  %v856_v44 = vsel %vm842_vm14, %v853_v45, %v855_v34  ;;  %v924_v33 = vsel %vm923_vm2, %v922_v6, 0 }
 0x278   :  { %v6606_v2 = vmul.u32.u64.low %v6580_v20, %v856_v44  ;;  %v6607_v31 = vmul.u32.u64.high %v6580_v20, %v856_v44, %v6606_v2  ;;  %v6610_v7 = vmul.u32.u64.low %v6580_v20, %v852_v51  ;;  %v6611_v55 = vmul.u32.u64.high %v6580_v20, %v852_v51, %v6610_v7 }
 0x279   :  { %vm1107_vm3 = vweird.f32 %v6310_v14  ;;  %v1193_v38 = vor.u32 %v1192_v57, %v1191_v60  ;;  %v1196_v56 = vshll.u32 %v1195_v58, 23  ;;  %v926_v35 = vand.u32 31, %v924_v33 }
 0x27a   :  { %vm1109_vm4 = vcmp.lt.s32.totalorder %v6562_v36, 2  ;;  %vm1110_vm5 = vcmp.eq.s32.totalorder %v6562_v36, 0  ;;  %vm6619_vm6 = vcmp.le.f32.partialorder %v1118_v27, 0.7853982  ;;  %vm1120_vm7 = vcmp.lt.s32.totalorder %v6383_v28, 0 }
 0x27b   :  { %v1197_v24 = vor.u32 4788187, %v1196_v56  ;;  %v1200_v52 = vcvt.s32.f32 %v1193_v38  ;;  %v864_v42 = vmul.u32 %v6580_v20, %v848_v8  ;;  %v927_v3 = vsub.s32 32, %v926_v35 }
 0x27c   :  { %vm1113_vm12 = vcmp.eq.s32.totalorder %v6562_v36, 2  ;;  %vm866_vm8 = vc.u32 %v6607_v31, %v6610_v7  ;;  %v867_v29 = vadd.s32 1, %v6611_v55  ;;  %v920_v11 = vor.u32 8388608, %v6599_v50 }
 0x27d   :  { %v1198_v15 = vand.u32 2147483647, %v1197_v24  ;;  %v1204_v6 = vsub.s32 4, %v6559_v9  ;;  %v6631_v5 = vshrl.u32 %v924_v33, 5  ;;  %v929_v25 = vshll.u32 %v7179_v18, %v926_v35 }
 0x27e   :  { %v868_v22 = vsel %vm866_vm8, %v867_v29, %v6611_v55  ;;  %v930_v53 = vshrl.u32 %v7180_v49, %v927_v3  ;;  %v932_v46 = vshll.u32 %v7180_v49, %v926_v35  ;;  %v933_v37 = vshrl.u32 %v7181_v26, %v927_v3 }
 0x27f   :  { %v4544_v27 = vpop.eup %4543  ;;  %v1201_v10 = vmul.f32 %v1200_v52, %v1198_v15  ;;  %v869_v21 = vadd.s32 %v868_v22, %v864_v42  ;;  %v935_v17 = vshll.u32 %v7181_v26, %v926_v35  ;;  %v936_v16 = vshrl.u32 %v7182_v40, %v927_v3 }
 0x280   :  { %v4546_v61 = vpop.eup %4545  ;;  %v1114_v20 = vxor.u32 2147483648, %v4544_v27  ;;  %v938_v47 = vshll.u32 %v7182_v40, %v926_v35  ;;  %v939_v49 = vshrl.u32 %v7153_v62, %v927_v3  ;;  %v931_v54 = vor.u32 %v930_v53, %v929_v25 }
 0x281   :  { %v1111_v32 = vxor.u32 2147483648, %v4546_v61  ;;  %v1202_v0 = vxor.u32 2147483648, %v1201_v10  ;;  %v870_v45 = vadd.s32 536870912, %v869_v21  ;;  %v941_v13 = vshll.u32 %v7153_v62, %v926_v35 }
 0x282   :  { %v1115_v23 = vsel %vm1113_vm12, %v1114_v20, %v4546_v61  ;;  %v942_v59 = vshrl.u32 %v7155_v41, %v927_v3  ;;  %v934_v60 = vor.u32 %v933_v37, %v932_v46  ;;  %v940_v50 = vor.u32 %v939_v49, %v938_v47 }
 0x283   :  { %v1112_v12 = vsel %vm1110_vm5, %v4544_v27, %v1111_v32  ;;  %v1203_v40 = vsel %vm1120_vm7, %v1202_v0, %v1201_v10  ;;  %v6654_v1 = vshrl.u32 %v870_v45, 30  ;;  %vm944_vm9 = vcmp.lt.s32.totalorder %v6631_v5, 1 }
 0x284   :  { %v1116_v48 = vsel %vm1109_vm4, %v1112_v12, %v1115_v23  ;;  %v1206_v36 = vsel %vm6619_vm6, %v6383_v28, %v1203_v40  ;;  %v937_v41 = vor.u32 %v936_v16, %v935_v17  ;;  %v943_v14 = vor.u32 %v942_v59, %v941_v13 }
 0x285   :  { %v1117_v26 = vsel %vm1107_vm3, nan, %v1116_v48  ;;  %4547 = vcosq.f32 %v1206_v36  ;;  %v872_v62 = vshll.u32 %v6654_v1, 30  ;;  %vm946_vm10 = vcmp.lt.s32.totalorder %v6631_v5, 3 }
 0x286   :  { %v2459_v39 = vadd.f32 1.0, %v1117_v26  ;;  %4549 = vsinq.f32 %v1206_v36  ;;  %vm947_vm11 = vcmp.lt.s32.totalorder %v6631_v5, 4  ;;  %v928_v34 = vshrl.u32 %v7179_v18, %v927_v3 }
 0x287   :  { %v873_v51 = vsub.s32 %v869_v21, %v872_v62  ;;  %vm945_vm13 = vcmp.lt.s32.totalorder %v6631_v5, 2  ;;  %v952_v57 = vsel %vm944_vm9, %v931_v54, %v934_v60  ;;  %v1205_v58 = vsel %vm1120_vm7, %v1204_v6, %v6559_v9 }
 0x288   :  { %v2475_v8 = vmul.f32 0.5, %v2459_v39  ;;  %v949_v44 = vsel %vm947_vm11, %v937_v41, 2102212464  ;;  %v953_v33 = vsel %vm947_vm11, %v940_v50, 920167782  ;;  %v960_v2 = vshll.u32 %v920_v11, 8 }
 0x289   :  { %v875_v55 = vsub.s32 0, %v873_v51  ;;  %v954_v38 = vsel %vm946_vm10, %v937_v41, %v953_v33  ;;  %v956_v56 = vsel %vm944_vm9, %v934_v60, %v937_v41  ;;  %v957_v35 = vsel %vm947_vm11, %v943_v14, 1326507024 }
 0x28a   :  { %2501 = vperm.xlu0 %4357, %v2475_v8   ;;  %v955_v18 = vsel %vm945_vm13, %v952_v57, %v954_v38  ;;  %v1207_v24 = vsel %vm6619_vm6, 0, %v1205_v58  ;;  %v948_v9 = vsel %vm944_vm9, %v928_v34, %v931_v54  ;;  %v950_v42 = vsel %vm946_vm10, %v934_v60, %v949_v44 }
 0x28b   :  { %v3797_v52 = vmin.u32 %v875_v55, %v873_v51  ;;  %v958_v3 = vsel %vm946_vm10, %v940_v50, %v957_v35  ;;  %v6684_v29 = vmul.u32.u64.low %v960_v2, %v955_v18  ;;  %v6685_v11 = vmul.u32.u64.high %v960_v2, %v955_v18, %v6684_v29 }
 0x28c   :  { %v959_v15 = vsel %vm945_vm13, %v956_v56, %v958_v3  ;;  %v1211_v6 = vand.u32 3, %v1207_v24  ;;  %v951_v19 = vsel %vm945_vm13, %v948_v9, %v950_v42  ;;  %v865_v53 = vadd.s32 %v6610_v7, %v6607_v31 }
 0x28d   :  { %v877_v27 = vclz %v3797_v52  ;;  %v6691_v25 = vmul.u32.u64.low %v960_v2, %v959_v15  ;;  %v6692_v61 = vmul.u32.u64.high %v960_v2, %v959_v15, %v6691_v25  ;;  %v970_v22 = vadd.s32 1, %v6685_v11 }
 0x28e   :  { %v967_v46 = vmul.u32 %v960_v2, %v951_v19  ;;  %vm1213_vm15 = vcmp.eq.s32.totalorder %v1211_v6, 0  ;;  %vm1216_vm0 = vcmp.eq.s32.totalorder %v1211_v6, 2  ;;  %vm1210_vm2 = vweird.f32 %v6383_v28 }
 0x28f   :  { %v3798_v20 = vadd.s32 4294967294, %v877_v27  ;;  %vm969_vm1 = vc.u32 %v6692_v61, %v6684_v29  ;;  %vm1212_vm3 = vcmp.lt.s32.totalorder %v1211_v6, 2  ;;  %vm811_vm4 = vcmp.lt.s32.totalorder %v6496_v63, 0 }
 0x290   :  { %v971_v47 = vsel %vm969_vm1, %v970_v22, %v6685_v11  ;;  %vm6704_vm5 = vcmp.le.f32.partialorder %v809_v43, 0.7853982  ;;  %v895_v58 = vsub.s32 4, %v6654_v1  ;;  %v968_v43 = vadd.s32 %v6684_v29, %v6692_v61 }
 0x291   :  { %vm3799_vm14 = vcmp.lt.s32.totalorder %v3798_v20, 0  ;;  %v972_v0 = vadd.s32 %v971_v47, %v967_v46  ;;  %vm901_vm9 = vweird.f32 %v6496_v63  ;;  %vm914_vm10 = vcmp.lt.s32.totalorder %v6537_v30, 0 }
 0x292   :  { %v4548_v32 = vpop.eup %4547  ;;  %v880_v10 = vsel %vm3799_vm14, 0, %v3798_v20  ;;  %v896_v55 = vsel %vm811_vm4, %v895_v58, %v6654_v1  ;;  %vm913_vm11 = vcmp.le.f32.partialorder %v912_v4, 0.7853982 }
 0x293   :  { %v4550_v21 = vpop.eup %4549  ;;  %v1217_v5 = vxor.u32 2147483648, %v4548_v32  ;;  %v881_v37 = vsub.s32 32, %v880_v10  ;;  %v882_v23 = vshll.u32 %v873_v51, %v880_v10  ;;  %v885_v17 = vsub.s32 4294967266, %v880_v10 }
 0x294   :  { %v1214_v16 = vxor.u32 2147483648, %v4550_v21  ;;  %v973_v13 = vadd.s32 536870912, %v972_v0  ;;  %v898_v18 = vsel %vm6704_vm5, 0, %v896_v55 }
 0x295   :  { %v1218_v31 = vsel %vm1216_vm0, %v1217_v5, %v4550_v21  ;;  %v883_v7 = vshrl.u32 %v865_v53, %v881_v37  ;;  %v886_v12 = vadd.s32 127, %v885_v17  ;;  %v902_v42 = vand.u32 3, %v898_v18  ;;  %v6721_v17 = vpop.f32.mrf.mxu1  ;;  %v4416_v18 = vld [vmem:[#allocation7 + $0xf0] sm:$0xff]  }
 0x296   :  { %v1215_v45 = vsel %vm1213_vm15, %v4548_v32, %v1214_v16  ;;  %v974_v39 = vshrl.u32 %v973_v13, 30  ;;  %vm1004_vm0 = vweird.f32 %v6537_v30 }
 0x297   :  { %v1219_v49 = vsel %vm1212_vm3, %v1215_v45, %v1218_v31  ;;  %v884_v48 = vor.u32 %v883_v7, %v882_v23  ;;  %v887_v54 = vshll.u32 %v886_v12, 23  ;;  %vm907_vm7 = vcmp.eq.s32.totalorder %v902_v42, 2  ;;  %v6723_v47 = vpop.f32.mrf.mxu1 }
 0x298   :  { %v1220_v59 = vsel %vm1210_vm2, nan, %v1219_v49  ;;  %v975_v50 = vshll.u32 %v974_v39, 30  ;;  %vm904_vm12 = vcmp.eq.s32.totalorder %v902_v42, 0  ;;  %vm903_vm8 = vcmp.lt.s32.totalorder %v902_v42, 2 }
 0x299   :  { %v2460_v26 = vadd.f32 1.0, %v1220_v59  ;;  %v888_v40 = vor.u32 4788187, %v887_v54  ;;  %v891_v60 = vcvt.s32.f32 %v884_v48  ;;  %v998_v5 = vsub.s32 4, %v974_v39  ;;  %v6725_v7 = vpop.f32.mrf.mxu1 }
 0x29a   :  { %v976_v41 = vsub.s32 %v972_v0, %v975_v50 }
 0x29b   :  { %v2476_v28 = vmul.f32 0.5, %v2460_v26  ;;  %v889_v36 = vand.u32 2147483647, %v888_v40  ;;  %v6727_v49 = vpop.f32.mrf.mxu1 }
 0x29c   :  { %v978_v51 = vsub.s32 0, %v976_v41 }
 0x29d   :  { %2506 = vperm.xlu1 %4358, %v2476_v28   ;;  %v892_v62 = vmul.f32 %v891_v60, %v889_v36  ;;  %v6730_v26 = vpop.f32.mrf.mxu1 }
 0x29e   :  { %v3801_v57 = vmin.u32 %v978_v51, %v976_v41 }
 0x29f   :  { %v893_v8 = vxor.u32 2147483648, %v892_v62  ;;  %v6732_v60 = vpop.f32.mrf.mxu1 }
 0x2a0   :  { %v980_v33 = vclz %v3801_v57 }
 0x2a1   :  { %v894_v34 = vsel %vm811_vm4, %v893_v8, %v892_v62  ;;  %v6734_v28 = vpop.f32.mrf.mxu1  ;;  %v4407_v62 = vld [vmem:[#allocation5] sm:$0xff]  }
 0x2a2   :  { %v897_v44 = vsel %vm6704_vm5, %v6496_v63, %v894_v34  ;;  %v3802_v2 = vadd.s32 4294967294, %v980_v33  ;;  %v999_v63 = vsel %vm914_vm10, %v998_v5, %v974_v39  ;;  %4182 = vmatprep.mubr.bf16.mxu0 %v4407_v62 }
 0x2a3   :  { %4551 = vcosq.f32 %v897_v44  ;;  %v1001_v16 = vsel %vm913_vm11, 0, %v999_v63  ;;  %v6736_v36 = vpop.f32.mrf.mxu1 }
 0x2a4   :  { %4553 = vsinq.f32 %v897_v44  ;;  %vm3803_vm6 = vcmp.lt.s32.totalorder %v3802_v2, 0  ;;  %v1005_v31 = vand.u32 3, %v1001_v16 }
 0x2a5   :  { %v983_v38 = vsel %vm3803_vm6, 0, %v3802_v2  ;;  %v4096_v50 = vpop.f32.mrf.mxu1 }
 0x2a6   :  { %v984_v56 = vsub.s32 32, %v983_v38  ;;  %v985_v35 = vshll.u32 %v976_v41, %v983_v38  ;;  %v988_v24 = vsub.s32 4294967266, %v983_v38  ;;  %vm1010_vm13 = vcmp.eq.s32.totalorder %v1005_v31, 2  ;;  %v4415_v38 = vld [vmem:[#allocation7 + $0xf8] sm:$0xff]  }
 0x2a7   :  { %vm1007_vm14 = vcmp.eq.s32.totalorder %v1005_v31, 0  ;;  %vm1006_vm15 = vcmp.lt.s32.totalorder %v1005_v31, 2  ;;  %v6738_v41 = vpop.f32.mrf.mxu1  ;;  %4198 = vmatprep.subr.bf16.mxu1 %v4415_v38 }
 0x2a8   :  { %v986_v52 = vshrl.u32 %v968_v43, %v984_v56  ;;  %v989_v9 = vadd.s32 127, %v988_v24  ;;  %v2552_v56 = vpop.permute.xlu1 %2551  ;;  %v2562_v24 = vpop.permute.xlu0 %2561  ;;  %4199 = vmatpush3.bf16.msra.mxu1 %v4415_v38 }
 0x2a9   :  { %4200 = vmatprep.subr.bf16.mxu1 %v4416_v18 }
 0x2aa   :  { %v987_v3 = vor.u32 %v986_v52, %v985_v35  ;;  %v990_v11 = vshll.u32 %v989_v9, 23  ;;  %v4417_v9 = vld [vmem:[#allocation7 + $0xe8] sm:$0xff]  }
 0x2ac   :  { %v991_v27 = vor.u32 4788187, %v990_v11  ;;  %v994_v15 = vcvt.s32.f32 %v987_v3  ;;  %v2557_v3 = vpop.permute.xlu1 %2556  ;;  %4201 = vmatpush3.bf16.msra.mxu1 %v4416_v18 }
 0x2ad   :  { %4202 = vmatprep.subr.bf16.mxu1 %v4417_v9 }
 0x2ae   :  { %v992_v19 = vand.u32 2147483647, %v991_v27  ;;  %v4418_v27 = vld [vmem:[#allocation7 + $0xe0] sm:$0xff]  }
 0x2b0   :  { %v4552_v6 = vpop.eup %4551  ;;  %v995_v20 = vmul.f32 %v994_v15, %v992_v19  ;;  %v2567_v15 = vpop.permute.xlu0 %2566  ;;  %4203 = vmatpush3.bf16.msra.mxu1 %v4417_v9 }
 0x2b1   :  { %v4554_v1 = vpop.eup %4553  ;;  %v908_v29 = vxor.u32 2147483648, %v4552_v6  ;;  %4204 = vmatprep.subr.bf16.mxu1 %v4418_v27 }
 0x2b2   :  { %v905_v25 = vxor.u32 2147483648, %v4554_v1  ;;  %v996_v46 = vxor.u32 2147483648, %v995_v20 }
 0x2b3   :  { %v909_v61 = vsel %vm907_vm7, %v908_v29, %v4554_v1  ;;  %v6759_v1 = vld [vmem:[%s7047_s6 + $0x1] ss:$0 sm:$0xff] }
 0x2b4   :  { %v906_v22 = vsel %vm904_vm12, %v4552_v6, %v905_v25  ;;  %v997_v21 = vsel %vm914_vm10, %v996_v46, %v995_v20  ;;  %v2547_v20 = vpop.permute.xlu1 %2546  ;;  %4205 = vmatpush3.bf16.msra.mxu1 %v4418_v27  ;;  %v755_v63 = vadd.f32 %v4096_v50, %v6759_v1  ;;  %v739_v18 = vadd.f32 %v6730_v26, %v6759_v1 }
 0x2b5   :  { %v910_v53 = vsel %vm903_vm8, %v906_v22, %v909_v61  ;;  %v1000_v37 = vsel %vm913_vm11, %v6537_v30, %v997_v21  ;;  %v4097_v30 = vpop.f32.mrf.mxu1  ;;  %v4419_v61 = vld [vmem:[#allocation7 + $0xd8] sm:$0xff]  }
 0x2b6   :  { %v911_v32 = vsel %vm901_vm9, nan, %v910_v53  ;;  %4555 = vcosq.f32 %v1000_v37  ;;  %v758_v21 = vadd.f32 %v4097_v30, %v6759_v1  ;;  %4206 = vmatprep.subr.bf16.mxu1 %v4419_v61  ;;  %v747_v30 = vadd.f32 %v6759_v1, %v6738_v41 }
 0x2b7   :  { %v2457_v10 = vadd.f32 1.0, %v911_v32  ;;  %4557 = vsinq.f32 %v1000_v37  ;;  %v749_v14 = vpop.f32.mrf.mxu1  ;;  %v2542_v32 = vpop.permute.xlu0 %2541 }
 0x2b8   :  { %4207 = vmatpush3.bf16.msra.mxu1 %v4419_v61  ;;  %v2579_v50 = vmul.f32 %v2542_v32, %v755_v63 }
 0x2b9   :  { %v2473_v23 = vmul.f32 0.5, %v2457_v10  ;;  %v4100_v8 = vpop.f32.mrf.mxu1 }
 0x2ba   :  { %v771_v19 = vadd.f32 %v4100_v8, %v6759_v1 }
 0x2bb   :  { %2491 = vperm.xlu0 %4357, %v2473_v23   ;;  %v762_v51 = vpop.f32.mrf.mxu1  ;;  %v4420_v23 = vld [vmem:[#allocation7 + $0xd0] sm:$0xff]   ;;  %v2532_v62 = vpop.permute.xlu0 %2531 }
 0x2bc   :  { %v763_v53 = vadd.f32 %v6759_v1, %v762_v51  ;;  %v2583_v5 = vmul.f32 %v2562_v24, %v771_v19  ;;  %4208 = vmatprep.subr.bf16.mxu1 %v4420_v23 }
 0x2bd   :  { %v4101_v34 = vpop.f32.mrf.mxu1  ;;  %4209 = vmatpush3.bf16.msra.mxu1 %v4420_v23 }
 0x2be   :  { %v774_v25 = vadd.f32 %v4101_v34, %v6759_v1 }
 0x2bf   :  { %v765_v57 = vpop.f32.mrf.mxu1  ;;  %v2522_v41 = vpop.permute.xlu0 %2521 }
 0x2c0   :  { %v766_v46 = vadd.f32 %v6759_v1, %v765_v57  ;;  %v2584_v37 = vmul.f32 %v2567_v15, %v774_v25 }
 0x2c1   :  { %v6740_v58 = vpop.f32.mrf.mxu1 }
 0x2c3   :  { %v4556_v4 = vpop.eup %4555  ;;  %v6742_v44 = vpop.f32.mrf.mxu1 }
 0x2c4   :  { %v4558_v12 = vpop.eup %4557  ;;  %v1011_v0 = vxor.u32 2147483648, %v4556_v4 }
 0x2c5   :  { %v1008_v45 = vxor.u32 2147483648, %v4558_v12  ;;  %v6744_v33 = vpop.f32.mrf.mxu1 }
 0x2c6   :  { %v1012_v48 = vsel %vm1010_vm13, %v1011_v0, %v4558_v12  ;;  %v2582_v0 = vmul.f32 %v2557_v3, %v766_v46  ;;  %v734_v3 = vadd.f32 %v6759_v1, %v6736_v36 }
 0x2c7   :  { %v1009_v54 = vsel %vm1007_vm14, %v4556_v4, %v1008_v45  ;;  %v6746_v2 = vpop.f32.mrf.mxu1  ;;  %v2581_v4 = vmul.f32 %v2552_v56, %v763_v53  ;;  %v2537_v45 = vpop.permute.xlu1 %2536  ;;  %v2577_v56 = vmul.f32 %v2532_v62, %v747_v30 }
 0x2c8   :  { %v1013_v13 = vsel %vm1006_vm15, %v1009_v54, %v1012_v48  ;;  %v750_v48 = vadd.f32 %v6759_v1, %v749_v14  ;;  %v742_v14 = vadd.f32 %v6734_v28, %v6759_v1  ;;  %v731_v28 = vadd.f32 %v6759_v1, %v6732_v60 }
 0x2c9   :  { %v1014_v59 = vsel %vm1004_vm0, nan, %v1013_v13  ;;  %v6748_v55 = vpop.f32.mrf.mxu1  ;;  %v2580_v13 = vmul.f32 %v2547_v20, %v758_v21  ;;  %v723_v60 = vadd.f32 %v6721_v17, %v6759_v1  ;;  %v715_v17 = vadd.f32 %v6759_v1, %v6723_v47  ;;  %v4411_v47 = vld [vmem:[#allocation5 + $0x20] sm:$0xff]  }
 0x2ca   :  { %v2458_v40 = vadd.f32 1.0, %v1014_v59  ;;  %v2578_v57 = vmul.f32 %v2537_v45, %v750_v48 }
 0x2cb   :  { %v6750_v43 = vpop.f32.mrf.mxu1  ;;  %v2527_v38 = vpop.permute.xlu1 %2526 }
 0x2cc   :  { %v2474_v39 = vmul.f32 0.5, %v2458_v40  ;;  %v2576_v27 = vmul.f32 %v2527_v38, %v742_v14 }
 0x2cd   :  { %v6752_v35 = vpop.f32.mrf.mxu1 }
 0x2ce   :  { %2496 = vperm.xlu1 %4358, %v2474_v39  }
 0x2cf   :  { %v6754_v52 = vpop.f32.mrf.mxu1  ;;  %v2512_v61 = vpop.permute.xlu0 %2511 }
 0x2d0   :  { %v2573_v20 = vmul.f32 %v2512_v61, %v731_v28  ;;  %v4423_v28 = vld [vmem:[#allocation7 + $0x138] sm:$0xff]   ;;  %v4430_v61 = vld [vmem:[#allocation7 + $0x100] sm:$0xff]  }
 0x2d1   :  { %v4160_v42 = vpop.f32.mrf.mxu1 }
 0x2d2   :  { %v2973_v34 = vmul.f32 %v4160_v42, %v2579_v50  ;;  %v2575_v42 = vmul.f32 %v2522_v41, %v739_v18 }
 0x2d3   :  { %v2932_v11 = vpop.f32.mrf.mxu1 }
 0x2d4   :  { %v2971_v15 = vmul.f32 %v2932_v11, %v2577_v56  ;;  %v2969_v26 = vmul.f32 %v6748_v55, %v2575_v42  ;;  %v2967_v11 = vmul.f32 %v6750_v43, %v2573_v20  ;;  %v4424_v42 = vld [vmem:[#allocation7 + $0x130] sm:$0xff]   ;;  %v6797_v20 = vld [vmem:[%s7047_s6 + $0x2] ss:$0 sm:$0xff] }
 0x2d5   :  { %v4161_v6 = vpop.f32.mrf.mxu1 }
 0x2d6   :  { %v2974_v8 = vmul.f32 %v4161_v6, %v2580_v13  ;;  %v2970_v6 = vmul.f32 %v6752_v35, %v2576_v27  ;;  %v726_v35 = vadd.f32 %v6725_v7, %v6759_v1  ;;  %v718_v7 = vadd.f32 %v6759_v1, %v6727_v49  ;;  %v4412_v49 = vld [vmem:[#allocation5 + $0x28] sm:$0xff]   ;;  %v4413_v1 = vld [vmem:[#allocation5 + $0x30] sm:$0xff]  }
 0x2d7   :  { %v2935_v29 = vpop.f32.mrf.mxu1 }
 0x2d8   :  { %v3000_v24 = vpack.c.bf16 %v2974_v8, %v2973_v34  ;;  %v2972_v9 = vmul.f32 %v2935_v29, %v2578_v57 }
 0x2d9   :  { %v4164_v22 = vpop.f32.mrf.mxu1 }
 0x2da   :  { %v2977_v31 = vmul.f32 %v4164_v22, %v2583_v5  ;;  %v2999_v19 = vpack.c.bf16 %v2972_v9, %v2971_v15  ;;  %v2998_v22 = vpack.c.bf16 %v2970_v6, %v2969_v26  ;;  %v4425_v6 = vld [vmem:[#allocation7 + $0x128] sm:$0xff]   ;;  %v4428_v26 = vld [vmem:[#allocation7 + $0x110] sm:$0xff]  }
 0x2db   :  { %v2948_v10 = vpop.f32.mrf.mxu1 }
 0x2dc   :  { %v2975_v59 = vmul.f32 %v2948_v10, %v2581_v4  ;;  %v4409_v4 = vld [vmem:[#allocation5 + $0x10] sm:$0xff]  }
 0x2dd   :  { %v4165_v16 = vpop.f32.mrf.mxu1 }
 0x2de   :  { %v2978_v12 = vmul.f32 %v4165_v16, %v2584_v37 }
 0x2df   :  { %v2951_v54 = vpop.f32.mrf.mxu1 }
 0x2e0   :  { %v3002_v40 = vpack.c.bf16 %v2978_v12, %v2977_v31  ;;  %v2976_v39 = vmul.f32 %v2951_v54, %v2582_v0  ;;  %v4410_v12 = vld [vmem:[#allocation5 + $0x18] sm:$0xff]  }
 0x2e1   :  { %v4414_v0 = vld [vmem:[#allocation5 + $0x38] sm:$0xff]  }
 0x2e2   :  { %v3001_v51 = vpack.c.bf16 %v2976_v39, %v2975_v59  ;;  %4166 = vmatprep.subr.bf16.mxu0 %v3002_v40 }
 0x2e3   :  { %4167 = vmatpush3.bf16.msra.mxu0 %v3002_v40 }
 0x2e4   :  { %4168 = vmatprep.subr.bf16.mxu0 %v3001_v51 }
 0x2e7   :  { %4169 = vmatpush3.bf16.msra.mxu0 %v3001_v51 }
 0x2e8   :  { %4170 = vmatprep.subr.bf16.mxu0 %v3000_v24 }
 0x2ea   :  { %v2517_v25 = vpop.permute.xlu1 %2516 }
 0x2eb   :  { %4171 = vmatpush3.bf16.msra.mxu0 %v3000_v24  ;;  %v2574_v29 = vmul.f32 %v2517_v25, %v734_v3  ;;  %v4427_v25 = vld [vmem:[#allocation7 + $0x118] sm:$0xff]  }
 0x2ec   :  { %4172 = vmatprep.subr.bf16.mxu0 %v2999_v19 }
 0x2ed   :  { %v2968_v36 = vmul.f32 %v6754_v52, %v2574_v29  ;;  %v4429_v29 = vld [vmem:[#allocation7 + $0x108] sm:$0xff]  }
 0x2ef   :  { %4173 = vmatpush3.bf16.msra.mxu0 %v2999_v19  ;;  %v2997_v53 = vpack.c.bf16 %v2968_v36, %v2967_v11  ;;  %v4426_v19 = vld [vmem:[#allocation7 + $0x120] sm:$0xff]  }
 0x2f0   :  { %4174 = vmatprep.subr.bf16.mxu0 %v2998_v22 }
 0x2f3   :  { %4175 = vmatpush3.bf16.msra.mxu0 %v2998_v22 }
 0x2f4   :  { %4176 = vmatprep.subr.bf16.mxu0 %v2997_v53 }
 0x2f7   :  { %4177 = vmatpush3.bf16.msra.mxu0 %v2997_v53 }
 0x305   :  { %v2502_v55 = vpop.permute.xlu0 %2501 }
 0x306   :  { %v2571_v32 = vmul.f32 %v2502_v55, %v723_v60 }
 0x308   :  { %v2965_v52 = vmul.f32 %v6740_v58, %v2571_v32 }
 0x318   :  { %v2507_v46 = vpop.permute.xlu1 %2506 }
 0x319   :  { %v2572_v10 = vmul.f32 %v2507_v46, %v726_v35 }
 0x31b   :  { %v2966_v21 = vmul.f32 %v6744_v33, %v2572_v10  ;;  %v4408_v33 = vld [vmem:[#allocation5 + $0x8] sm:$0xff]  }
 0x31d   :  { %v2996_v43 = vpack.c.bf16 %v2966_v21, %v2965_v52 }
 0x31f   :  { %4178 = vmatprep.subr.bf16.mxu0 %v2996_v43 }
 0x320   :  { %4179 = vmatpush3.bf16.msra.mxu0 %v2996_v43 }
 0x336   :  { %v2492_v5 = vpop.permute.xlu0 %2491 }
 0x337   :  { %v2569_v23 = vmul.f32 %v2492_v5, %v715_v17 }
 0x339   :  { %v2963_v16 = vmul.f32 %v6742_v44, %v2569_v23  ;;  %v4421_v44 = vld [vmem:[#allocation7 + $0xc8] sm:$0xff]  }
 0x33a   :  { %4210 = vmatprep.subr.bf16.mxu1 %v4421_v44 }
 0x33b   :  { %4211 = vmatpush3.bf16.msra.mxu1 %v4421_v44 }
 0x349   :  { %v2497_v37 = vpop.permute.xlu1 %2496 }
 0x34a   :  { %v2570_v63 = vmul.f32 %v2497_v37, %v718_v7 }
 0x34c   :  { %v2964_v31 = vmul.f32 %v6746_v2, %v2570_v63  ;;  %v4422_v2 = vld [vmem:[#allocation7 + $0xc0] sm:$0xff]  }
 0x34d   :  { %4212 = vmatprep.subr.bf16.mxu1 %v4422_v2 }
 0x34e   :  { %v2995_v58 = vpack.c.bf16 %v2964_v31, %v2963_v16  ;;  %4213 = vmatpush3.bf16.msra.mxu1 %v4422_v2 }
 0x34f   :  { %4262 = vmatprep.subr.bf16.mxu1 %v4423_v28 }
 0x350   :  { %4180 = vmatprep.subr.bf16.mxu0 %v2995_v58 }
 0x351   :  { %4181 = vmatpush3.bf16.msra.mxu0 %v2995_v58 }
 0x352   :  { %4230 = vmatprep.subr.bf16.mxu0 %v4423_v28 }
 0x354   :  { %4183 = vmatmul.mubr.bf16.vlgmr.msra.gmra.mxu0 %v4408_v33 }
 0x355   :  { %4186 = vmatprep.mubr.bf16.mxu0 %v4409_v4  ;;  %4231 = vmatpush3.bf16.msra.mxu0 %v4423_v28 }
 0x356   :  { %4232 = vmatprep.subr.bf16.mxu0 %v4424_v42 }
 0x359   :  { %4233 = vmatpush3.bf16.msra.mxu0 %v4424_v42 }
 0x35a   :  { %4234 = vmatprep.subr.bf16.mxu0 %v4425_v6 }
 0x35c   :  { %4187 = vmatmul.mubr.bf16.gmra.mxu0 %v4410_v12 }
 0x35d   :  { %4190 = vmatprep.mubr.bf16.mxu0 %v4411_v47  ;;  %4235 = vmatpush3.bf16.msra.mxu0 %v4425_v6 }
 0x35e   :  { %4236 = vmatprep.subr.bf16.mxu0 %v4426_v19 }
 0x361   :  { %4237 = vmatpush3.bf16.msra.mxu0 %v4426_v19 }
 0x362   :  { %4238 = vmatprep.subr.bf16.mxu0 %v4427_v25 }
 0x364   :  { %4191 = vmatmul.mubr.bf16.gmra.mxu0 %v4412_v49 }
 0x365   :  { %4194 = vmatprep.mubr.bf16.mxu0 %v4413_v1  ;;  %4239 = vmatpush3.bf16.msra.mxu0 %v4427_v25 }
 0x366   :  { %4240 = vmatprep.subr.bf16.mxu0 %v4428_v26 }
 0x369   :  { %4241 = vmatpush3.bf16.msra.mxu0 %v4428_v26 }
 0x36a   :  { %4242 = vmatprep.subr.bf16.mxu0 %v4429_v29 }
 0x36c   :  { %4195 = vmatmul.mubr.bf16.gmra.mxu0 %v4414_v0 }
 0x36d   :  { %4243 = vmatpush3.bf16.msra.mxu0 %v4429_v29 }
 0x36e   :  { %4244 = vmatprep.subr.bf16.mxu0 %v4430_v61 }
 0x371   :  { %4245 = vmatpush3.bf16.msra.mxu0 %v4430_v61 }
 0x414   :  { %v4184_v45 = vpop.f32.mrf.mxu0 }
 0x416   :  { %v3085_v48 = vpop.f32.mrf.mxu0 }
 0x418   :  { %v4185_v54 = vpop.f32.mrf.mxu0 }
 0x419   :  { %v3149_v40 = vpack.c.bf16 %v4185_v54, %v4184_v45 }
 0x41a   :  { %v3088_v13 = vpop.f32.mrf.mxu0 }
 0x41b   :  { %v3148_v59 = vpack.c.bf16 %v3088_v13, %v3085_v48 }
 0x41c   :  { %v4188_v39 = vpop.f32.mrf.mxu0 }
 0x41d   :  { %4214 = vmatprep.mubr.bf16.mxu1 %v3148_v59 }
 0x41e   :  { %v3101_v62 = vpop.f32.mrf.mxu0  ;;  %4215 = vmatmul.mubr.bf16.vlgmr.msra.gmra.mxu1 %v3149_v40 }
 0x41f   :  { %4270 = vmatpush3.bf16.msra.mxu1 %v4423_v28 }
 0x420   :  { %v4189_v30 = vpop.f32.mrf.mxu0  ;;  %4263 = vmatprep.subr.bf16.mxu1 %v4424_v42 }
 0x421   :  { %v3151_v51 = vpack.c.bf16 %v4189_v30, %v4188_v39 }
 0x422   :  { %v3104_v50 = vpop.f32.mrf.mxu0 }
 0x423   :  { %v3150_v8 = vpack.c.bf16 %v3104_v50, %v3101_v62  ;;  %4271 = vmatpush3.bf16.msra.mxu1 %v4424_v42 }
 0x424   :  { %v4192_v14 = vpop.f32.mrf.mxu0  ;;  %4264 = vmatprep.subr.bf16.mxu1 %v4425_v6 }
 0x425   :  { %4218 = vmatprep.mubr.bf16.mxu1 %v3150_v8 }
 0x426   :  { %v3117_v34 = vpop.f32.mrf.mxu0  ;;  %4219 = vmatmul.mubr.bf16.gmra.mxu1 %v3151_v51 }
 0x427   :  { %4272 = vmatpush3.bf16.msra.mxu1 %v4425_v6 }
 0x428   :  { %v4193_v57 = vpop.f32.mrf.mxu0  ;;  %4265 = vmatprep.subr.bf16.mxu1 %v4426_v19 }
 0x429   :  { %v3153_v56 = vpack.c.bf16 %v4193_v57, %v4192_v14 }
 0x42a   :  { %v3120_v38 = vpop.f32.mrf.mxu0 }
 0x42b   :  { %v3152_v18 = vpack.c.bf16 %v3120_v38, %v3117_v34  ;;  %4273 = vmatpush3.bf16.msra.mxu1 %v4426_v19 }
 0x42c   :  { %v4196_v24 = vpop.f32.mrf.mxu0  ;;  %4266 = vmatprep.subr.bf16.mxu1 %v4427_v25 }
 0x42d   :  { %4222 = vmatprep.mubr.bf16.mxu1 %v3152_v18 }
 0x42e   :  { %v3133_v9 = vpop.f32.mrf.mxu0  ;;  %4223 = vmatmul.mubr.bf16.gmra.mxu1 %v3153_v56 }
 0x42f   :  { %4274 = vmatpush3.bf16.msra.mxu1 %v4427_v25 }
 0x430   :  { %v4197_v41 = vpop.f32.mrf.mxu0  ;;  %4267 = vmatprep.subr.bf16.mxu1 %v4428_v26 }
 0x431   :  { %v3155_v15 = vpack.c.bf16 %v4197_v41, %v4196_v24 }
 0x432   :  { %v3136_v3 = vpop.f32.mrf.mxu0 }
 0x433   :  { %v3154_v27 = vpack.c.bf16 %v3136_v3, %v3133_v9  ;;  %4275 = vmatpush3.bf16.msra.mxu1 %v4428_v26 }
 0x434   :  { %4268 = vmatprep.subr.bf16.mxu1 %v4429_v29 }
 0x435   :  { %4226 = vmatprep.mubr.bf16.mxu1 %v3154_v27 }
 0x436   :  { %4227 = vmatmul.mubr.bf16.gmra.mxu1 %v3155_v15 }
 0x437   :  { %4276 = vmatpush3.bf16.msra.mxu1 %v4429_v29 }
 0x438   :  { %4269 = vmatprep.subr.bf16.mxu1 %v4430_v61 }
 0x43b   :  { %4277 = vmatpush3.bf16.msra.mxu1 %v4430_v61 }
 0x4de   :  { %v4216_v22 = vpop.f32.mrf.mxu1 }
 0x4df   :  { %v6800_v36 = vadd.f32 %v4216_v22, %v6797_v20 }
 0x4e0   :  { %v3243_v11 = vpop.f32.mrf.mxu1 }
 0x4e1   :  { %v3324_v60 = vand.u32 2147483647, %v6800_v36  ;;  %v6804_v35 = vadd.f32 %v6797_v20, %v3243_v11  ;;  %v3308_v22 = vmax.f32 %v6800_v36, 0.0 }
 0x4e2   :  { %v4217_v53 = vpop.f32.mrf.mxu1 }
 0x4e3   :  { %v3340_v55 = vsub.f32 0.0, %v3324_v60  ;;  %v3322_v46 = vand.u32 2147483647, %v6804_v35  ;;  %v6808_v32 = vadd.f32 %v4217_v53, %v6797_v20  ;;  %v3306_v60 = vmax.f32 %v6804_v35, 0.0 }
 0x4e4   :  { %v3246_v10 = vpop.f32.mrf.mxu1 }
 0x4e5   :  { %v3358_v52 = vmul.f32 1.442695, %v3340_v55  ;;  %v3338_v21 = vsub.f32 0.0, %v3322_v46  ;;  %v3325_v43 = vand.u32 2147483647, %v6808_v32  ;;  %v6812_v17 = vadd.f32 %v6797_v20, %v3246_v10 }
 0x4e6   :  { %v4220_v7 = vpop.f32.mrf.mxu1  ;;  %v3309_v55 = vmax.f32 %v6808_v32, 0.0 }
 0x4e7   :  { %4559 = vpow2.f32 %v3358_v52  ;;  %v3354_v5 = vmul.f32 1.442695, %v3338_v21  ;;  %v3341_v37 = vsub.f32 0.0, %v3325_v43  ;;  %v6815_v23 = vadd.f32 %v4220_v7, %v6797_v20 }
 0x4e8   :  { %v3323_v63 = vand.u32 2147483647, %v6812_v17  ;;  %v3259_v16 = vpop.f32.mrf.mxu1  ;;  %v3307_v21 = vmax.f32 %v6812_v17, 0.0 }
 0x4e9   :  { %4561 = vpow2.f32 %v3354_v5  ;;  %v3360_v31 = vmul.f32 1.442695, %v3341_v37  ;;  %v3328_v58 = vand.u32 2147483647, %v6815_v23  ;;  %v6820_v4 = vadd.f32 %v6797_v20, %v3259_v16 }
 0x4ea   :  { %v3339_v33 = vsub.f32 0.0, %v3323_v63  ;;  %v4221_v12 = vpop.f32.mrf.mxu1  ;;  %v3312_v43 = vmax.f32 %v6815_v23, 0.0 }
 0x4eb   :  { %4563 = vpow2.f32 %v3360_v31  ;;  %v3344_v47 = vsub.f32 0.0, %v3328_v58  ;;  %v6823_v49 = vadd.f32 %v4221_v12, %v6797_v20  ;;  %v3326_v0 = vand.u32 2147483647, %v6820_v4 }
 0x4ec   :  { %v3356_v1 = vmul.f32 1.442695, %v3339_v33  ;;  %v3262_v44 = vpop.f32.mrf.mxu1  ;;  %v3310_v63 = vmax.f32 %v6820_v4, 0.0 }
 0x4ed   :  { %v3366_v2 = vmul.f32 1.442695, %v3344_v47  ;;  %v3329_v45 = vand.u32 2147483647, %v6823_v49  ;;  %v6828_v48 = vadd.f32 %v6797_v20, %v3262_v44  ;;  %v3342_v54 = vsub.f32 0.0, %v3326_v0 }
 0x4ee   :  { %4565 = vpow2.f32 %v3356_v1  ;;  %v4224_v13 = vpop.f32.mrf.mxu1 }
 0x4ef   :  { %v3345_v59 = vsub.f32 0.0, %v3329_v45  ;;  %v3327_v40 = vand.u32 2147483647, %v6828_v48  ;;  %4567 = vpow2.f32 %v3366_v2  ;;  %v3362_v39 = vmul.f32 1.442695, %v3342_v54 }
 0x4f0   :  { %v6832_v62 = vadd.f32 %v4224_v13, %v6797_v20  ;;  %v3275_v30 = vpop.f32.mrf.mxu1 }
 0x4f1   :  { %v3368_v50 = vmul.f32 1.442695, %v3345_v59  ;;  %v3343_v8 = vsub.f32 0.0, %v3327_v40  ;;  %v6835_v51 = vadd.f32 %v6797_v20, %v3275_v30  ;;  %4569 = vpow2.f32 %v3362_v39 }
 0x4f2   :  { %v3332_v34 = vand.u32 2147483647, %v6832_v62  ;;  %v4225_v38 = vpop.f32.mrf.mxu1  ;;  %v3313_v59 = vmax.f32 %v6823_v49, 0.0 }
 0x4f3   :  { %4571 = vpow2.f32 %v3368_v50  ;;  %v3364_v14 = vmul.f32 1.442695, %v3343_v8  ;;  %v3330_v18 = vand.u32 2147483647, %v6835_v51  ;;  %v6842_v41 = vadd.f32 %v4225_v38, %v6797_v20 }
 0x4f4   :  { %v4560_v57 = vpop.eup %4559  ;;  %v3348_v9 = vsub.f32 0.0, %v3332_v34  ;;  %v3278_v26 = vpop.f32.mrf.mxu1  ;;  %v3311_v50 = vmax.f32 %v6828_v48, 0.0 }
 0x4f5   :  { %4573 = vpow2.f32 %v3364_v14  ;;  %v3404_v24 = vadd.f32 1.0, %v4560_v57  ;;  %v3346_v28 = vsub.f32 0.0, %v3330_v18  ;;  %v3333_v19 = vand.u32 2147483647, %v6842_v41 }
 0x4f6   :  { %v6839_v56 = vpop.eup %4561  ;;  %v3374_v6 = vmul.f32 1.442695, %v3348_v9  ;;  %v3407_v11 = vmul.f32 -0.5, %v4560_v57  ;;  %v6860_v10 = vadd.f32 %v6797_v20, %v3278_v26  ;;  %v3410_v33 = vand.u32 2147483647, %v4560_v57  ;;  %v4228_v8 = vpop.f32.mrf.mxu1 }
 0x4f7   :  { %v3386_v27 = vadd.f32 1.0, %v6839_v56  ;;  %4575 = vlog2.f32 %v3404_v24  ;;  %v3370_v61 = vmul.f32 1.442695, %v3346_v28  ;;  %v3349_v46 = vsub.f32 0.0, %v3333_v19 }
 0x4f8   :  { %v6844_v3 = vpop.eup %4563  ;;  %v3389_v37 = vmul.f32 -0.5, %v6839_v56  ;;  %v3408_v58 = vadd.f32 1.0, %v3407_v11  ;;  %v3392_v12 = vand.u32 2147483647, %v6839_v56  ;;  %v3331_v0 = vand.u32 2147483647, %v6860_v10 }
 0x4f9   :  { %v3413_v15 = vadd.f32 1.0, %v6844_v3  ;;  %v3376_v1 = vmul.f32 1.442695, %v3349_v46  ;;  %v3416_v44 = vmul.f32 -0.5, %v6844_v3  ;;  %v3419_v2 = vand.u32 2147483647, %v6844_v3 }
 0x4fa   :  { %v3390_v54 = vadd.f32 1.0, %v3389_v37  ;;  %v3409_v40 = vmul.f32 %v4560_v57, %v3408_v58  ;;  %vm6881_vm1 = vcmp.lt.f32.partialorder %v3410_v33, 0.0004427343  ;;  %v3347_v18 = vsub.f32 0.0, %v3331_v0 }
 0x4fb   :  { %v6848_v42 = vpop.eup %4565  ;;  %4577 = vlog2.f32 %v3413_v15  ;;  %vm6889_vm2 = vcmp.lt.f32.partialorder %v3392_v12, 0.0004427343  ;;  %v3417_v57 = vadd.f32 1.0, %v3416_v44  ;;  %vm6893_vm3 = vcmp.lt.f32.partialorder %v3419_v2, 0.0004427343 }
 0x4fc   :  { %4579 = vlog2.f32 %v3386_v27  ;;  %v3395_v25 = vadd.f32 1.0, %v6848_v42  ;;  %v6852_v29 = vpop.eup %4567  ;;  %v3398_v45 = vmul.f32 -0.5, %v6848_v42  ;;  %v3401_v13 = vand.u32 2147483647, %v6848_v42 }
 0x4fd   :  { %v3440_v7 = vadd.f32 1.0, %v6852_v29  ;;  %v3443_v34 = vmul.f32 -0.5, %v6852_v29 }
 0x4fe   :  { %4581 = vlog2.f32 %v3395_v25  ;;  %v6856_v53 = vpop.eup %4569  ;;  %v3399_v15 = vadd.f32 1.0, %v3398_v45  ;;  %vm6898_vm4 = vcmp.lt.f32.partialorder %v3401_v13, 0.0004427343  ;;  %v3446_v25 = vand.u32 2147483647, %v6852_v29 }
 0x4ff   :  { %4583 = vpow2.f32 %v3374_v6  ;;  %v3422_v5 = vadd.f32 1.0, %v6856_v53  ;;  %v3425_v30 = vmul.f32 -0.5, %v6856_v53  ;;  %v3391_v6 = vmul.f32 %v6839_v56, %v3390_v54 }
 0x500   :  { %v6862_v52 = vpop.eup %4571  ;;  %4585 = vpow2.f32 %v3370_v61  ;;  %v3428_v26 = vand.u32 2147483647, %v6856_v53  ;;  %v3444_v58 = vadd.f32 1.0, %v3443_v34  ;;  %v3372_v56 = vmul.f32 1.442695, %v3347_v18 }
 0x501   :  { %v3449_v16 = vadd.f32 1.0, %v6862_v52  ;;  %4587 = vlog2.f32 %v3422_v5  ;;  %v3452_v38 = vmul.f32 -0.5, %v6862_v52  ;;  %v3426_v11 = vadd.f32 1.0, %v3425_v30  ;;  %v3291_v5 = vpop.f32.mrf.mxu1 }
 0x502   :  { %v6871_v31 = vpop.eup %4573  ;;  %v3455_v46 = vand.u32 2147483647, %v6862_v52  ;;  %v3400_v2 = vmul.f32 %v6848_v42, %v3399_v15  ;;  %vm6911_vm5 = vcmp.lt.f32.partialorder %v3428_v26, 0.0004427343  ;;  %v6916_v54 = vadd.f32 %v4228_v8, %v6797_v20 }
 0x503   :  { %4589 = vlog2.f32 %v3449_v16  ;;  %v3431_v47 = vadd.f32 1.0, %v6871_v31  ;;  %v3453_v33 = vadd.f32 1.0, %v3452_v38  ;;  %v3437_v44 = vand.u32 2147483647, %v6871_v31  ;;  %v4229_v42 = vpop.f32.mrf.mxu1 }
 0x504   :  { %4591 = vlog2.f32 %v3440_v7  ;;  %v4576_v14 = vpop.eup %4575  ;;  %v3434_v7 = vmul.f32 -0.5, %v6871_v31  ;;  %v6924_v34 = vadd.f32 %v6797_v20, %v3291_v5  ;;  %vm6930_vm6 = vcmp.lt.f32.partialorder %v3455_v46, 0.0004427343 }
 0x505   :  { %4593 = vlog2.f32 %v3431_v47  ;;  %v3406_v61 = vmul.f32 0.6931472, %v4576_v14  ;;  %vm6939_vm7 = vcmp.lt.f32.partialorder %v3437_v44, 0.0004427343  ;;  %v6947_v46 = vadd.f32 %v4229_v42, %v6797_v20 }
 0x506   :  { %4595 = vpow2.f32 %v3376_v1  ;;  %v3418_v1 = vmul.f32 %v6844_v3, %v3417_v57  ;;  %v3427_v3 = vmul.f32 %v6856_v53, %v3426_v11  ;;  %v3435_v14 = vadd.f32 1.0, %v3434_v7 }
 0x507   :  { %4597 = vpow2.f32 %v3372_v56  ;;  %v3412_v30 = vsel %vm6881_vm1, %v3409_v40, %v3406_v61  ;;  %v3336_v53 = vand.u32 2147483647, %v6916_v54  ;;  %v3334_v5 = vand.u32 2147483647, %v6924_v34 }
 0x508   :  { %v4578_v24 = vpop.eup %4577  ;;  %v3532_v26 = vadd.f32 %v3412_v30, %v3308_v22  ;;  %v3337_v17 = vand.u32 2147483647, %v6947_v46  ;;  %vm3447_vm12 = vcmp.lt.f32.partialorder %v3446_v25, 0.0004427343 }
 0x509   :  { %v4580_v28 = vpop.eup %4579  ;;  %v3415_v16 = vmul.f32 0.6931472, %v4578_v24  ;;  %v3352_v11 = vsub.f32 0.0, %v3336_v53  ;;  %v3350_v56 = vsub.f32 0.0, %v3334_v5 }
 0x50a   :  { %v3388_v47 = vmul.f32 0.6931472, %v4580_v28  ;;  %v3454_v28 = vmul.f32 %v6862_v52, %v3453_v33  ;;  %v3353_v45 = vsub.f32 0.0, %v3337_v17  ;;  %v3903_v42 = vadd.f32 -0.6931472, %v3532_v26 }
 0x50b   :  { %v4582_v37 = vpop.eup %4581  ;;  %v3421_v18 = vsel %vm6893_vm3, %v3418_v1, %v3415_v16  ;;  %v3294_v16 = vpop.f32.mrf.mxu1  ;;  %v3320_v17 = vmax.f32 %v6916_v54, 0.0  ;;  %v3917_v54 = vld [vmem:[%s7047_s6 + $0x3] ss:$0 sm:$0xff]  ;;  %s4721_s6 = smov [#allocation8]  }
 0x50c   :  { %v6906_v12 = vpop.eup %4583  ;;  %v3397_v0 = vmul.f32 0.6931472, %v4582_v37  ;;  %v3394_v57 = vsel %vm6889_vm2, %v3391_v6, %v3388_v47  ;;  %v3533_v9 = vadd.f32 %v3421_v18, %v3309_v55  ;;  %v3436_v6 = vmul.f32 %v6871_v31, %v3435_v14  ;;  %s3741_s30 = sshll.u32 %s4721_s6, 4  ;;  %s3742_s30 = int_to_ptr.vmem [resolvable:$true] %s3741_s30 }
 0x50d   :  { %v6918_v13 = vpop.eup %4585  ;;  %v3476_v40 = vadd.f32 1.0, %v6906_v12  ;;  %v3530_v36 = vadd.f32 %v3394_v57, %v3306_v60  ;;  %v3382_v55 = vmul.f32 1.442695, %v3352_v11  ;;  %v3479_v53 = vmul.f32 -0.5, %v6906_v12  ;;  %s4683_s8 = scalar_lea.vmem %s3742_s30, 2048  ;;  %p4688_p2 = scmp.lt.s32.totalorder %s3742_s30, %s3742_s30 }
 0x50e   :  { %v4588_v38 = vpop.eup %4587  ;;  %v3403_v8 = vsel %vm6898_vm4, %v3400_v2, %v3397_v0  ;;  %v3458_v61 = vadd.f32 1.0, %v6918_v13  ;;  %v3904_v60 = vadd.f32 -0.6931472, %v3533_v9  ;;  %v6968_v0 = vadd.f32 %v6797_v20, %v3294_v16  ;;  %p4684_p1 = scmp.ne.s32.totalorder %s3742_s30, %s4683_s8  ;;  %p4689_p3 = scmp.lt.s32.totalorder %s4683_s8, %s4683_s8 }
 0x50f   :  { %v3424_v15 = vmul.f32 0.6931472, %v4588_v38  ;;  %v3531_v52 = vadd.f32 %v3403_v8, %v3307_v21  ;;  %4599 = vlog2.f32 %v3476_v40  ;;  %v3378_v2 = vmul.f32 1.442695, %v3350_v56 }
 0x510   :  { %v4590_v39 = vpop.eup %4589  ;;  %4601 = vlog2.f32 %v3458_v61  ;;  %v3901_v30 = vadd.f32 -0.6931472, %v3530_v36  ;;  %v3563_v18 = vpack.c.bf16 %v3904_v60, %v3903_v42  ;;  %v3461_v49 = vmul.f32 -0.5, %v6918_v13  ;;  %p4690_p4 = por %p4689_p3, %p4688_p2 }
 0x511   :  { %v4592_v19 = vpop.eup %4591  ;;  %v3451_v22 = vmul.f32 0.6931472, %v4590_v39  ;;  %v3430_v32 = vsel %vm6911_vm5, %v3427_v3, %v3424_v15  ;;  %v3902_v47 = vadd.f32 -0.6931472, %v3531_v52  ;;  %v3445_v3 = vmul.f32 %v6852_v29, %v3444_v58 }
 0x512   :  { %v4594_v7 = vpop.eup %4593  ;;  %v3442_v21 = vmul.f32 0.6931472, %v4592_v19  ;;  %v3534_v44 = vadd.f32 %v3430_v32, %v3310_v63  ;;  %v3384_v63 = vmul.f32 1.442695, %v3353_v45  ;;  %v3480_v19 = vadd.f32 1.0, %v3479_v53  ;;  %p4691_p5 = pnand %p4690_p4, %p4684_p1 }
 0x513   :  { %v3433_v37 = vmul.f32 0.6931472, %v4594_v7  ;;  %v6957_v33 = vpop.eup %4595  ;;  %v3457_v14 = vsel %vm6930_vm6, %v3454_v28, %v3451_v22  ;;  %v3562_v38 = vpack.c.bf16 %v3902_v47, %v3901_v30  ;;  %v3462_v23 = vadd.f32 1.0, %v3461_v49 }
 0x514   :  { %v3485_v35 = vadd.f32 1.0, %v6957_v33  ;;  %v6977_v20 = vpop.eup %4597  ;;  %v3448_v4 = vsel %vm3447_vm12, %v3445_v3, %v3442_v21  ;;  %v3905_v8 = vadd.f32 -0.6931472, %v3534_v44  ;;  %v3537_v58 = vadd.f32 %v3457_v14, %v3313_v59 }
 0x515   :  { %v3439_v31 = vsel %vm6939_vm7, %v3436_v6, %v3433_v37  ;;  %v3467_v24 = vadd.f32 1.0, %v6977_v20  ;;  %4246 = vmatprep.mubr.bf16.mxu0 %v3562_v38  ;;  %v3536_v29 = vadd.f32 %v3448_v4, %v3312_v43  ;;  %v3488_v39 = vmul.f32 -0.5, %v6957_v33 }
 0x516   :  { %v3535_v1 = vadd.f32 %v3439_v31, %v3311_v50  ;;  %4603 = vlog2.f32 %v3485_v35  ;;  %v3335_v50 = vand.u32 2147483647, %v6968_v0  ;;  %4247 = vmatmul.mubr.bf16.vlgmr.msra.gmra.mxu0 %v3563_v18  ;;  %v3908_v15 = vadd.f32 -0.6931472, %v3537_v58 }
 0x517   :  { %4605 = vpow2.f32 %v3382_v55  ;;  %v3907_v28 = vadd.f32 -0.6931472, %v3536_v29  ;;  %v3489_v26 = vadd.f32 1.0, %v3488_v39  ;;  %v3491_v43 = vand.u32 2147483647, %v6957_v33 }
 0x518   :  { %v3906_v48 = vadd.f32 -0.6931472, %v3535_v1  ;;  %4607 = vpow2.f32 %v3378_v2  ;;  %v3351_v40 = vsub.f32 0.0, %v3335_v50  ;;  %v3470_v61 = vmul.f32 -0.5, %v6977_v20 }
 0x519   :  { %4609 = vpow2.f32 %v3384_v63  ;;  %v3565_v11 = vpack.c.bf16 %v3908_v15, %v3907_v28  ;;  %v3464_v9 = vand.u32 2147483647, %v6918_v13  ;;  %v3482_v6 = vand.u32 2147483647, %v6906_v12 }
 0x51a   :  { %4611 = vlog2.f32 %v3467_v24  ;;  %v3564_v25 = vpack.c.bf16 %v3906_v48, %v3905_v8  ;;  %v3380_v57 = vmul.f32 1.442695, %v3351_v40  ;;  %v3481_v16 = vmul.f32 %v6906_v12, %v3480_v19 }
 0x51b   :  { %v3490_v32 = vmul.f32 %v6957_v33, %v3489_v26  ;;  %v3463_v56 = vmul.f32 %v6918_v13, %v3462_v23  ;;  %vm7000_vm8 = vcmp.lt.f32.partialorder %v3491_v43, 0.0004427343  ;;  %v3471_v21 = vadd.f32 1.0, %v3470_v61 }
 0x51c   :  { %4250 = vmatprep.mubr.bf16.mxu0 %v3564_v25  ;;  %v4600_v59 = vpop.eup %4599  ;;  %4613 = vpow2.f32 %v3380_v57  ;;  %vm7005_vm9 = vcmp.lt.f32.partialorder %v3464_v9, 0.0004427343  ;;  %v3473_v33 = vand.u32 2147483647, %v6977_v20  ;;  %vm7012_vm10 = vcmp.lt.f32.partialorder %v3482_v6, 0.0004427343 }
 0x51d   :  { %v4602_v27 = vpop.eup %4601  ;;  %v3478_v37 = vmul.f32 0.6931472, %v4600_v59  ;;  %v3317_v1 = vmax.f32 %v6842_v41, 0.0  ;;  %v3314_v45 = vmax.f32 %v6835_v51, 0.0  ;;  %v3316_v3 = vmax.f32 %v6832_v62, 0.0 }
 0x51e   :  { %v3460_v5 = vmul.f32 0.6931472, %v4602_v27  ;;  %4251 = vmatmul.mubr.bf16.gmra.mxu0 %v3565_v11  ;;  %v3472_v48 = vmul.f32 %v6977_v20, %v3471_v21  ;;  %v3315_v63 = vmax.f32 %v6860_v10, 0.0  ;;  %vm3474_vm11 = vcmp.lt.f32.partialorder %v3473_v33, 0.0004427343 }
 0x51f   :  { %v3484_v2 = vsel %vm7012_vm10, %v3481_v16, %v3478_v37  ;;  %v3321_v37 = vmax.f32 %v6947_v46, 0.0 }
 0x520   :  { %v3466_v47 = vsel %vm7005_vm9, %v3463_v56, %v3460_v5  ;;  %v3540_v50 = vadd.f32 %v3484_v2, %v3316_v3  ;;  %v3318_v56 = vmax.f32 %v6924_v34, 0.0 }
 0x521   :  { %v3538_v4 = vadd.f32 %v3466_v47, %v3314_v45 }
 0x522   :  { %v3911_v40 = vadd.f32 -0.6931472, %v3540_v50 }
 0x523   :  { %v4604_v7 = vpop.eup %4603  ;;  %v3909_v24 = vadd.f32 -0.6931472, %v3538_v4 }
 0x524   :  { %v6991_v52 = vpop.eup %4605  ;;  %v3487_v36 = vmul.f32 0.6931472, %v4604_v7 }
 0x525   :  { %v6994_v22 = vpop.eup %4607  ;;  %v3512_v55 = vadd.f32 1.0, %v6991_v52  ;;  %v3515_v53 = vmul.f32 -0.5, %v6991_v52  ;;  %v3518_v19 = vand.u32 2147483647, %v6991_v52 }
 0x526   :  { %v3494_v31 = vadd.f32 1.0, %v6994_v22  ;;  %v3493_v12 = vsel %vm7000_vm8, %v3490_v32, %v3487_v36  ;;  %v4610_v60 = vpop.eup %4609  ;;  %v3497_v62 = vmul.f32 -0.5, %v6994_v22  ;;  %v3500_v28 = vand.u32 2147483647, %v6994_v22 }
 0x527   :  { %4615 = vlog2.f32 %v3512_v55  ;;  %v4612_v44 = vpop.eup %4611  ;;  %v3521_v30 = vadd.f32 1.0, %v4610_v60  ;;  %v3541_v14 = vadd.f32 %v3493_v12, %v3317_v1  ;;  %v3524_v29 = vmul.f32 -0.5, %v4610_v60 }
 0x528   :  { %4617 = vlog2.f32 %v3494_v31  ;;  %v3469_v42 = vmul.f32 0.6931472, %v4612_v44  ;;  %v3498_v57 = vadd.f32 1.0, %v3497_v62  ;;  %v3516_v59 = vadd.f32 1.0, %v3515_v53 }
 0x529   :  { %4619 = vlog2.f32 %v3521_v30  ;;  %v4614_v41 = vpop.eup %4613  ;;  %v3912_v58 = vadd.f32 -0.6931472, %v3541_v14  ;;  %v3525_v15 = vadd.f32 1.0, %v3524_v29  ;;  %v3527_v27 = vand.u32 2147483647, %v4610_v60 }
 0x52a   :  { %v3475_v38 = vsel %vm3474_vm11, %v3472_v48, %v3469_v42  ;;  %v3503_v8 = vadd.f32 1.0, %v4614_v41  ;;  %v3506_v49 = vmul.f32 -0.5, %v4614_v41  ;;  %v3499_v61 = vmul.f32 %v6994_v22, %v3498_v57 }
 0x52b   :  { %v3539_v18 = vadd.f32 %v3475_v38, %v3315_v63  ;;  %v3567_v20 = vpack.c.bf16 %v3912_v58, %v3911_v40  ;;  %v3526_v7 = vmul.f32 %v4610_v60, %v3525_v15  ;;  %v3517_v6 = vmul.f32 %v6991_v52, %v3516_v59 }
 0x52c   :  { %4621 = vlog2.f32 %v3503_v8  ;;  %v3507_v9 = vadd.f32 1.0, %v3506_v49  ;;  %vm3501_vm13 = vcmp.lt.f32.partialorder %v3500_v28, 0.0004427343  ;;  %vm3528_vm14 = vcmp.lt.f32.partialorder %v3527_v27, 0.0004427343 }
 0x52d   :  { %v3910_v51 = vadd.f32 -0.6931472, %v3539_v18  ;;  %v3509_v5 = vand.u32 2147483647, %v4614_v41  ;;  %vm3519_vm15 = vcmp.lt.f32.partialorder %v3518_v19, 0.0004427343 }
 0x52e   :  { %v3508_v31 = vmul.f32 %v4614_v41, %v3507_v9  ;;  %v3319_v52 = vmax.f32 %v6968_v0, 0.0 }
 0x52f   :  { %v3566_v25 = vpack.c.bf16 %v3910_v51, %v3909_v24  ;;  %vm3510_vm0 = vcmp.lt.f32.partialorder %v3509_v5, 0.0004427343 }
 0x531   :  { %4254 = vmatprep.mubr.bf16.mxu1 %v3566_v25 }
 0x532   :  { %4255 = vmatmul.mubr.bf16.vlgmr.msra.gmra.mxu1 %v3567_v20 }
 0x534   :  { %v4616_v10 = vpop.eup %4615 }
 0x535   :  { %v4618_v39 = vpop.eup %4617  ;;  %v3514_v43 = vmul.f32 0.6931472, %v4616_v10 }
 0x536   :  { %v3496_v26 = vmul.f32 0.6931472, %v4618_v39  ;;  %v4620_v23 = vpop.eup %4619 }
 0x537   :  { %v3523_v11 = vmul.f32 0.6931472, %v4620_v23  ;;  %v3520_v55 = vsel %vm3519_vm15, %v3517_v6, %v3514_v43 }
 0x538   :  { %v3502_v36 = vsel %vm3501_vm13, %v3499_v61, %v3496_v26  ;;  %v3544_v12 = vadd.f32 %v3520_v55, %v3320_v17 }
 0x539   :  { %v3529_v16 = vsel %vm3528_vm14, %v3526_v7, %v3523_v11  ;;  %v4622_v32 = vpop.eup %4621  ;;  %v3542_v35 = vadd.f32 %v3502_v36, %v3318_v56 }
 0x53a   :  { %v3545_v22 = vadd.f32 %v3529_v16, %v3321_v37  ;;  %v3505_v21 = vmul.f32 0.6931472, %v4622_v32  ;;  %v3915_v1 = vadd.f32 -0.6931472, %v3544_v12 }
 0x53b   :  { %v3913_v47 = vadd.f32 -0.6931472, %v3542_v35 }
 0x53c   :  { %v3511_v33 = vsel %vm3510_vm0, %v3508_v31, %v3505_v21  ;;  %v3916_v13 = vadd.f32 -0.6931472, %v3545_v22 }
 0x53d   :  { %v3543_v60 = vadd.f32 %v3511_v33, %v3319_v52 }
 0x53e   :  { %v3569_v2 = vpack.c.bf16 %v3916_v13, %v3915_v1 }
 0x53f   :  { %v3914_v46 = vadd.f32 -0.6931472, %v3543_v60 }
 0x541   :  { %v3568_v44 = vpack.c.bf16 %v3914_v46, %v3913_v47 }
 0x543   :  { %4258 = vmatprep.mubr.bf16.mxu1 %v3568_v44 }
 0x544   :  { %4259 = vmatmul.mubr.bf16.gmra.mxu1 %v3569_v2 }
 0x5d6   :  { %v4248_v34 = vpop.f32.mrf.mxu0 }
 0x5d7   :  { %v3666_v45 = vadd.f32 %v4248_v34, %v3917_v54 }
 0x5d8   :  { %v3657_v30 = vpop.f32.mrf.mxu0 }
 0x5d9   :  { %3722 = vst [vmem:[#allocation8 + $0x10] sm:$0xff] %v3666_v45  ;;  %v3658_v0 = vadd.f32 %v3917_v54, %v3657_v30 }
 0x5da   :  { %v4249_v3 = vpop.f32.mrf.mxu0 }
 0x5db   :  { %3720 = vst [vmem:[#allocation8] sm:$0xff] %v3658_v0  ;;  %v3669_v14 = vadd.f32 %v4249_v3, %v3917_v54 }
 0x5dc   :  { %v3660_v42 = vpop.f32.mrf.mxu0 }
 0x5dd   :  { %3723 = vst [vmem:[#allocation8 + $0x18] sm:$0xff] %v3669_v14  ;;  %v3661_v48 = vadd.f32 %v3917_v54, %v3660_v42 }
 0x5de   :  { %v4252_v4 = vpop.f32.mrf.mxu0 }
 0x5df   :  { %3721 = vst [vmem:[#allocation8 + $0x8] sm:$0xff] %v3661_v48  ;;  %v3682_v63 = vadd.f32 %v4252_v4, %v3917_v54 }
 0x5e0   :  { %v3673_v41 = vpop.f32.mrf.mxu0 }
 0x5e1   :  { %3726 = vst [vmem:[#allocation8 + $0x30] sm:$0xff] %v3682_v63  ;;  %v3674_v50 = vadd.f32 %v3917_v54, %v3673_v41 }
 0x5e2   :  { %v4253_v38 = vpop.f32.mrf.mxu0 }
 0x5e3   :  { %3724 = vst [vmem:[#allocation8 + $0x20] sm:$0xff] %v3674_v50  ;;  %v3685_v18 = vadd.f32 %v4253_v38, %v3917_v54 }
 0x5e4   :  { %v3676_v8 = vpop.f32.mrf.mxu0 }
 0x5e5   :  { %3727 = vst [vmem:[#allocation8 + $0x38] sm:$0xff] %v3685_v18  ;;  %v3677_v58 = vadd.f32 %v3917_v54, %v3676_v8 }
 0x5e7   :  { %3725 = vst [vmem:[#allocation8 + $0x28] sm:$0xff] %v3677_v58 }
 0x5f2   :  { %v4256_v24 = vpop.f32.mrf.mxu1 }
 0x5f3   :  { %v3698_v51 = vadd.f32 %v4256_v24, %v3917_v54 }
 0x5f4   :  { %v3689_v40 = vpop.f32.mrf.mxu1 }
 0x5f5   :  { %3730 = vst [vmem:[#allocation8 + $0x50] sm:$0xff] %v3698_v51  ;;  %v3690_v62 = vadd.f32 %v3917_v54, %v3689_v40 }
 0x5f6   :  { %v4257_v29 = vpop.f32.mrf.mxu1 }
 0x5f7   :  { %3728 = vst [vmem:[#allocation8 + $0x40] sm:$0xff] %v3690_v62  ;;  %v3701_v25 = vadd.f32 %v4257_v29, %v3917_v54 }
 0x5f8   :  { %v3692_v20 = vpop.f32.mrf.mxu1 }
 0x5f9   :  { %3731 = vst [vmem:[#allocation8 + $0x58] sm:$0xff] %v3701_v25  ;;  %v3693_v53 = vadd.f32 %v3917_v54, %v3692_v20 }
 0x5fb   :  { %3729 = vst [vmem:[#allocation8 + $0x48] sm:$0xff] %v3693_v53 }
 0x604   :  { %v4260_v10 = vpop.f32.mrf.mxu1 }
 0x605   :  { %v3714_v39 = vadd.f32 %v4260_v10, %v3917_v54 }
 0x606   :  { %v3705_v57 = vpop.f32.mrf.mxu1 }
 0x607   :  { %3734 = vst [vmem:[#allocation8 + $0x70] sm:$0xff] %v3714_v39  ;;  %v3706_v15 = vadd.f32 %v3917_v54, %v3705_v57 }
 0x608   :  { %v4261_v49 = vpop.f32.mrf.mxu1 }
 0x609   :  { %3732 = vst [vmem:[#allocation8 + $0x60] sm:$0xff] %v3706_v15  ;;  %v3717_v59 = vadd.f32 %v4261_v49, %v3917_v54 }
 0x60a   :  { %v3708_v28 = vpop.f32.mrf.mxu1 }
 0x60b   :  { %3735 = vst [vmem:[#allocation8 + $0x78] sm:$0xff] %v3717_v59  ;;  %v3709_v27 = vadd.f32 %v3917_v54, %v3708_v28 }
 0x60d   :  { %3733 = vst [vmem:[#allocation8 + $0x68] sm:$0xff] %v3709_v27 }
 0x60e   :  { %4694 = shalt.err (!%p4691_p5)
}
 0x60f   :  { %s4722_s9 = smov 128   ;;  %s4723_s10 = smov 8  }
 0x610   :  { %3747 = dma.vmem_to_hbm [thread:$0]  %s3742_s30, 2048, %s7048_s7, [#allocation4], %s4722_s9, %s4722_s9, %s4723_s10  }
 0x611   :  { %4707 = dma.done.wait [#allocation4], 2048  }
 0x612   :  { %4708 = vsyncadd [#allocation4], 4294965248 }
 0x613   :  { %3751 = vsyncpa [#allocation3], 1 }
 0x614   :  { %3752 = vsyncpa [#allocation6], 1 }
 0x615   :  { %3753 = vsyncpa [#allocation4], 1 }

</bundles_post_ra>
